<compile_context>
chip_gen: v5e
topology: v5e:2x2
jax: 0.10.0
libtpu: 0.0.40
codegen_flags: <defaults>
</compile_context>

<pallas_src>
import functools

import numpy as np

import jax
import jax.numpy as jnp
from jax.experimental import pallas as pl
from jax.experimental.pallas import tpu as pltpu

_BIG = 1e9  # >> max possible squared pixel distance


# --------------------------------------------------------------------------
# Per-sample fused kernel: sigmoid + threshold masks + squared-EDT (min-plus)
# + weighted partial sum.
# --------------------------------------------------------------------------
def _hausdorff_kernel(pm_ref, lm_ref, loss_ref, *,
                      alpha, threshold, logit_thr, scale):
    # pm: (1, hw, 4) sublane-major: channels [pred logits, gt, pix-row, pix-col]
    #                (q / candidate-pixel axis on sublanes)
    # lm: (1, 4, hw) lane-major, same channels (p / target-pixel axis on lanes)
    pm = pm_ref[0]                                    # (hw, 4)
    lm = lm_ref[0]                                    # (4, hw)

    # --- boolean masks (no float casts).  sigmoid(x) > t <=> x > logit(t)
    # (0 < t < 1), so sigmoid is only evaluated once, lane-dense, for the
    # loss term below.
    pc_mask_q = pm[:, 0:1] > logit_thr                # (hw, 1) bool
    gt_mask_q = pm[:, 1:2] > threshold                # (hw, 1) bool
    pc_mask_p = lm[0:1, :] > logit_thr                # (1, hw) bool
    gt_mask_p = lm[1:2, :] > threshold                # (1, hw) bool

    # --- pairwise squared pixel distances rebuilt in-kernel (no HBM table) --
    dr = pm[:, 2:3] - lm[2:3, :]                      # (hw, hw)
    dc = pm[:, 3:4] - lm[3:4, :]                      # (hw, hw)
    d2 = dr * dr + dc * dc                            # exact (<= (h-1)^2+(w-1)^2)

    def sq_edt(mask_q, mask_p):
        # Squared distance from each pixel p (lanes) to the nearest pixel q
        # (sublanes) of the opposite class == (EDT(mask) + EDT(~mask))**2.
        opposite = mask_q != mask_p                   # broadcasted XOR, (hw, hw) bool
        cost = jnp.where(opposite, d2, _BIG)
        sqd = jnp.min(cost, axis=0, keepdims=True)    # sublane reduce -> (1, hw)
        # TODO(synk): scipy's EDT is ill-defined when the mask holds a single
        # class; we define the distance map as 0 in that degenerate case.
        return jnp.where(sqd > 0.5 * _BIG, 0.0, sqd)

    pc_sqd = sq_edt(pc_mask_q, pc_mask_p)             # d2 shared by both passes
    gt_sqd = sq_edt(gt_mask_q, gt_mask_p)

    if alpha == 2.0:
        dist = pc_sqd + gt_sqd                        # squared EDT == dist**alpha, exact
    else:
        dist = pc_sqd ** (0.5 * alpha) + gt_sqd ** (0.5 * alpha)

    # --- loss term in the lane-dense row layout, one final reduction --------
    pc = jax.nn.sigmoid(lm[0:1, :])                   # (1, hw) soft probabilities
    err = (lm[1:2, :] - pc) * (lm[1:2, :] - pc)       # (1, hw)
    partial = jnp.sum(err * dist) * scale             # scale = 1/(N*H*W*omega)
    loss_ref[...] = jnp.zeros((1, 1, 1), jnp.float32) + partial


# --------------------------------------------------------------------------
# Wrapper: layout glue (channel-0 slice, flatten to lane-dense H*W, both
# orientations with coordinate channels) + one pallas_call gridded over batch.
# --------------------------------------------------------------------------
@functools.partial(jax.jit, static_argnames=("alpha", "omega", "threshold"))
def hausdorff_binary_loss(net_output, target, *, alpha=2.0, omega=256 * 256,
                          threshold=0.5):
    if not (0.0 < threshold < 1.0):
        raise ValueError("threshold must lie in (0, 1) for the logit shortcut")
    n, _, h, w = net_output.shape
    hw = h * w

    pred = net_output[:, 0].reshape(n, hw).astype(jnp.float32)   # logits, (n, hw)
    gt = target[:, 0].reshape(n, hw).astype(jnp.float32)         # (n, hw)

    # Pixel coordinates as two extra channels (exact small f32, constant-folded).
    row = jnp.repeat(jnp.arange(h, dtype=jnp.float32), w)        # (hw,)
    col = jnp.tile(jnp.arange(w, dtype=jnp.float32), h)          # (hw,)
    rowb = jnp.broadcast_to(row, (n, hw))
    colb = jnp.broadcast_to(col, (n, hw))

    lm = jnp.stack([pred, gt, rowb, colb], axis=1)               # (n, 4, hw)  lane-major
    pm = jnp.stack([pred, gt, rowb, colb], axis=2)               # (n, hw, 4)  sublane-major

    logit_thr = float(np.log(threshold / (1.0 - threshold)))
    scale = 1.0 / (float(n) * float(hw) * float(omega))

    kern = functools.partial(_hausdorff_kernel, alpha=float(alpha),
                             threshold=float(threshold), logit_thr=logit_thr,
                             scale=scale)

    partials = pl.pallas_call(
        kern,
        out_shape=jax.ShapeDtypeStruct((n, 1, 1), jnp.float32),
        grid_spec=pltpu.PrefetchScalarGridSpec(
            num_scalar_prefetch=0,
            grid=(n,),
            in_specs=[pl.BlockSpec((1, hw, 4), lambda b: (b, 0, 0)),
                      pl.BlockSpec((1, 4, hw), lambda b: (b, 0, 0))],
            out_specs=pl.BlockSpec((1, 1, 1), lambda b: (b, 0, 0))),
        compiler_params=pltpu.CompilerParams(
            dimension_semantics=("parallel",)),
    )(pm, lm)
    return jnp.sum(partials)


# --------------------------------------------------------------------------
# Pure-numpy reference (same math: brute-force squared EDT == scipy EDT for
# non-degenerate masks).  Used only to validate the kernel in __main__.
# --------------------------------------------------------------------------
def _reference_loss(net_output, target, alpha=2.0, omega=256 * 256, threshold=0.5):
    net = np.asarray(net_output, dtype=np.float64)
    tgt = np.asarray(target, dtype=np.float64)
    pc = 1.0 / (1.0 + np.exp(-net[:, 0]))
    gt = tgt[:, 0]
    n, h, w = pc.shape
    ii, jj = np.meshgrid(np.arange(h), np.arange(w), indexing="ij")
    coords = np.stack([ii.ravel(), jj.ravel()], axis=-1).astype(np.float64)
    d2 = ((coords[:, None, :] - coords[None, :, :]) ** 2).sum(-1)

    def sq_edt(mask_flat):
        same = mask_flat[:, None] == mask_flat[None, :]
        m = (d2 + np.where(same, 1e9, 0.0)).min(axis=-1)
        return np.where(m >= 5e8, 0.0, m)

    total = 0.0
    for b in range(n):
        pc_sqd = sq_edt(pc[b].ravel() > threshold)
        gt_sqd = sq_edt(gt[b].ravel() > threshold)
        dist = pc_sqd ** (alpha / 2.0) + gt_sqd ** (alpha / 2.0)
        pred_error = (gt[b].ravel() - pc[b].ravel()) ** 2
        total += float((pred_error * dist).sum())
    return total / (n * h * w) / omega


if __name__ == "__main__":
    N, C, H, W = 2, 1, 16, 16

    key = jax.random.PRNGKey(0)
    logits = jax.random.normal(key, (N, C, H, W), dtype=jnp.float32)
    # Keep logits away from the 0.5-probability boundary so the hard masks are
    # numerically unambiguous between the kernel and the reference.
    logits = jnp.where(jnp.abs(logits) < 0.05, 0.5, logits)

    # Deterministic structured binary ground-truth masks.
    ii = jnp.arange(H)[:, None]
    jj = jnp.arange(W)[None, :]
    gt0 = (((ii - 8) ** 2 + (jj - 8) ** 2) <= 20).astype(jnp.float32)
    gt1 = ((ii >= 3) & (ii < 12) & (jj >= 4) & (jj < 13)).astype(jnp.float32)
    target = jnp.stack([gt0, gt1], axis=0)[:, None]   # (N, 1, H, W)

    loss = hausdorff_binary_loss(logits, target)
    loss = jax.block_until_ready(loss)

    ref = _reference_loss(np.asarray(logits), np.asarray(target))
    np.testing.assert_allclose(float(loss), float(ref), rtol=5e-3, atol=1e-8)
    print("KERNEL_OK")
</pallas_src>

<mosaic_0001>
module attributes {stable_mosaic.version = 11 : i64} {
  func.func @_hausdorff_kernel(%arg0: i32, %arg1: memref<1x256x4xf32, #tpu.memory_space<vmem>>, %arg2: memref<1x4x256xf32, #tpu.memory_space<vmem>>, %arg3: memref<1x1x1xf32, #tpu.memory_space<vmem>>) attributes {dimension_semantics = [#tpu.dimension_semantics<parallel>], iteration_bounds = array<i64: 2>, scalar_prefetch = 0 : i64, scratch_operands = 0 : i64, tpu.core_type = #tpu.core_type<tc>, window_params = [{transform_indices = @transform_0, window_bounds = array<i64: 1, 256, 4>}, {transform_indices = @transform_1, window_bounds = array<i64: 1, 4, 256>}, {transform_indices = @transform_2, window_bounds = array<i64: 1, 1, 1>}]} {
    %c0 = arith.constant 0 : index
    %c0_0 = arith.constant 0 : index
    %c0_1 = arith.constant 0 : index
    %0 = vector.load %arg1[%c0, %c0_0, %c0_1] : memref<1x256x4xf32, #tpu.memory_space<vmem>>, vector<1x256x4xf32>
    %1 = vector.shape_cast %0 : vector<1x256x4xf32> to vector<256x4xf32>
    %c0_2 = arith.constant 0 : index
    %c0_3 = arith.constant 0 : index
    %c0_4 = arith.constant 0 : index
    %2 = vector.load %arg2[%c0_2, %c0_3, %c0_4] : memref<1x4x256xf32, #tpu.memory_space<vmem>>, vector<1x4x256xf32>
    %3 = vector.shape_cast %2 : vector<1x4x256xf32> to vector<4x256xf32>
    %4 = vector.extract_strided_slice %1 {offsets = [0, 0], sizes = [256, 1], strides = [1, 1]} : vector<256x4xf32> to vector<256x1xf32>
    %cst = arith.constant 0.000000e+00 : f32
    %5 = vector.broadcast %cst : f32 to vector<256x1xf32>
    %6 = arith.cmpf ogt, %4, %5 : vector<256x1xf32>
    %7 = vector.extract_strided_slice %1 {offsets = [0, 1], sizes = [256, 1], strides = [1, 1]} : vector<256x4xf32> to vector<256x1xf32>
    %cst_5 = arith.constant 5.000000e-01 : f32
    %8 = vector.broadcast %cst_5 : f32 to vector<256x1xf32>
    %9 = arith.cmpf ogt, %7, %8 : vector<256x1xf32>
    %10 = vector.extract_strided_slice %3 {offsets = [0, 0], sizes = [1, 256], strides = [1, 1]} : vector<4x256xf32> to vector<1x256xf32>
    %cst_6 = arith.constant 0.000000e+00 : f32
    %11 = vector.broadcast %cst_6 : f32 to vector<1x256xf32>
    %12 = arith.cmpf ogt, %10, %11 : vector<1x256xf32>
    %13 = vector.extract_strided_slice %3 {offsets = [1, 0], sizes = [1, 256], strides = [1, 1]} : vector<4x256xf32> to vector<1x256xf32>
    %cst_7 = arith.constant 5.000000e-01 : f32
    %14 = vector.broadcast %cst_7 : f32 to vector<1x256xf32>
    %15 = arith.cmpf ogt, %13, %14 : vector<1x256xf32>
    %16 = vector.extract_strided_slice %1 {offsets = [0, 2], sizes = [256, 1], strides = [1, 1]} : vector<256x4xf32> to vector<256x1xf32>
    %17 = vector.extract_strided_slice %3 {offsets = [2, 0], sizes = [1, 256], strides = [1, 1]} : vector<4x256xf32> to vector<1x256xf32>
    %18 = vector.broadcast %16 : vector<256x1xf32> to vector<256x256xf32>
    %19 = vector.broadcast %17 : vector<1x256xf32> to vector<256x256xf32>
    %20 = arith.subf %18, %19 : vector<256x256xf32>
    %21 = vector.extract_strided_slice %1 {offsets = [0, 3], sizes = [256, 1], strides = [1, 1]} : vector<256x4xf32> to vector<256x1xf32>
    %22 = vector.extract_strided_slice %3 {offsets = [3, 0], sizes = [1, 256], strides = [1, 1]} : vector<4x256xf32> to vector<1x256xf32>
    %23 = vector.broadcast %21 : vector<256x1xf32> to vector<256x256xf32>
    %24 = vector.broadcast %22 : vector<1x256xf32> to vector<256x256xf32>
    %25 = arith.subf %23, %24 : vector<256x256xf32>
    %26 = arith.mulf %20, %20 : vector<256x256xf32>
    %27 = arith.mulf %25, %25 : vector<256x256xf32>
    %28 = arith.addf %26, %27 : vector<256x256xf32>
    %29 = vector.broadcast %6 : vector<256x1xi1> to vector<256x256xi1>
    %30 = vector.broadcast %12 : vector<1x256xi1> to vector<256x256xi1>
    %31 = vector.broadcast %29 : vector<256x256xi1> to vector<256x256xi1>
    %32 = vector.broadcast %30 : vector<256x256xi1> to vector<256x256xi1>
    %33 = arith.xori %31, %32 : vector<256x256xi1>
    %cst_8 = arith.constant 1.000000e+09 : f32
    %34 = vector.broadcast %cst_8 : f32 to vector<256x256xf32>
    %35 = arith.select %33, %28, %34 : vector<256x256xi1>, vector<256x256xf32>
    %cst_9 = arith.constant dense<0x7F800000> : vector<256xf32>
    %36 = vector.multi_reduction <minimumf>, %35, %cst_9 [0] : vector<256x256xf32> to vector<256xf32>
    %37 = vector.shape_cast %36 : vector<256xf32> to vector<1x256xf32>
    %cst_10 = arith.constant 5.000000e+08 : f32
    %38 = vector.broadcast %cst_10 : f32 to vector<1x256xf32>
    %39 = arith.cmpf ogt, %37, %38 : vector<1x256xf32>
    %cst_11 = arith.constant 0.000000e+00 : f32
    %40 = vector.broadcast %cst_11 : f32 to vector<1x256xf32>
    %41 = arith.select %39, %40, %37 : vector<1x256xi1>, vector<1x256xf32>
    %42 = vector.broadcast %9 : vector<256x1xi1> to vector<256x256xi1>
    %43 = vector.broadcast %15 : vector<1x256xi1> to vector<256x256xi1>
    %44 = vector.broadcast %42 : vector<256x256xi1> to vector<256x256xi1>
    %45 = vector.broadcast %43 : vector<256x256xi1> to vector<256x256xi1>
    %46 = arith.xori %44, %45 : vector<256x256xi1>
    %cst_12 = arith.constant 1.000000e+09 : f32
    %47 = vector.broadcast %cst_12 : f32 to vector<256x256xf32>
    %48 = arith.select %46, %28, %47 : vector<256x256xi1>, vector<256x256xf32>
    %cst_13 = arith.constant dense<0x7F800000> : vector<256xf32>
    %49 = vector.multi_reduction <minimumf>, %48, %cst_13 [0] : vector<256x256xf32> to vector<256xf32>
    %50 = vector.shape_cast %49 : vector<256xf32> to vector<1x256xf32>
    %cst_14 = arith.constant 5.000000e+08 : f32
    %51 = vector.broadcast %cst_14 : f32 to vector<1x256xf32>
    %52 = arith.cmpf ogt, %50, %51 : vector<1x256xf32>
    %cst_15 = arith.constant 0.000000e+00 : f32
    %53 = vector.broadcast %cst_15 : f32 to vector<1x256xf32>
    %54 = arith.select %52, %53, %50 : vector<1x256xi1>, vector<1x256xf32>
    %55 = arith.addf %41, %54 : vector<1x256xf32>
    %56 = vector.extract_strided_slice %3 {offsets = [0, 0], sizes = [1, 256], strides = [1, 1]} : vector<4x256xf32> to vector<1x256xf32>
    %57 = arith.negf %56 : vector<1x256xf32>
    %58 = math.exp %57 : vector<1x256xf32>
    %cst_16 = arith.constant 1.000000e+00 : f32
    %59 = vector.broadcast %cst_16 : f32 to vector<1x256xf32>
    %60 = arith.addf %59, %58 : vector<1x256xf32>
    %61 = arith.divf %59, %60 : vector<1x256xf32>
    %62 = vector.extract_strided_slice %3 {offsets = [1, 0], sizes = [1, 256], strides = [1, 1]} : vector<4x256xf32> to vector<1x256xf32>
    %63 = arith.subf %62, %61 : vector<1x256xf32>
    %64 = vector.extract_strided_slice %3 {offsets = [1, 0], sizes = [1, 256], strides = [1, 1]} : vector<4x256xf32> to vector<1x256xf32>
    %65 = arith.subf %64, %61 : vector<1x256xf32>
    %66 = arith.mulf %63, %65 : vector<1x256xf32>
    %67 = arith.mulf %66, %55 : vector<1x256xf32>
    %68 = vector.shape_cast %67 : vector<1x256xf32> to vector<1x1x256xf32>
    %cst_17 = arith.constant dense<0.000000e+00> : vector<1xf32>
    %69 = vector.multi_reduction <add>, %68, %cst_17 [1, 2] : vector<1x1x256xf32> to vector<1xf32>
    %70 = vector.shape_cast %69 : vector<1xf32> to vector<1x1x1xf32>
    %71 = vector.extract %70[0, 0, 0] : f32 from vector<1x1x1xf32>
    %cst_18 = arith.constant 2.98023224E-8 : f32
    %72 = arith.mulf %71, %cst_18 : f32
    %cst_19 = arith.constant 0.000000e+00 : f32
    %73 = vector.broadcast %cst_19 : f32 to vector<1x1x1xf32>
    %74 = vector.broadcast %72 : f32 to vector<1x1x1xf32>
    %75 = arith.addf %73, %74 : vector<1x1x1xf32>
    %c0_20 = arith.constant 0 : index
    %c0_21 = arith.constant 0 : index
    %c0_22 = arith.constant 0 : index
    %76 = vector.load %arg3[%c0_20, %c0_21, %c0_22] : memref<1x1x1xf32, #tpu.memory_space<vmem>>, vector<1x1x1xf32>
    tpu.vector_store %arg3[%c0_20, %c0_21, %c0_22], %75 {strides = array<i32>} : memref<1x1x1xf32, #tpu.memory_space<vmem>>, vector<1x1x1xf32>,
    return
  }
  func.func @transform_0(%arg0: i32) -> (i32, i32, i32) {
    %c0_i32 = arith.constant 0 : i32
    %c0_i32_0 = arith.constant 0 : i32
    %c0_i32_1 = arith.constant 0 : i32
    return %arg0, %c0_i32, %c0_i32_0 : i32, i32, i32
  }
  func.func @transform_1(%arg0: i32) -> (i32, i32, i32) {
    %c0_i32 = arith.constant 0 : i32
    %c0_i32_0 = arith.constant 0 : i32
    %c0_i32_1 = arith.constant 0 : i32
    return %arg0, %c0_i32, %c0_i32_0 : i32, i32, i32
  }
  func.func @transform_2(%arg0: i32) -> (i32, i32, i32) {
    %c0_i32 = arith.constant 0 : i32
    %c0_i32_0 = arith.constant 0 : i32
    %c0_i32_1 = arith.constant 0 : i32
    return %arg0, %c0_i32, %c0_i32_0 : i32, i32, i32
  }
}

</mosaic_0001>

<bundles_post_ra>
// kernel: squeeze.4
= control target key start
LH: loop header
LB: loop body
LE: loop exit
PB: predicated region body
PF: predicated region fallthrough
CT: control target
= control target key end

     0   :  { %s88_s8 = smov 112   ;;  %s89_s11 = smov 80   ;;  %vm3_vm0 = vcmask 130048   ;;  %vm9_vm1 = vcmask 1048448   ;;  %vm15_vm2 = vcmask 917248   ;;  %vm21_vm3 = vcmask 786048   ;;  %s141_s0 = inlined_call_operand.vmem [shape: f32[2,1,16,16], index: 0, kind: input, shape index: {}]   ;;  %s142_s1 = inlined_call_operand.vmem [shape: f32[2,1,256], index: 1, kind: output, shape index: {}]  }
   0x1   :  { %v71_v0 = vld [vmem:[%s141_s0 + $0x7] ss:$8 sm:$0xf]   ;;  %v73_v1 = vld [vmem:[%s141_s0 + $0x5] ss:$8 sm:$0xf]  }
   0x2   :  { %7 = vrot.lane.b32.xlu0 %v71_v0, %s88_s8  ;;  %19 = vrot.lane.b32.xlu1 %v73_v1, %s89_s11  ;;  %v75_v2 = vld [vmem:[%s141_s0 + $0x3] ss:$8 sm:$0xf]   ;;  %s90_s14 = smov 48   ;;  %s91_s19 = smov 96   ;;  %vm27_vm4 = vcmask 654848  }
   0x3   :  { %31 = vrot.lane.b32.xlu2 %v75_v2, %s90_s14  ;;  %v72_v3 = vld [vmem:[%s141_s0 + $0x6] ss:$8 sm:$0xf]   ;;  %v74_v4 = vld [vmem:[%s141_s0 + $0x4] ss:$8 sm:$0xf]  }
   0x4   :  { %s92_s20 = smov 64   ;;  %v76_v5 = vld [vmem:[%s141_s0 + $0x2] ss:$8 sm:$0xf]   ;;  %s93_s23 = smov 32   ;;  %vm33_vm5 = vcmask 523648  }
   0x5   :  { %v77_v6 = vld [vmem:[%s141_s0 + $0x1] ss:$8 sm:$0xf]   ;;  %s94_s26 = smov 16   ;;  %vm39_vm6 = vcmask 392448   ;;  %vm45_vm7 = vcmask 261248  }
   0x6   :  { %v2_v7 = vld [vmem:[%s141_s0] ss:$8 sm:$0xf]  }
   0x7   :  { %4 = vst.msk [vmem:[#allocation0] ss:$8 sm:$0xf] %vm3_vm0, %v2_v7  }
   0xa   :  { %13 = vrot.lane.b32.xlu0 %v72_v3, %s91_s19  ;;  %25 = vrot.lane.b32.xlu1 %v74_v4, %s92_s20 }
   0xb   :  { %37 = vrot.lane.b32.xlu2 %v76_v5, %s93_s23 }
  0x12   :  { %43 = vrot.lane.b32.xlu0 %v77_v6, %s94_s26 }
  0x5d   :  { %v32_v8 = vpop.permute.xlu2 %31  }
  0x65   :  { %v38_v9 = vpop.permute.xlu2 %37  }
  0x74   :  { %v8_v10 = vpop.permute.xlu0 %7   ;;  %v20_v11 = vpop.permute.xlu1 %19  }
  0x75   :  { %10 = vst.msk [vmem:[#allocation0] ss:$8 sm:$0xf] %vm9_vm1, %v8_v10  }
  0x7c   :  { %v14_v12 = vpop.permute.xlu0 %13   ;;  %v26_v13 = vpop.permute.xlu1 %25  }
  0x7d   :  { %16 = vst.msk [vmem:[#allocation0] ss:$8 sm:$0xf] %vm15_vm2, %v14_v12  }
  0x7e   :  { %22 = vst.msk [vmem:[#allocation0] ss:$8 sm:$0xf] %vm21_vm3, %v20_v11  }
  0x7f   :  { %28 = vst.msk [vmem:[#allocation0] ss:$8 sm:$0xf] %vm27_vm4, %v26_v13  }
  0x80   :  { %34 = vst.msk [vmem:[#allocation0] ss:$8 sm:$0xf] %vm33_vm5, %v32_v8  }
  0x81   :  { %40 = vst.msk [vmem:[#allocation0] ss:$8 sm:$0xf] %vm39_vm6, %v38_v9  }
  0x84   :  { %v44_v14 = vpop.permute.xlu0 %43  }
  0x85   :  { %46 = vst.msk [vmem:[#allocation0] ss:$8 sm:$0xf] %vm45_vm7, %v44_v14  }
  0x8c   :  { %v49_v15 = vld [vmem:[#allocation0] sm:$0x1]  ;;  %v54_v16 = vld [vmem:[#allocation0 + $0x8] sm:$0x1]  ;;  %v60_v17 = vld [vmem:[#allocation0 + $0x10] sm:$0x1] }
  0x8d   :  { %52 = vst [vmem:[%s142_s1] sm:$0x1] %v49_v15  ;;  %v66_v18 = vld [vmem:[#allocation0 + $0x18] sm:$0x1] }
  0x8e   :  { %78 = vst [vmem:[%s142_s1 + $0x1] sm:$0x1] %v54_v16 }
  0x8f   :  { %79 = vst [vmem:[%s142_s1 + $0x2] sm:$0x1] %v60_v17 }
  0x90   :  { %80 = vst [vmem:[%s142_s1 + $0x3] sm:$0x1] %v66_v18 }

// kernel: squeeze.0
= control target key start
LH: loop header
LB: loop body
LE: loop exit
PB: predicated region body
PF: predicated region fallthrough
CT: control target
= control target key end

     0   :  { %s1121_s10 = smov 127   ;;  %s1122_s11 = smov 126   ;;  %vm3_vm0 = vcmask 7168   ;;  %s2266_s0 = inlined_call_operand.vmem [shape: f32[2,1,16,16], index: 0, kind: input, shape index: {}]   ;;  %s2267_s1 = inlined_call_operand.vmem [shape: f32[2,256,1], index: 1, kind: output, shape index: {}]  }
   0x1   :  { %v1149_v0 = vld [vmem:[%s2266_s0 + $0x10] sm:$0xff]   ;;  %v1154_v1 = vld [vmem:[%s2266_s0] sm:$0xff]   ;;  %v1162_v2 = vld [vmem:[%s2266_s0 + $0x18] sm:$0xff]   ;;  %s1124_s16 = smov 124   ;;  %s1125_s17 = smov 123  }
   0x2   :  { %68 = vrot.lane.b32.xlu1 %v1149_v0, %s1121_s10  ;;  %42 = vrot.lane.b32.xlu0 %v1154_v1, %s1121_s10  ;;  %v1167_v3 = vld [vmem:[%s2266_s0 + $0x8] sm:$0xff]   ;;  %s1123_s0 = smov 125   ;;  %s1126_s18 = smov 122   ;;  %4 = vst.msk [vmem:[%s2267_s1] ss:$16 sm:$0x3] %vm3_vm0, %v1154_v1  }
   0x3   :  { %93 = vrot.lane.b32.xlu2 %v1154_v1, %s1122_s11  ;;  %s1127_s19 = smov 121   ;;  %s1128_s20 = smov 120   ;;  %5 = vst.msk [vmem:[%s2267_s1] ss:$16 sm:$0xc] %vm3_vm0, %v1154_v1  }
   0x4   :  { %s1129_s21 = smov 119   ;;  %6 = vst.msk [vmem:[%s2267_s1] ss:$16 sm:$0x30] %vm3_vm0, %v1154_v1   ;;  %s1130_s22 = smov 118  }
   0x5   :  { %7 = vst.msk [vmem:[%s2267_s1] ss:$16 sm:$0xc0] %vm3_vm0, %v1154_v1   ;;  %s1134_s7 = smov 114   ;;  %s1135_s25 = smov 113  }
   0x6   :  { %807 = vst.msk [vmem:[%s2267_s1 + $0x80] ss:$16 sm:$0x3] %vm3_vm0, %v1167_v3  }
   0x7   :  { %808 = vst.msk [vmem:[%s2267_s1 + $0x80] ss:$16 sm:$0xc] %vm3_vm0, %v1167_v3  }
   0x8   :  { %809 = vst.msk [vmem:[%s2267_s1 + $0x80] ss:$16 sm:$0x30] %vm3_vm0, %v1167_v3  }
   0x9   :  { %810 = vst.msk [vmem:[%s2267_s1 + $0x80] ss:$16 sm:$0xc0] %vm3_vm0, %v1167_v3  }
   0xa   :  { %81 = vrot.lane.b32.xlu1 %v1162_v2, %s1121_s10  ;;  %55 = vrot.lane.b32.xlu0 %v1167_v3, %s1121_s10  ;;  %812 = vst.msk [vmem:[%s2267_s1 + $0x100] ss:$16 sm:$0x3] %vm3_vm0, %v1149_v0   ;;  %s1131_s10 = smov 117  }
   0xb   :  { %106 = vrot.lane.b32.xlu2 %v1167_v3, %s1122_s11  ;;  %813 = vst.msk [vmem:[%s2267_s1 + $0x100] ss:$16 sm:$0xc] %vm3_vm0, %v1149_v0  }
   0xc   :  { %814 = vst.msk [vmem:[%s2267_s1 + $0x100] ss:$16 sm:$0x30] %vm3_vm0, %v1149_v0  }
   0xd   :  { %815 = vst.msk [vmem:[%s2267_s1 + $0x100] ss:$16 sm:$0xc0] %vm3_vm0, %v1149_v0  }
   0xe   :  { %817 = vst.msk [vmem:[%s2267_s1 + $0x180] ss:$16 sm:$0x3] %vm3_vm0, %v1162_v2  }
   0xf   :  { %818 = vst.msk [vmem:[%s2267_s1 + $0x180] ss:$16 sm:$0xc] %vm3_vm0, %v1162_v2  }
  0x10   :  { %819 = vst.msk [vmem:[%s2267_s1 + $0x180] ss:$16 sm:$0x30] %vm3_vm0, %v1162_v2  }
  0x11   :  { %820 = vst.msk [vmem:[%s2267_s1 + $0x180] ss:$16 sm:$0xc0] %vm3_vm0, %v1162_v2  }
  0x12   :  { %132 = vrot.lane.b32.xlu1 %v1162_v2, %s1122_s11  ;;  %119 = vrot.lane.b32.xlu0 %v1149_v0, %s1122_s11 }
  0x13   :  { %144 = vrot.lane.b32.xlu2 %v1154_v1, %s1123_s0 }
  0x1a   :  { %170 = vrot.lane.b32.xlu1 %v1149_v0, %s1123_s0  ;;  %157 = vrot.lane.b32.xlu0 %v1167_v3, %s1123_s0 }
  0x1b   :  { %183 = vrot.lane.b32.xlu2 %v1162_v2, %s1123_s0 }
  0x22   :  { %208 = vrot.lane.b32.xlu1 %v1167_v3, %s1124_s16  ;;  %195 = vrot.lane.b32.xlu0 %v1154_v1, %s1124_s16 }
  0x23   :  { %221 = vrot.lane.b32.xlu2 %v1149_v0, %s1124_s16 }
  0x2a   :  { %246 = vrot.lane.b32.xlu1 %v1154_v1, %s1125_s17  ;;  %234 = vrot.lane.b32.xlu0 %v1162_v2, %s1124_s16 }
  0x2b   :  { %259 = vrot.lane.b32.xlu2 %v1167_v3, %s1125_s17 }
  0x32   :  { %285 = vrot.lane.b32.xlu1 %v1162_v2, %s1125_s17  ;;  %272 = vrot.lane.b32.xlu0 %v1149_v0, %s1125_s17 }
  0x33   :  { %297 = vrot.lane.b32.xlu2 %v1154_v1, %s1126_s18 }
  0x3a   :  { %323 = vrot.lane.b32.xlu1 %v1149_v0, %s1126_s18  ;;  %310 = vrot.lane.b32.xlu0 %v1167_v3, %s1126_s18 }
  0x3b   :  { %336 = vrot.lane.b32.xlu2 %v1162_v2, %s1126_s18 }
  0x42   :  { %361 = vrot.lane.b32.xlu1 %v1167_v3, %s1127_s19  ;;  %348 = vrot.lane.b32.xlu0 %v1154_v1, %s1127_s19 }
  0x43   :  { %374 = vrot.lane.b32.xlu2 %v1149_v0, %s1127_s19 }
  0x4a   :  { %399 = vrot.lane.b32.xlu1 %v1154_v1, %s1128_s20  ;;  %387 = vrot.lane.b32.xlu0 %v1162_v2, %s1127_s19  ;;  %s1133_s19 = smov 115  }
  0x4b   :  { %412 = vrot.lane.b32.xlu2 %v1167_v3, %s1128_s20 }
  0x52   :  { %438 = vrot.lane.b32.xlu1 %v1162_v2, %s1128_s20  ;;  %425 = vrot.lane.b32.xlu0 %v1149_v0, %s1128_s20  ;;  %s1132_s20 = smov 116  }
  0x53   :  { %450 = vrot.lane.b32.xlu2 %v1154_v1, %s1129_s21 }
  0x5a   :  { %476 = vrot.lane.b32.xlu1 %v1149_v0, %s1129_s21  ;;  %463 = vrot.lane.b32.xlu0 %v1167_v3, %s1129_s21 }
  0x5b   :  { %489 = vrot.lane.b32.xlu2 %v1162_v2, %s1129_s21 }
  0x5d   :  { %v94_v4 = vpop.permute.xlu2 %93  }
  0x5e   :  { %840 = vst.msk [vmem:[%s2267_s1 + $0x2] ss:$16 sm:$0x3] %vm3_vm0, %v94_v4  }
  0x5f   :  { %841 = vst.msk [vmem:[%s2267_s1 + $0x2] ss:$16 sm:$0xc] %vm3_vm0, %v94_v4  }
  0x60   :  { %842 = vst.msk [vmem:[%s2267_s1 + $0x2] ss:$16 sm:$0x30] %vm3_vm0, %v94_v4  }
  0x61   :  { %843 = vst.msk [vmem:[%s2267_s1 + $0x2] ss:$16 sm:$0xc0] %vm3_vm0, %v94_v4  }
  0x62   :  { %514 = vrot.lane.b32.xlu1 %v1167_v3, %s1130_s22  ;;  %501 = vrot.lane.b32.xlu0 %v1154_v1, %s1130_s22 }
  0x63   :  { %527 = vrot.lane.b32.xlu2 %v1149_v0, %s1130_s22 }
  0x65   :  { %v107_v5 = vpop.permute.xlu2 %106  }
  0x66   :  { %845 = vst.msk [vmem:[%s2267_s1 + $0x82] ss:$16 sm:$0x3] %vm3_vm0, %v107_v5  }
  0x67   :  { %846 = vst.msk [vmem:[%s2267_s1 + $0x82] ss:$16 sm:$0xc] %vm3_vm0, %v107_v5  }
  0x68   :  { %847 = vst.msk [vmem:[%s2267_s1 + $0x82] ss:$16 sm:$0x30] %vm3_vm0, %v107_v5  }
  0x69   :  { %848 = vst.msk [vmem:[%s2267_s1 + $0x82] ss:$16 sm:$0xc0] %vm3_vm0, %v107_v5  }
  0x6a   :  { %552 = vrot.lane.b32.xlu1 %v1154_v1, %s1131_s10  ;;  %540 = vrot.lane.b32.xlu0 %v1162_v2, %s1130_s22 }
  0x6b   :  { %565 = vrot.lane.b32.xlu2 %v1167_v3, %s1131_s10 }
  0x6d   :  { %v145_v6 = vpop.permute.xlu2 %144  }
  0x6e   :  { %859 = vst.msk [vmem:[%s2267_s1 + $0x3] ss:$16 sm:$0x3] %vm3_vm0, %v145_v6  }
  0x6f   :  { %860 = vst.msk [vmem:[%s2267_s1 + $0x3] ss:$16 sm:$0xc] %vm3_vm0, %v145_v6  }
  0x70   :  { %861 = vst.msk [vmem:[%s2267_s1 + $0x3] ss:$16 sm:$0x30] %vm3_vm0, %v145_v6  }
  0x71   :  { %862 = vst.msk [vmem:[%s2267_s1 + $0x3] ss:$16 sm:$0xc0] %vm3_vm0, %v145_v6  }
  0x72   :  { %591 = vrot.lane.b32.xlu1 %v1162_v2, %s1131_s10  ;;  %578 = vrot.lane.b32.xlu0 %v1149_v0, %s1131_s10 }
  0x73   :  { %603 = vrot.lane.b32.xlu2 %v1154_v1, %s1132_s20 }
  0x74   :  { %v69_v7 = vpop.permute.xlu1 %68   ;;  %v43_v8 = vpop.permute.xlu0 %42  }
  0x75   :  { %831 = vst.msk [vmem:[%s2267_s1 + $0x101] ss:$16 sm:$0x3] %vm3_vm0, %v69_v7   ;;  %v184_v9 = vpop.permute.xlu2 %183  }
  0x76   :  { %832 = vst.msk [vmem:[%s2267_s1 + $0x101] ss:$16 sm:$0xc] %vm3_vm0, %v69_v7  }
  0x77   :  { %833 = vst.msk [vmem:[%s2267_s1 + $0x101] ss:$16 sm:$0x30] %vm3_vm0, %v69_v7  }
  0x78   :  { %834 = vst.msk [vmem:[%s2267_s1 + $0x101] ss:$16 sm:$0xc0] %vm3_vm0, %v69_v7  }
  0x79   :  { %821 = vst.msk [vmem:[%s2267_s1 + $0x1] ss:$16 sm:$0x3] %vm3_vm0, %v43_v8  }
  0x7a   :  { %822 = vst.msk [vmem:[%s2267_s1 + $0x1] ss:$16 sm:$0xc] %vm3_vm0, %v43_v8   ;;  %629 = vrot.lane.b32.xlu1 %v1149_v0, %s1132_s20  ;;  %616 = vrot.lane.b32.xlu0 %v1167_v3, %s1132_s20 }
  0x7b   :  { %823 = vst.msk [vmem:[%s2267_s1 + $0x1] ss:$16 sm:$0x30] %vm3_vm0, %v43_v8   ;;  %642 = vrot.lane.b32.xlu2 %v1162_v2, %s1132_s20 }
  0x7c   :  { %824 = vst.msk [vmem:[%s2267_s1 + $0x1] ss:$16 sm:$0xc0] %vm3_vm0, %v43_v8   ;;  %v82_v10 = vpop.permute.xlu1 %81   ;;  %v56_v11 = vpop.permute.xlu0 %55  }
  0x7d   :  { %836 = vst.msk [vmem:[%s2267_s1 + $0x181] ss:$16 sm:$0x3] %vm3_vm0, %v82_v10   ;;  %v222_v12 = vpop.permute.xlu2 %221  }
  0x7e   :  { %837 = vst.msk [vmem:[%s2267_s1 + $0x181] ss:$16 sm:$0xc] %vm3_vm0, %v82_v10  }
  0x7f   :  { %838 = vst.msk [vmem:[%s2267_s1 + $0x181] ss:$16 sm:$0x30] %vm3_vm0, %v82_v10  }
  0x80   :  { %839 = vst.msk [vmem:[%s2267_s1 + $0x181] ss:$16 sm:$0xc0] %vm3_vm0, %v82_v10  }
  0x81   :  { %826 = vst.msk [vmem:[%s2267_s1 + $0x81] ss:$16 sm:$0x3] %vm3_vm0, %v56_v11  }
  0x82   :  { %827 = vst.msk [vmem:[%s2267_s1 + $0x81] ss:$16 sm:$0xc] %vm3_vm0, %v56_v11   ;;  %667 = vrot.lane.b32.xlu1 %v1167_v3, %s1133_s19  ;;  %654 = vrot.lane.b32.xlu0 %v1154_v1, %s1133_s19 }
  0x83   :  { %828 = vst.msk [vmem:[%s2267_s1 + $0x81] ss:$16 sm:$0x30] %vm3_vm0, %v56_v11   ;;  %680 = vrot.lane.b32.xlu2 %v1149_v0, %s1133_s19 }
  0x84   :  { %829 = vst.msk [vmem:[%s2267_s1 + $0x81] ss:$16 sm:$0xc0] %vm3_vm0, %v56_v11   ;;  %v133_v13 = vpop.permute.xlu1 %132   ;;  %v120_v14 = vpop.permute.xlu0 %119  }
  0x85   :  { %855 = vst.msk [vmem:[%s2267_s1 + $0x182] ss:$16 sm:$0x3] %vm3_vm0, %v133_v13   ;;  %v260_v15 = vpop.permute.xlu2 %259  }
  0x86   :  { %856 = vst.msk [vmem:[%s2267_s1 + $0x182] ss:$16 sm:$0xc] %vm3_vm0, %v133_v13  }
  0x87   :  { %857 = vst.msk [vmem:[%s2267_s1 + $0x182] ss:$16 sm:$0x30] %vm3_vm0, %v133_v13  }
  0x88   :  { %858 = vst.msk [vmem:[%s2267_s1 + $0x182] ss:$16 sm:$0xc0] %vm3_vm0, %v133_v13  }
  0x89   :  { %850 = vst.msk [vmem:[%s2267_s1 + $0x102] ss:$16 sm:$0x3] %vm3_vm0, %v120_v14  }
  0x8a   :  { %851 = vst.msk [vmem:[%s2267_s1 + $0x102] ss:$16 sm:$0xc] %vm3_vm0, %v120_v14   ;;  %705 = vrot.lane.b32.xlu1 %v1154_v1, %s1134_s7  ;;  %693 = vrot.lane.b32.xlu0 %v1162_v2, %s1133_s19 }
  0x8b   :  { %852 = vst.msk [vmem:[%s2267_s1 + $0x102] ss:$16 sm:$0x30] %vm3_vm0, %v120_v14   ;;  %718 = vrot.lane.b32.xlu2 %v1167_v3, %s1134_s7 }
  0x8c   :  { %853 = vst.msk [vmem:[%s2267_s1 + $0x102] ss:$16 sm:$0xc0] %vm3_vm0, %v120_v14   ;;  %v171_v16 = vpop.permute.xlu1 %170   ;;  %v158_v17 = vpop.permute.xlu0 %157  }
  0x8d   :  { %874 = vst.msk [vmem:[%s2267_s1 + $0x183] ss:$16 sm:$0x3] %vm3_vm0, %v184_v9   ;;  %v298_v18 = vpop.permute.xlu2 %297  }
  0x8e   :  { %875 = vst.msk [vmem:[%s2267_s1 + $0x183] ss:$16 sm:$0xc] %vm3_vm0, %v184_v9  }
  0x8f   :  { %876 = vst.msk [vmem:[%s2267_s1 + $0x183] ss:$16 sm:$0x30] %vm3_vm0, %v184_v9  }
  0x90   :  { %877 = vst.msk [vmem:[%s2267_s1 + $0x183] ss:$16 sm:$0xc0] %vm3_vm0, %v184_v9  }
  0x91   :  { %869 = vst.msk [vmem:[%s2267_s1 + $0x103] ss:$16 sm:$0x3] %vm3_vm0, %v171_v16  }
  0x92   :  { %870 = vst.msk [vmem:[%s2267_s1 + $0x103] ss:$16 sm:$0xc] %vm3_vm0, %v171_v16   ;;  %744 = vrot.lane.b32.xlu1 %v1162_v2, %s1134_s7  ;;  %731 = vrot.lane.b32.xlu0 %v1149_v0, %s1134_s7 }
  0x93   :  { %871 = vst.msk [vmem:[%s2267_s1 + $0x103] ss:$16 sm:$0x30] %vm3_vm0, %v171_v16   ;;  %756 = vrot.lane.b32.xlu2 %v1154_v1, %s1135_s25 }
  0x94   :  { %872 = vst.msk [vmem:[%s2267_s1 + $0x103] ss:$16 sm:$0xc0] %vm3_vm0, %v171_v16   ;;  %v209_v19 = vpop.permute.xlu1 %208   ;;  %v196_v20 = vpop.permute.xlu0 %195  }
  0x95   :  { %864 = vst.msk [vmem:[%s2267_s1 + $0x83] ss:$16 sm:$0x3] %vm3_vm0, %v158_v17   ;;  %v337_v23 = vpop.permute.xlu2 %336  }
  0x96   :  { %865 = vst.msk [vmem:[%s2267_s1 + $0x83] ss:$16 sm:$0xc] %vm3_vm0, %v158_v17  }
  0x97   :  { %866 = vst.msk [vmem:[%s2267_s1 + $0x83] ss:$16 sm:$0x30] %vm3_vm0, %v158_v17  }
  0x98   :  { %867 = vst.msk [vmem:[%s2267_s1 + $0x83] ss:$16 sm:$0xc0] %vm3_vm0, %v158_v17  }
  0x99   :  { %888 = vst.msk [vmem:[%s2267_s1 + $0x104] ss:$16 sm:$0x3] %vm3_vm0, %v222_v12  }
  0x9a   :  { %889 = vst.msk [vmem:[%s2267_s1 + $0x104] ss:$16 sm:$0xc] %vm3_vm0, %v222_v12   ;;  %782 = vrot.lane.b32.xlu1 %v1149_v0, %s1135_s25  ;;  %769 = vrot.lane.b32.xlu0 %v1167_v3, %s1135_s25 }
  0x9b   :  { %890 = vst.msk [vmem:[%s2267_s1 + $0x104] ss:$16 sm:$0x30] %vm3_vm0, %v222_v12   ;;  %795 = vrot.lane.b32.xlu2 %v1162_v2, %s1135_s25 }
  0x9c   :  { %891 = vst.msk [vmem:[%s2267_s1 + $0x104] ss:$16 sm:$0xc0] %vm3_vm0, %v222_v12   ;;  %v247_v21 = vpop.permute.xlu1 %246   ;;  %v235_v22 = vpop.permute.xlu0 %234  }
  0x9d   :  { %883 = vst.msk [vmem:[%s2267_s1 + $0x84] ss:$16 sm:$0x3] %vm3_vm0, %v209_v19   ;;  %v375_v26 = vpop.permute.xlu2 %374  }
  0x9e   :  { %884 = vst.msk [vmem:[%s2267_s1 + $0x84] ss:$16 sm:$0xc] %vm3_vm0, %v209_v19  }
  0x9f   :  { %885 = vst.msk [vmem:[%s2267_s1 + $0x84] ss:$16 sm:$0x30] %vm3_vm0, %v209_v19  }
  0xa0   :  { %886 = vst.msk [vmem:[%s2267_s1 + $0x84] ss:$16 sm:$0xc0] %vm3_vm0, %v209_v19  }
  0xa1   :  { %878 = vst.msk [vmem:[%s2267_s1 + $0x4] ss:$16 sm:$0x3] %vm3_vm0, %v196_v20  }
  0xa2   :  { %879 = vst.msk [vmem:[%s2267_s1 + $0x4] ss:$16 sm:$0xc] %vm3_vm0, %v196_v20  }
  0xa3   :  { %880 = vst.msk [vmem:[%s2267_s1 + $0x4] ss:$16 sm:$0x30] %vm3_vm0, %v196_v20  }
  0xa4   :  { %881 = vst.msk [vmem:[%s2267_s1 + $0x4] ss:$16 sm:$0xc0] %vm3_vm0, %v196_v20   ;;  %v286_v24 = vpop.permute.xlu1 %285   ;;  %v273_v25 = vpop.permute.xlu0 %272  }
  0xa5   :  { %902 = vst.msk [vmem:[%s2267_s1 + $0x85] ss:$16 sm:$0x3] %vm3_vm0, %v260_v15   ;;  %v413_v31 = vpop.permute.xlu2 %412  }
  0xa6   :  { %903 = vst.msk [vmem:[%s2267_s1 + $0x85] ss:$16 sm:$0xc] %vm3_vm0, %v260_v15  }
  0xa7   :  { %904 = vst.msk [vmem:[%s2267_s1 + $0x85] ss:$16 sm:$0x30] %vm3_vm0, %v260_v15  }
  0xa8   :  { %905 = vst.msk [vmem:[%s2267_s1 + $0x85] ss:$16 sm:$0xc0] %vm3_vm0, %v260_v15  }
  0xa9   :  { %897 = vst.msk [vmem:[%s2267_s1 + $0x5] ss:$16 sm:$0x3] %vm3_vm0, %v247_v21  }
  0xaa   :  { %898 = vst.msk [vmem:[%s2267_s1 + $0x5] ss:$16 sm:$0xc] %vm3_vm0, %v247_v21  }
  0xab   :  { %899 = vst.msk [vmem:[%s2267_s1 + $0x5] ss:$16 sm:$0x30] %vm3_vm0, %v247_v21  }
  0xac   :  { %900 = vst.msk [vmem:[%s2267_s1 + $0x5] ss:$16 sm:$0xc0] %vm3_vm0, %v247_v21   ;;  %v324_v27 = vpop.permute.xlu1 %323   ;;  %v311_v28 = vpop.permute.xlu0 %310  }
  0xad   :  { %893 = vst.msk [vmem:[%s2267_s1 + $0x184] ss:$16 sm:$0x3] %vm3_vm0, %v235_v22   ;;  %v451_v34 = vpop.permute.xlu2 %450  }
  0xae   :  { %894 = vst.msk [vmem:[%s2267_s1 + $0x184] ss:$16 sm:$0xc] %vm3_vm0, %v235_v22  }
  0xaf   :  { %895 = vst.msk [vmem:[%s2267_s1 + $0x184] ss:$16 sm:$0x30] %vm3_vm0, %v235_v22  }
  0xb0   :  { %896 = vst.msk [vmem:[%s2267_s1 + $0x184] ss:$16 sm:$0xc0] %vm3_vm0, %v235_v22  }
  0xb1   :  { %916 = vst.msk [vmem:[%s2267_s1 + $0x6] ss:$16 sm:$0x3] %vm3_vm0, %v298_v18  }
  0xb2   :  { %917 = vst.msk [vmem:[%s2267_s1 + $0x6] ss:$16 sm:$0xc] %vm3_vm0, %v298_v18  }
  0xb3   :  { %918 = vst.msk [vmem:[%s2267_s1 + $0x6] ss:$16 sm:$0x30] %vm3_vm0, %v298_v18  }
  0xb4   :  { %919 = vst.msk [vmem:[%s2267_s1 + $0x6] ss:$16 sm:$0xc0] %vm3_vm0, %v298_v18   ;;  %v362_v29 = vpop.permute.xlu1 %361   ;;  %v349_v30 = vpop.permute.xlu0 %348  }
  0xb5   :  { %912 = vst.msk [vmem:[%s2267_s1 + $0x185] ss:$16 sm:$0x3] %vm3_vm0, %v286_v24   ;;  %v490_v37 = vpop.permute.xlu2 %489  }
  0xb6   :  { %913 = vst.msk [vmem:[%s2267_s1 + $0x185] ss:$16 sm:$0xc] %vm3_vm0, %v286_v24  }
  0xb7   :  { %914 = vst.msk [vmem:[%s2267_s1 + $0x185] ss:$16 sm:$0x30] %vm3_vm0, %v286_v24  }
  0xb8   :  { %915 = vst.msk [vmem:[%s2267_s1 + $0x185] ss:$16 sm:$0xc0] %vm3_vm0, %v286_v24  }
  0xb9   :  { %907 = vst.msk [vmem:[%s2267_s1 + $0x105] ss:$16 sm:$0x3] %vm3_vm0, %v273_v25  }
  0xba   :  { %908 = vst.msk [vmem:[%s2267_s1 + $0x105] ss:$16 sm:$0xc] %vm3_vm0, %v273_v25  }
  0xbb   :  { %909 = vst.msk [vmem:[%s2267_s1 + $0x105] ss:$16 sm:$0x30] %vm3_vm0, %v273_v25  }
  0xbc   :  { %910 = vst.msk [vmem:[%s2267_s1 + $0x105] ss:$16 sm:$0xc0] %vm3_vm0, %v273_v25   ;;  %v400_v32 = vpop.permute.xlu1 %399   ;;  %v388_v33 = vpop.permute.xlu0 %387  }
  0xbd   :  { %931 = vst.msk [vmem:[%s2267_s1 + $0x186] ss:$16 sm:$0x3] %vm3_vm0, %v337_v23   ;;  %v528_v40 = vpop.permute.xlu2 %527  }
  0xbe   :  { %932 = vst.msk [vmem:[%s2267_s1 + $0x186] ss:$16 sm:$0xc] %vm3_vm0, %v337_v23  }
  0xbf   :  { %933 = vst.msk [vmem:[%s2267_s1 + $0x186] ss:$16 sm:$0x30] %vm3_vm0, %v337_v23  }
  0xc0   :  { %934 = vst.msk [vmem:[%s2267_s1 + $0x186] ss:$16 sm:$0xc0] %vm3_vm0, %v337_v23  }
  0xc1   :  { %926 = vst.msk [vmem:[%s2267_s1 + $0x106] ss:$16 sm:$0x3] %vm3_vm0, %v324_v27  }
  0xc2   :  { %927 = vst.msk [vmem:[%s2267_s1 + $0x106] ss:$16 sm:$0xc] %vm3_vm0, %v324_v27  }
  0xc3   :  { %928 = vst.msk [vmem:[%s2267_s1 + $0x106] ss:$16 sm:$0x30] %vm3_vm0, %v324_v27  }
  0xc4   :  { %929 = vst.msk [vmem:[%s2267_s1 + $0x106] ss:$16 sm:$0xc0] %vm3_vm0, %v324_v27   ;;  %v439_v35 = vpop.permute.xlu1 %438   ;;  %v426_v36 = vpop.permute.xlu0 %425  }
  0xc5   :  { %921 = vst.msk [vmem:[%s2267_s1 + $0x86] ss:$16 sm:$0x3] %vm3_vm0, %v311_v28   ;;  %v566_v43 = vpop.permute.xlu2 %565  }
  0xc6   :  { %922 = vst.msk [vmem:[%s2267_s1 + $0x86] ss:$16 sm:$0xc] %vm3_vm0, %v311_v28  }
  0xc7   :  { %923 = vst.msk [vmem:[%s2267_s1 + $0x86] ss:$16 sm:$0x30] %vm3_vm0, %v311_v28  }
  0xc8   :  { %924 = vst.msk [vmem:[%s2267_s1 + $0x86] ss:$16 sm:$0xc0] %vm3_vm0, %v311_v28  }
  0xc9   :  { %945 = vst.msk [vmem:[%s2267_s1 + $0x107] ss:$16 sm:$0x3] %vm3_vm0, %v375_v26  }
  0xca   :  { %946 = vst.msk [vmem:[%s2267_s1 + $0x107] ss:$16 sm:$0xc] %vm3_vm0, %v375_v26  }
  0xcb   :  { %947 = vst.msk [vmem:[%s2267_s1 + $0x107] ss:$16 sm:$0x30] %vm3_vm0, %v375_v26  }
  0xcc   :  { %948 = vst.msk [vmem:[%s2267_s1 + $0x107] ss:$16 sm:$0xc0] %vm3_vm0, %v375_v26   ;;  %v477_v38 = vpop.permute.xlu1 %476   ;;  %v464_v39 = vpop.permute.xlu0 %463  }
  0xcd   :  { %940 = vst.msk [vmem:[%s2267_s1 + $0x87] ss:$16 sm:$0x3] %vm3_vm0, %v362_v29   ;;  %v604_v46 = vpop.permute.xlu2 %603  }
  0xce   :  { %941 = vst.msk [vmem:[%s2267_s1 + $0x87] ss:$16 sm:$0xc] %vm3_vm0, %v362_v29  }
  0xcf   :  { %942 = vst.msk [vmem:[%s2267_s1 + $0x87] ss:$16 sm:$0x30] %vm3_vm0, %v362_v29  }
  0xd0   :  { %943 = vst.msk [vmem:[%s2267_s1 + $0x87] ss:$16 sm:$0xc0] %vm3_vm0, %v362_v29  }
  0xd1   :  { %935 = vst.msk [vmem:[%s2267_s1 + $0x7] ss:$16 sm:$0x3] %vm3_vm0, %v349_v30  }
  0xd2   :  { %936 = vst.msk [vmem:[%s2267_s1 + $0x7] ss:$16 sm:$0xc] %vm3_vm0, %v349_v30  }
  0xd3   :  { %937 = vst.msk [vmem:[%s2267_s1 + $0x7] ss:$16 sm:$0x30] %vm3_vm0, %v349_v30  }
  0xd4   :  { %938 = vst.msk [vmem:[%s2267_s1 + $0x7] ss:$16 sm:$0xc0] %vm3_vm0, %v349_v30   ;;  %v515_v41 = vpop.permute.xlu1 %514   ;;  %v502_v42 = vpop.permute.xlu0 %501  }
  0xd5   :  { %959 = vst.msk [vmem:[%s2267_s1 + $0x88] ss:$16 sm:$0x3] %vm3_vm0, %v413_v31   ;;  %v643_v49 = vpop.permute.xlu2 %642  }
  0xd6   :  { %960 = vst.msk [vmem:[%s2267_s1 + $0x88] ss:$16 sm:$0xc] %vm3_vm0, %v413_v31  }
  0xd7   :  { %961 = vst.msk [vmem:[%s2267_s1 + $0x88] ss:$16 sm:$0x30] %vm3_vm0, %v413_v31  }
  0xd8   :  { %962 = vst.msk [vmem:[%s2267_s1 + $0x88] ss:$16 sm:$0xc0] %vm3_vm0, %v413_v31  }
  0xd9   :  { %954 = vst.msk [vmem:[%s2267_s1 + $0x8] ss:$16 sm:$0x3] %vm3_vm0, %v400_v32  }
  0xda   :  { %955 = vst.msk [vmem:[%s2267_s1 + $0x8] ss:$16 sm:$0xc] %vm3_vm0, %v400_v32  }
  0xdb   :  { %956 = vst.msk [vmem:[%s2267_s1 + $0x8] ss:$16 sm:$0x30] %vm3_vm0, %v400_v32  }
  0xdc   :  { %957 = vst.msk [vmem:[%s2267_s1 + $0x8] ss:$16 sm:$0xc0] %vm3_vm0, %v400_v32   ;;  %v553_v44 = vpop.permute.xlu1 %552   ;;  %v541_v45 = vpop.permute.xlu0 %540  }
  0xdd   :  { %950 = vst.msk [vmem:[%s2267_s1 + $0x187] ss:$16 sm:$0x3] %vm3_vm0, %v388_v33   ;;  %v681_v52 = vpop.permute.xlu2 %680  }
  0xde   :  { %951 = vst.msk [vmem:[%s2267_s1 + $0x187] ss:$16 sm:$0xc] %vm3_vm0, %v388_v33  }
  0xdf   :  { %952 = vst.msk [vmem:[%s2267_s1 + $0x187] ss:$16 sm:$0x30] %vm3_vm0, %v388_v33  }
  0xe0   :  { %953 = vst.msk [vmem:[%s2267_s1 + $0x187] ss:$16 sm:$0xc0] %vm3_vm0, %v388_v33  }
  0xe1   :  { %973 = vst.msk [vmem:[%s2267_s1 + $0x9] ss:$16 sm:$0x3] %vm3_vm0, %v451_v34  }
  0xe2   :  { %974 = vst.msk [vmem:[%s2267_s1 + $0x9] ss:$16 sm:$0xc] %vm3_vm0, %v451_v34  }
  0xe3   :  { %975 = vst.msk [vmem:[%s2267_s1 + $0x9] ss:$16 sm:$0x30] %vm3_vm0, %v451_v34  }
  0xe4   :  { %976 = vst.msk [vmem:[%s2267_s1 + $0x9] ss:$16 sm:$0xc0] %vm3_vm0, %v451_v34   ;;  %v592_v47 = vpop.permute.xlu1 %591   ;;  %v579_v48 = vpop.permute.xlu0 %578  }
  0xe5   :  { %969 = vst.msk [vmem:[%s2267_s1 + $0x188] ss:$16 sm:$0x3] %vm3_vm0, %v439_v35   ;;  %v719_v55 = vpop.permute.xlu2 %718  }
  0xe6   :  { %970 = vst.msk [vmem:[%s2267_s1 + $0x188] ss:$16 sm:$0xc] %vm3_vm0, %v439_v35  }
  0xe7   :  { %971 = vst.msk [vmem:[%s2267_s1 + $0x188] ss:$16 sm:$0x30] %vm3_vm0, %v439_v35  }
  0xe8   :  { %972 = vst.msk [vmem:[%s2267_s1 + $0x188] ss:$16 sm:$0xc0] %vm3_vm0, %v439_v35  }
  0xe9   :  { %964 = vst.msk [vmem:[%s2267_s1 + $0x108] ss:$16 sm:$0x3] %vm3_vm0, %v426_v36  }
  0xea   :  { %965 = vst.msk [vmem:[%s2267_s1 + $0x108] ss:$16 sm:$0xc] %vm3_vm0, %v426_v36  }
  0xeb   :  { %966 = vst.msk [vmem:[%s2267_s1 + $0x108] ss:$16 sm:$0x30] %vm3_vm0, %v426_v36  }
  0xec   :  { %967 = vst.msk [vmem:[%s2267_s1 + $0x108] ss:$16 sm:$0xc0] %vm3_vm0, %v426_v36   ;;  %v630_v50 = vpop.permute.xlu1 %629   ;;  %v617_v51 = vpop.permute.xlu0 %616  }
  0xed   :  { %988 = vst.msk [vmem:[%s2267_s1 + $0x189] ss:$16 sm:$0x3] %vm3_vm0, %v490_v37   ;;  %v757_v58 = vpop.permute.xlu2 %756  }
  0xee   :  { %989 = vst.msk [vmem:[%s2267_s1 + $0x189] ss:$16 sm:$0xc] %vm3_vm0, %v490_v37  }
  0xef   :  { %990 = vst.msk [vmem:[%s2267_s1 + $0x189] ss:$16 sm:$0x30] %vm3_vm0, %v490_v37  }
  0xf0   :  { %991 = vst.msk [vmem:[%s2267_s1 + $0x189] ss:$16 sm:$0xc0] %vm3_vm0, %v490_v37  }
  0xf1   :  { %983 = vst.msk [vmem:[%s2267_s1 + $0x109] ss:$16 sm:$0x3] %vm3_vm0, %v477_v38  }
  0xf2   :  { %984 = vst.msk [vmem:[%s2267_s1 + $0x109] ss:$16 sm:$0xc] %vm3_vm0, %v477_v38  }
  0xf3   :  { %985 = vst.msk [vmem:[%s2267_s1 + $0x109] ss:$16 sm:$0x30] %vm3_vm0, %v477_v38  }
  0xf4   :  { %986 = vst.msk [vmem:[%s2267_s1 + $0x109] ss:$16 sm:$0xc0] %vm3_vm0, %v477_v38   ;;  %v668_v53 = vpop.permute.xlu1 %667   ;;  %v655_v54 = vpop.permute.xlu0 %654  }
  0xf5   :  { %978 = vst.msk [vmem:[%s2267_s1 + $0x89] ss:$16 sm:$0x3] %vm3_vm0, %v464_v39   ;;  %v796_v61 = vpop.permute.xlu2 %795  }
  0xf6   :  { %979 = vst.msk [vmem:[%s2267_s1 + $0x89] ss:$16 sm:$0xc] %vm3_vm0, %v464_v39  }
  0xf7   :  { %980 = vst.msk [vmem:[%s2267_s1 + $0x89] ss:$16 sm:$0x30] %vm3_vm0, %v464_v39  }
  0xf8   :  { %981 = vst.msk [vmem:[%s2267_s1 + $0x89] ss:$16 sm:$0xc0] %vm3_vm0, %v464_v39  }
  0xf9   :  { %1002 = vst.msk [vmem:[%s2267_s1 + $0x10a] ss:$16 sm:$0x3] %vm3_vm0, %v528_v40  }
  0xfa   :  { %1003 = vst.msk [vmem:[%s2267_s1 + $0x10a] ss:$16 sm:$0xc] %vm3_vm0, %v528_v40  }
  0xfb   :  { %1004 = vst.msk [vmem:[%s2267_s1 + $0x10a] ss:$16 sm:$0x30] %vm3_vm0, %v528_v40  }
  0xfc   :  { %1005 = vst.msk [vmem:[%s2267_s1 + $0x10a] ss:$16 sm:$0xc0] %vm3_vm0, %v528_v40   ;;  %v706_v56 = vpop.permute.xlu1 %705   ;;  %v694_v57 = vpop.permute.xlu0 %693  }
  0xfd   :  { %997 = vst.msk [vmem:[%s2267_s1 + $0x8a] ss:$16 sm:$0x3] %vm3_vm0, %v515_v41  }
  0xfe   :  { %998 = vst.msk [vmem:[%s2267_s1 + $0x8a] ss:$16 sm:$0xc] %vm3_vm0, %v515_v41  }
  0xff   :  { %999 = vst.msk [vmem:[%s2267_s1 + $0x8a] ss:$16 sm:$0x30] %vm3_vm0, %v515_v41  }
 0x100   :  { %1000 = vst.msk [vmem:[%s2267_s1 + $0x8a] ss:$16 sm:$0xc0] %vm3_vm0, %v515_v41  }
 0x101   :  { %992 = vst.msk [vmem:[%s2267_s1 + $0xa] ss:$16 sm:$0x3] %vm3_vm0, %v502_v42  }
 0x102   :  { %993 = vst.msk [vmem:[%s2267_s1 + $0xa] ss:$16 sm:$0xc] %vm3_vm0, %v502_v42  }
 0x103   :  { %994 = vst.msk [vmem:[%s2267_s1 + $0xa] ss:$16 sm:$0x30] %vm3_vm0, %v502_v42  }
 0x104   :  { %995 = vst.msk [vmem:[%s2267_s1 + $0xa] ss:$16 sm:$0xc0] %vm3_vm0, %v502_v42   ;;  %v745_v59 = vpop.permute.xlu1 %744   ;;  %v732_v60 = vpop.permute.xlu0 %731  }
 0x105   :  { %1016 = vst.msk [vmem:[%s2267_s1 + $0x8b] ss:$16 sm:$0x3] %vm3_vm0, %v566_v43  }
 0x106   :  { %1017 = vst.msk [vmem:[%s2267_s1 + $0x8b] ss:$16 sm:$0xc] %vm3_vm0, %v566_v43  }
 0x107   :  { %1018 = vst.msk [vmem:[%s2267_s1 + $0x8b] ss:$16 sm:$0x30] %vm3_vm0, %v566_v43  }
 0x108   :  { %1019 = vst.msk [vmem:[%s2267_s1 + $0x8b] ss:$16 sm:$0xc0] %vm3_vm0, %v566_v43  }
 0x109   :  { %1011 = vst.msk [vmem:[%s2267_s1 + $0xb] ss:$16 sm:$0x3] %vm3_vm0, %v553_v44  }
 0x10a   :  { %1012 = vst.msk [vmem:[%s2267_s1 + $0xb] ss:$16 sm:$0xc] %vm3_vm0, %v553_v44  }
 0x10b   :  { %1013 = vst.msk [vmem:[%s2267_s1 + $0xb] ss:$16 sm:$0x30] %vm3_vm0, %v553_v44  }
 0x10c   :  { %1014 = vst.msk [vmem:[%s2267_s1 + $0xb] ss:$16 sm:$0xc0] %vm3_vm0, %v553_v44   ;;  %v783_v62 = vpop.permute.xlu1 %782   ;;  %v770_v63 = vpop.permute.xlu0 %769  }
 0x10d   :  { %1007 = vst.msk [vmem:[%s2267_s1 + $0x18a] ss:$16 sm:$0x3] %vm3_vm0, %v541_v45  }
 0x10e   :  { %1008 = vst.msk [vmem:[%s2267_s1 + $0x18a] ss:$16 sm:$0xc] %vm3_vm0, %v541_v45  }
 0x10f   :  { %1009 = vst.msk [vmem:[%s2267_s1 + $0x18a] ss:$16 sm:$0x30] %vm3_vm0, %v541_v45  }
 0x110   :  { %1010 = vst.msk [vmem:[%s2267_s1 + $0x18a] ss:$16 sm:$0xc0] %vm3_vm0, %v541_v45  }
 0x111   :  { %1030 = vst.msk [vmem:[%s2267_s1 + $0xc] ss:$16 sm:$0x3] %vm3_vm0, %v604_v46  }
 0x112   :  { %1031 = vst.msk [vmem:[%s2267_s1 + $0xc] ss:$16 sm:$0xc] %vm3_vm0, %v604_v46  }
 0x113   :  { %1032 = vst.msk [vmem:[%s2267_s1 + $0xc] ss:$16 sm:$0x30] %vm3_vm0, %v604_v46  }
 0x114   :  { %1033 = vst.msk [vmem:[%s2267_s1 + $0xc] ss:$16 sm:$0xc0] %vm3_vm0, %v604_v46  }
 0x115   :  { %1026 = vst.msk [vmem:[%s2267_s1 + $0x18b] ss:$16 sm:$0x3] %vm3_vm0, %v592_v47  }
 0x116   :  { %1027 = vst.msk [vmem:[%s2267_s1 + $0x18b] ss:$16 sm:$0xc] %vm3_vm0, %v592_v47  }
 0x117   :  { %1028 = vst.msk [vmem:[%s2267_s1 + $0x18b] ss:$16 sm:$0x30] %vm3_vm0, %v592_v47  }
 0x118   :  { %1029 = vst.msk [vmem:[%s2267_s1 + $0x18b] ss:$16 sm:$0xc0] %vm3_vm0, %v592_v47  }
 0x119   :  { %1021 = vst.msk [vmem:[%s2267_s1 + $0x10b] ss:$16 sm:$0x3] %vm3_vm0, %v579_v48  }
 0x11a   :  { %1022 = vst.msk [vmem:[%s2267_s1 + $0x10b] ss:$16 sm:$0xc] %vm3_vm0, %v579_v48  }
 0x11b   :  { %1023 = vst.msk [vmem:[%s2267_s1 + $0x10b] ss:$16 sm:$0x30] %vm3_vm0, %v579_v48  }
 0x11c   :  { %1024 = vst.msk [vmem:[%s2267_s1 + $0x10b] ss:$16 sm:$0xc0] %vm3_vm0, %v579_v48  }
 0x11d   :  { %1045 = vst.msk [vmem:[%s2267_s1 + $0x18c] ss:$16 sm:$0x3] %vm3_vm0, %v643_v49  }
 0x11e   :  { %1046 = vst.msk [vmem:[%s2267_s1 + $0x18c] ss:$16 sm:$0xc] %vm3_vm0, %v643_v49  }
 0x11f   :  { %1047 = vst.msk [vmem:[%s2267_s1 + $0x18c] ss:$16 sm:$0x30] %vm3_vm0, %v643_v49  }
 0x120   :  { %1048 = vst.msk [vmem:[%s2267_s1 + $0x18c] ss:$16 sm:$0xc0] %vm3_vm0, %v643_v49  }
 0x121   :  { %1040 = vst.msk [vmem:[%s2267_s1 + $0x10c] ss:$16 sm:$0x3] %vm3_vm0, %v630_v50  }
 0x122   :  { %1041 = vst.msk [vmem:[%s2267_s1 + $0x10c] ss:$16 sm:$0xc] %vm3_vm0, %v630_v50  }
 0x123   :  { %1042 = vst.msk [vmem:[%s2267_s1 + $0x10c] ss:$16 sm:$0x30] %vm3_vm0, %v630_v50  }
 0x124   :  { %1043 = vst.msk [vmem:[%s2267_s1 + $0x10c] ss:$16 sm:$0xc0] %vm3_vm0, %v630_v50  }
 0x125   :  { %1035 = vst.msk [vmem:[%s2267_s1 + $0x8c] ss:$16 sm:$0x3] %vm3_vm0, %v617_v51  }
 0x126   :  { %1036 = vst.msk [vmem:[%s2267_s1 + $0x8c] ss:$16 sm:$0xc] %vm3_vm0, %v617_v51  }
 0x127   :  { %1037 = vst.msk [vmem:[%s2267_s1 + $0x8c] ss:$16 sm:$0x30] %vm3_vm0, %v617_v51  }
 0x128   :  { %1038 = vst.msk [vmem:[%s2267_s1 + $0x8c] ss:$16 sm:$0xc0] %vm3_vm0, %v617_v51  }
 0x129   :  { %1059 = vst.msk [vmem:[%s2267_s1 + $0x10d] ss:$16 sm:$0x3] %vm3_vm0, %v681_v52  }
 0x12a   :  { %1060 = vst.msk [vmem:[%s2267_s1 + $0x10d] ss:$16 sm:$0xc] %vm3_vm0, %v681_v52  }
 0x12b   :  { %1061 = vst.msk [vmem:[%s2267_s1 + $0x10d] ss:$16 sm:$0x30] %vm3_vm0, %v681_v52  }
 0x12c   :  { %1062 = vst.msk [vmem:[%s2267_s1 + $0x10d] ss:$16 sm:$0xc0] %vm3_vm0, %v681_v52  }
 0x12d   :  { %1054 = vst.msk [vmem:[%s2267_s1 + $0x8d] ss:$16 sm:$0x3] %vm3_vm0, %v668_v53  }
 0x12e   :  { %1055 = vst.msk [vmem:[%s2267_s1 + $0x8d] ss:$16 sm:$0xc] %vm3_vm0, %v668_v53  }
 0x12f   :  { %1056 = vst.msk [vmem:[%s2267_s1 + $0x8d] ss:$16 sm:$0x30] %vm3_vm0, %v668_v53  }
 0x130   :  { %1057 = vst.msk [vmem:[%s2267_s1 + $0x8d] ss:$16 sm:$0xc0] %vm3_vm0, %v668_v53  }
 0x131   :  { %1049 = vst.msk [vmem:[%s2267_s1 + $0xd] ss:$16 sm:$0x3] %vm3_vm0, %v655_v54  }
 0x132   :  { %1050 = vst.msk [vmem:[%s2267_s1 + $0xd] ss:$16 sm:$0xc] %vm3_vm0, %v655_v54  }
 0x133   :  { %1051 = vst.msk [vmem:[%s2267_s1 + $0xd] ss:$16 sm:$0x30] %vm3_vm0, %v655_v54  }
 0x134   :  { %1052 = vst.msk [vmem:[%s2267_s1 + $0xd] ss:$16 sm:$0xc0] %vm3_vm0, %v655_v54  }
 0x135   :  { %1073 = vst.msk [vmem:[%s2267_s1 + $0x8e] ss:$16 sm:$0x3] %vm3_vm0, %v719_v55  }
 0x136   :  { %1074 = vst.msk [vmem:[%s2267_s1 + $0x8e] ss:$16 sm:$0xc] %vm3_vm0, %v719_v55  }
 0x137   :  { %1075 = vst.msk [vmem:[%s2267_s1 + $0x8e] ss:$16 sm:$0x30] %vm3_vm0, %v719_v55  }
 0x138   :  { %1076 = vst.msk [vmem:[%s2267_s1 + $0x8e] ss:$16 sm:$0xc0] %vm3_vm0, %v719_v55  }
 0x139   :  { %1068 = vst.msk [vmem:[%s2267_s1 + $0xe] ss:$16 sm:$0x3] %vm3_vm0, %v706_v56  }
 0x13a   :  { %1069 = vst.msk [vmem:[%s2267_s1 + $0xe] ss:$16 sm:$0xc] %vm3_vm0, %v706_v56  }
 0x13b   :  { %1070 = vst.msk [vmem:[%s2267_s1 + $0xe] ss:$16 sm:$0x30] %vm3_vm0, %v706_v56  }
 0x13c   :  { %1071 = vst.msk [vmem:[%s2267_s1 + $0xe] ss:$16 sm:$0xc0] %vm3_vm0, %v706_v56  }
 0x13d   :  { %1064 = vst.msk [vmem:[%s2267_s1 + $0x18d] ss:$16 sm:$0x3] %vm3_vm0, %v694_v57  }
 0x13e   :  { %1065 = vst.msk [vmem:[%s2267_s1 + $0x18d] ss:$16 sm:$0xc] %vm3_vm0, %v694_v57  }
 0x13f   :  { %1066 = vst.msk [vmem:[%s2267_s1 + $0x18d] ss:$16 sm:$0x30] %vm3_vm0, %v694_v57  }
 0x140   :  { %1067 = vst.msk [vmem:[%s2267_s1 + $0x18d] ss:$16 sm:$0xc0] %vm3_vm0, %v694_v57  }
 0x141   :  { %1087 = vst.msk [vmem:[%s2267_s1 + $0xf] ss:$16 sm:$0x3] %vm3_vm0, %v757_v58  }
 0x142   :  { %1088 = vst.msk [vmem:[%s2267_s1 + $0xf] ss:$16 sm:$0xc] %vm3_vm0, %v757_v58  }
 0x143   :  { %1089 = vst.msk [vmem:[%s2267_s1 + $0xf] ss:$16 sm:$0x30] %vm3_vm0, %v757_v58  }
 0x144   :  { %1090 = vst.msk [vmem:[%s2267_s1 + $0xf] ss:$16 sm:$0xc0] %vm3_vm0, %v757_v58  }
 0x145   :  { %1083 = vst.msk [vmem:[%s2267_s1 + $0x18e] ss:$16 sm:$0x3] %vm3_vm0, %v745_v59  }
 0x146   :  { %1084 = vst.msk [vmem:[%s2267_s1 + $0x18e] ss:$16 sm:$0xc] %vm3_vm0, %v745_v59  }
 0x147   :  { %1085 = vst.msk [vmem:[%s2267_s1 + $0x18e] ss:$16 sm:$0x30] %vm3_vm0, %v745_v59  }
 0x148   :  { %1086 = vst.msk [vmem:[%s2267_s1 + $0x18e] ss:$16 sm:$0xc0] %vm3_vm0, %v745_v59  }
 0x149   :  { %1078 = vst.msk [vmem:[%s2267_s1 + $0x10e] ss:$16 sm:$0x3] %vm3_vm0, %v732_v60  }
 0x14a   :  { %1079 = vst.msk [vmem:[%s2267_s1 + $0x10e] ss:$16 sm:$0xc] %vm3_vm0, %v732_v60  }
 0x14b   :  { %1080 = vst.msk [vmem:[%s2267_s1 + $0x10e] ss:$16 sm:$0x30] %vm3_vm0, %v732_v60  }
 0x14c   :  { %1081 = vst.msk [vmem:[%s2267_s1 + $0x10e] ss:$16 sm:$0xc0] %vm3_vm0, %v732_v60  }
 0x14d   :  { %1102 = vst.msk [vmem:[%s2267_s1 + $0x18f] ss:$16 sm:$0x3] %vm3_vm0, %v796_v61  }
 0x14e   :  { %1103 = vst.msk [vmem:[%s2267_s1 + $0x18f] ss:$16 sm:$0xc] %vm3_vm0, %v796_v61  }
 0x14f   :  { %1104 = vst.msk [vmem:[%s2267_s1 + $0x18f] ss:$16 sm:$0x30] %vm3_vm0, %v796_v61  }
 0x150   :  { %1105 = vst.msk [vmem:[%s2267_s1 + $0x18f] ss:$16 sm:$0xc0] %vm3_vm0, %v796_v61  }
 0x151   :  { %1097 = vst.msk [vmem:[%s2267_s1 + $0x10f] ss:$16 sm:$0x3] %vm3_vm0, %v783_v62  }
 0x152   :  { %1098 = vst.msk [vmem:[%s2267_s1 + $0x10f] ss:$16 sm:$0xc] %vm3_vm0, %v783_v62  }
 0x153   :  { %1099 = vst.msk [vmem:[%s2267_s1 + $0x10f] ss:$16 sm:$0x30] %vm3_vm0, %v783_v62  }
 0x154   :  { %1100 = vst.msk [vmem:[%s2267_s1 + $0x10f] ss:$16 sm:$0xc0] %vm3_vm0, %v783_v62  }
 0x155   :  { %1092 = vst.msk [vmem:[%s2267_s1 + $0x8f] ss:$16 sm:$0x3] %vm3_vm0, %v770_v63  }
 0x156   :  { %1093 = vst.msk [vmem:[%s2267_s1 + $0x8f] ss:$16 sm:$0xc] %vm3_vm0, %v770_v63  }
 0x157   :  { %1094 = vst.msk [vmem:[%s2267_s1 + $0x8f] ss:$16 sm:$0x30] %vm3_vm0, %v770_v63  }
 0x158   :  { %1095 = vst.msk [vmem:[%s2267_s1 + $0x8f] ss:$16 sm:$0xc0] %vm3_vm0, %v770_v63  }

// kernel: hausdorff_binary_loss.1
= control target key start
LH: loop header
LB: loop body
LE: loop exit
PB: predicated region body
PF: predicated region fallthrough
CT: control target
= control target key end

     0   :  { %s1843_s9 = smov 0   ;;  %s3597_s0 = inlined_call_operand.vmem [shape: f32[2,256,4], index: 0, kind: input, shape index: {}]   ;;  %s3598_s1 = inlined_call_operand.vmem [shape: f32[2,4,256], index: 1, kind: input, shape index: {}]   ;;  %s3599_s2 = inlined_call_operand.vmem [shape: f32[2,1,1], index: 2, kind: output, shape index: {}]  }
   0x1 LB: > { %s1742_s10 = sadd.s32 4294967295, %s1822_s9   ;;  %p1746_p0 = scmp.ge.s32.totalorder %s1822_s9, 1  ;;  %s1822_s9 = sphi %s1843_s9, %s12_s9  }
   0x2   : > { %p122_p1 = scmp.lt.s32.totalorder %s1822_s9, 3 }
   0x4   : > { %p123_p2 = pnand %p1746_p0, %p122_p1 }
   0x6   : > { %126 = sbr.rel (%p123_p2) target bundleno = 697 (0x2b9), region = 28 }
   0xb   : > { %p147_p3 = scmp.lt.s32.totalorder %s1742_s10, 1  ;;  %v1824_v0 = vmov 2   ;;  %v1825_v33 = vmov 3  }
   0xc   : > { %1772 = vset.pattern.permute.xlu2 %v1824_v0  ;;  %1771 = vset.pattern.permute.xlu1 %v1824_v0 }
   0xd   : > { %1770 = vset.pattern.permute.xlu0 %v1824_v0  ;;  %s3950_s10 = smov (!%p147_p3, %s1742_s10), 1 }
   0xe   : > { %s1754_s11 = sshll.u32 %s3950_s10, 8  ;;  %s1755_s15 = sshll.u32 %s3950_s10, 3 }
   0xf   : > { %s1857_s14 = scalar_lea.vmem %s3597_s0, %s1754_s11  ;;  %s2059_s18 = scalar_lea.vmem %s3598_s1, %s1755_s15 }
  0x10   : > { %v1860_v1 = vld [vmem:[%s1857_s14 + $0x20] sm:$0xff]  ;;  %v1863_v2 = vld [vmem:[%s1857_s14 + $0x10] sm:$0xff]  ;;  %v1872_v4 = vld [vmem:[%s1857_s14 + $0x28] sm:$0xff]  ;;  %s159_s22 = scalar_lea.vmem %s3599_s2, %s3950_s10 }
  0x11   : > { %v1866_v3 = vld [vmem:[%s1857_s14] sm:$0xff]  ;;  %281 = vperm.xlu2 %1772, %v1860_v1   ;;  %271 = vperm.xlu1 %1771, %v1863_v2   ;;  %v1875_v5 = vld [vmem:[%s1857_s14 + $0x18] sm:$0xff]  ;;  %v1878_v6 = vld [vmem:[%s1857_s14 + $0x8] sm:$0xff]  ;;  %vm195_vm2 = vcmp.gt.f32.partialorder %v1863_v2, 0.0  ;;  %vm197_vm5 = vcmp.gt.f32.partialorder %v1860_v1, 0.0  ;;  %vm198_vm7 = vcmp.gt.f32.partialorder %v1872_v4, 0.0 }
  0x12   : > { %3670 = vst [vmem:[#allocation2_spill] sm:$0xff] %v1866_v3  ;;  %261 = vperm.xlu0 %1770, %v1866_v3   ;;  %v1884_v7 = vld [vmem:[%s1857_s14 + $0x40] sm:$0xff]  ;;  %v1887_v8 = vld [vmem:[%s1857_s14 + $0x38] sm:$0xff]  ;;  %v1890_v9 = vld [vmem:[%s1857_s14 + $0x30] sm:$0xff]  ;;  %vm194_vm0 = vcmp.gt.f32.partialorder %v1878_v6, 0.0  ;;  %vm193_vm1 = vcmp.gt.f32.partialorder %v1866_v3, 0.0 }
  0x13   : > { %3671 = vst [vmem:[#allocation3_spill] sm:$0xff] %v1878_v6  ;;  %v1896_v10 = vld [vmem:[%s1857_s14 + $0x58] sm:$0xff]  ;;  %v1899_v11 = vld [vmem:[%s1857_s14 + $0x50] sm:$0xff]  ;;  %v1902_v12 = vld [vmem:[%s1857_s14 + $0x48] sm:$0xff]  ;;  %vm199_vm3 = vcmp.gt.f32.partialorder %v1890_v9, 0.0  ;;  %vm196_vm4 = vcmp.gt.f32.partialorder %v1875_v5, 0.0 }
  0x14   : > { %3672 = vst [vmem:[#allocation4_spill] sm:$0xff] %v1890_v9  ;;  %v1908_v13 = vld [vmem:[%s1857_s14 + $0x70] sm:$0xff]  ;;  %v1911_v14 = vld [vmem:[%s1857_s14 + $0x68] sm:$0xff]  ;;  %v1914_v15 = vld [vmem:[%s1857_s14 + $0x60] sm:$0xff]  ;;  %vm202_vm6 = vcmp.gt.f32.partialorder %v1902_v12, 0.0  ;;  %vm200_vm8 = vcmp.gt.f32.partialorder %v1887_v8, 0.0 }
  0x15   : > { %v1920_v16 = vld [vmem:[%s1857_s14 + $0x88] sm:$0xff]  ;;  %v1923_v17 = vld [vmem:[%s1857_s14 + $0x80] sm:$0xff]  ;;  %v1926_v18 = vld [vmem:[%s1857_s14 + $0x78] sm:$0xff]  ;;  %vm205_vm9 = vcmp.gt.f32.partialorder %v1914_v15, 0.0  ;;  %vm201_vm10 = vcmp.gt.f32.partialorder %v1884_v7, 0.0  ;;  %vm203_vm11 = vcmp.gt.f32.partialorder %v1899_v11, 0.0 }
  0x16   : > { %v1932_v19 = vld [vmem:[%s1857_s14 + $0xa0] sm:$0xff]  ;;  %v1935_v20 = vld [vmem:[%s1857_s14 + $0x98] sm:$0xff]  ;;  %v1938_v21 = vld [vmem:[%s1857_s14 + $0x90] sm:$0xff]  ;;  %vm208_vm12 = vcmp.gt.f32.partialorder %v1926_v18, 0.0  ;;  %vm204_vm13 = vcmp.gt.f32.partialorder %v1896_v10, 0.0  ;;  %vm206_vm14 = vcmp.gt.f32.partialorder %v1911_v14, 0.0 }
  0x17   : > { %v1944_v22 = vld [vmem:[%s1857_s14 + $0xb8] sm:$0xff]  ;;  %v1947_v23 = vld [vmem:[%s1857_s14 + $0xb0] sm:$0xff]  ;;  %v1950_v24 = vld [vmem:[%s1857_s14 + $0xa8] sm:$0xff]  ;;  %vm211_vm15 = vcmp.gt.f32.partialorder %v1938_v21, 0.0 }
  0x18   : > { %3673 = vst [vmem:[#allocation5_spill] sm:$0xff] %v1944_v22  ;;  %v1956_v25 = vld [vmem:[%s1857_s14 + $0xd0] sm:$0xff]  ;;  %v1959_v26 = vld [vmem:[%s1857_s14 + $0xc8] sm:$0xff]  ;;  %v1962_v27 = vld [vmem:[%s1857_s14 + $0xc0] sm:$0xff] }
  0x19   : > { %286 = vperm.xlu2 %1772, %v1872_v4   ;;  %276 = vperm.xlu1 %1771, %v1875_v5   ;;  %3674 = vst [vmem:[#allocation6_spill] sm:$0xff] %v1956_v25  ;;  %v1968_v28 = vld [vmem:[%s1857_s14 + $0xe8] sm:$0xff]  ;;  %v1971_v29 = vld [vmem:[%s1857_s14 + $0xe0] sm:$0xff]  ;;  %v1974_v30 = vld [vmem:[%s1857_s14 + $0xd8] sm:$0xff] }
  0x1a   : > { %266 = vperm.xlu0 %1770, %v1878_v6   ;;  %3675 = vst [vmem:[#allocation7_spill] sm:$0xff] %v1959_v26  ;;  %v1980_v31 = vld [vmem:[%s1857_s14 + $0xf8] sm:$0xff]  ;;  %v1983_v32 = vld [vmem:[%s1857_s14 + $0xf0] sm:$0xff]  ;;  %v2062_v55 = vld [vmem:[%s2059_s18] sm:$0xff] }
  0x1b   : > { %3676 = vst [vmem:[#allocation8_spill] sm:$0xff] %v1968_v28  ;;  %v420_v58 = vperm.slane %v2062_v55, 2  ;;  %v421_v59 = vperm.slane %v2062_v55, 6  ;;  %v618_v61 = vperm.slane %v2062_v55, 3  ;;  %v619_v62 = vperm.slane %v2062_v55, 7 }
  0x1c   : > { %3677 = vst [vmem:[#allocation9_spill] sm:$0xff] %v1971_v29 }
  0x1d   : > { %3678 = vst [vmem:[#allocation10_spill] sm:$0xff] %v1980_v31  ;;  %v2079_v63 = vperm.slane %v420_v58, 2  ;;  %v2081_v0 = vperm.slane %v421_v59, 2 }
  0x1e   : > { %3679 = vst [vmem:[#allocation11_spill] sm:$0xff] %v1983_v32 }
  0x1f   : > { %3680 = vst [vmem:[#allocation12_spill] sm:$0xff] %v2062_v55 }
  0x21   : > { %301 = vperm.xlu2 %1772, %v1884_v7   ;;  %296 = vperm.xlu1 %1771, %v1887_v8  }
  0x22   : > { %291 = vperm.xlu0 %1770, %v1890_v9  }
  0x29   : > { %316 = vperm.xlu2 %1772, %v1896_v10   ;;  %311 = vperm.xlu1 %1771, %v1899_v11  }
  0x2a   : > { %306 = vperm.xlu0 %1770, %v1902_v12  }
  0x31   : > { %331 = vperm.xlu2 %1772, %v1908_v13   ;;  %326 = vperm.xlu1 %1771, %v1911_v14  }
  0x32   : > { %321 = vperm.xlu0 %1770, %v1914_v15  }
  0x39   : > { %346 = vperm.xlu2 %1772, %v1920_v16   ;;  %341 = vperm.xlu1 %1771, %v1923_v17  }
  0x3a   : > { %336 = vperm.xlu0 %1770, %v1926_v18  }
  0x41   : > { %361 = vperm.xlu2 %1772, %v1932_v19   ;;  %356 = vperm.xlu1 %1771, %v1935_v20  }
  0x42   : > { %351 = vperm.xlu0 %1770, %v1938_v21  }
  0x49   : > { %376 = vperm.xlu2 %1772, %v1944_v22   ;;  %371 = vperm.xlu1 %1771, %v1947_v23  }
  0x4a   : > { %366 = vperm.xlu0 %1770, %v1950_v24  }
  0x51   : > { %391 = vperm.xlu2 %1772, %v1956_v25   ;;  %386 = vperm.xlu1 %1771, %v1959_v26  }
  0x52   : > { %381 = vperm.xlu0 %1770, %v1962_v27  }
  0x59   : > { %406 = vperm.xlu2 %1772, %v1968_v28   ;;  %401 = vperm.xlu1 %1771, %v1971_v29  }
  0x5a   : > { %396 = vperm.xlu0 %1770, %v1974_v30  }
  0x61   : > { %1773 = vset.pattern.permute.xlu2 %v1825_v33  ;;  %416 = vperm.xlu1 %1771, %v1980_v31  }
  0x62   : > { %411 = vperm.xlu0 %1770, %v1983_v32   ;;  %491 = vperm.xlu2 %1773, %v1866_v3  }
  0x69   : > { %1775 = vset.pattern.permute.xlu1 %v1825_v33 }
  0x6a   : > { %1774 = vset.pattern.permute.xlu0 %v1825_v33  ;;  %499 = vperm.xlu1 %1775, %v1863_v2   ;;  %v3611_v33 = vmov 0  }
  0x6b   : > { %503 = vperm.xlu2 %1773, %v1875_v5   ;;  %495 = vperm.xlu0 %1774, %v1878_v6   ;;  %v1991_v34 = vpop.permute.xlu2 %281 }
  0x72   : > { %507 = vperm.xlu1 %1775, %v1860_v1  }
  0x73   : > { %511 = vperm.xlu2 %1773, %v1872_v4   ;;  %515 = vperm.xlu0 %1774, %v1890_v9   ;;  %v1996_v35 = vpop.permute.xlu2 %286 }
  0x7a   : > { %519 = vperm.xlu1 %1775, %v1887_v8  }
  0x7b   : > { %523 = vperm.xlu2 %1773, %v1884_v7   ;;  %527 = vperm.xlu0 %1774, %v1902_v12   ;;  %v2001_v36 = vpop.permute.xlu2 %301 }
  0x82   : > { %531 = vperm.xlu1 %1775, %v1899_v11  }
  0x83   : > { %535 = vperm.xlu2 %1773, %v1896_v10   ;;  %539 = vperm.xlu0 %1774, %v1914_v15   ;;  %v2006_v37 = vpop.permute.xlu2 %316  ;;  %v2008_v38 = vpop.permute.xlu1 %271 }
  0x84   : > { %v262_v39 = vpop.permute.xlu0 %261  ;;  %v448_v12 = vsub.f32 %v2006_v37, %v2079_v63  ;;  %v449_v4 = vsub.f32 %v2006_v37, %v2081_v0 }
  0x85   : > { %v426_v55 = vsub.f32 %v262_v39, %v2079_v63  ;;  %v427_v6 = vsub.f32 %v262_v39, %v2081_v0 }
  0x87   : > { %v688_v39 = vmul.f32 %v426_v55, %v426_v55  ;;  %v436_v55 = vsub.f32 %v1996_v35, %v2079_v63 }
  0x8a   : > { %543 = vperm.xlu1 %1775, %v1911_v14  }
  0x8b   : > { %547 = vperm.xlu2 %1773, %v1908_v13   ;;  %551 = vperm.xlu0 %1774, %v1926_v18   ;;  %v2013_v40 = vpop.permute.xlu2 %331  ;;  %v2015_v41 = vpop.permute.xlu1 %276 }
  0x8c   : > { %v2017_v42 = vpop.permute.xlu0 %266  ;;  %v432_v2 = vsub.f32 %v2015_v41, %v2079_v63 }
  0x92   : > { %555 = vperm.xlu1 %1775, %v1923_v17  }
  0x93   : > { %559 = vperm.xlu2 %1773, %v1920_v16   ;;  %563 = vperm.xlu0 %1774, %v1938_v21   ;;  %v2022_v43 = vpop.permute.xlu2 %346  ;;  %v2024_v44 = vpop.permute.xlu1 %296 }
  0x94   : > { %v2026_v45 = vpop.permute.xlu0 %291  ;;  %v460_v8 = vsub.f32 %v2022_v43, %v2079_v63  ;;  %v461_v7 = vsub.f32 %v2022_v43, %v2081_v0 }
  0x9a   : > { %567 = vperm.xlu1 %1775, %v1935_v20  }
  0x9b   : > { %571 = vperm.xlu2 %1773, %v1932_v19   ;;  %575 = vperm.xlu0 %1774, %v1950_v24   ;;  %v2031_v46 = vpop.permute.xlu2 %361  ;;  %v2033_v47 = vpop.permute.xlu1 %311 }
  0x9c   : > { %v2035_v48 = vpop.permute.xlu0 %306 }
  0x9d   : > { %v444_v11 = vsub.f32 %v2035_v48, %v2079_v63 }
  0xa2   : > { %579 = vperm.xlu1 %1775, %v1947_v23  }
  0xa3   : > { %583 = vperm.xlu2 %1773, %v1944_v22   ;;  %587 = vperm.xlu0 %1774, %v1962_v27   ;;  %v2040_v49 = vpop.permute.xlu2 %376  ;;  %v2042_v50 = vpop.permute.xlu1 %326 }
  0xa4   : > { %v2044_v51 = vpop.permute.xlu0 %321  ;;  %v453_v14 = vsub.f32 %v2042_v50, %v2081_v0 }
  0xaa   : > { %591 = vperm.xlu1 %1775, %v1959_v26  }
  0xab   : > { %595 = vperm.xlu2 %1773, %v1956_v25   ;;  %599 = vperm.xlu0 %1774, %v1974_v30   ;;  %v2050_v52 = vpop.permute.xlu2 %391  ;;  %v2052_v53 = vpop.permute.xlu1 %341  ;;  %v2085_v25 = vperm.slane %v618_v61, 3 }
  0xac   : > { %v2054_v54 = vpop.permute.xlu0 %336 }
  0xb2   : > { %603 = vperm.xlu1 %1775, %v1971_v29   ;;  %v880_v29 = vsel %vm193_vm1, 1, %v3611_v33  ;;  %vm209_vm1 = vcmp.gt.f32.partialorder %v1923_v17, 0.0 }
  0xb3   : > { %607 = vperm.xlu2 %1773, %v1968_v28   ;;  %611 = vperm.xlu0 %1774, %v1983_v32   ;;  %v2067_v56 = vpop.permute.xlu2 %406  ;;  %v2069_v57 = vpop.permute.xlu1 %356  ;;  %v881_v28 = vsel %vm194_vm0, 1, %v3611_v33  ;;  %v2087_v32 = vperm.slane %v619_v62, 3  ;;  %vm207_vm0 = vcmp.gt.f32.partialorder %v1908_v13, 0.0  ;;  %v450_v13 = vsub.f32 %v2044_v51, %v2079_v63 }
  0xb4   : > { %v2073_v60 = vpop.permute.xlu0 %351 }
  0xb5   : > { %3681 = vst [vmem:[#allocation13_spill] sm:$0xff] %v2073_v60 }
  0xba   : > { %615 = vperm.xlu1 %1775, %v1980_v31   ;;  %v689_v31 = vmul.f32 %v427_v6, %v427_v6 }
  0xbb   : > { %1776 = vset.pattern.permute.xlu2 %v3611_v33  ;;  %1777 = vset.pattern.permute.xlu0 %v3611_v33  ;;  %v2094_v58 = vpop.permute.xlu1 %371 }
  0xbc   : > { %3682 = vst [vmem:[#allocation14_spill] sm:$0xff] %v2094_v58  ;;  %916 = vperm.xlu0 %1777, %v881_v28   ;;  %v2096_v59 = vpop.permute.xlu0 %366  ;;  %913 = vperm.xlu2 %1776, %v880_v29   ;;  %v492_v61 = vpop.permute.xlu2 %491  ;;  %v3684_v58 = vmov 0  }
  0xbd   : > { %3683 = vst [vmem:[#allocation15_spill] sm:$0xff] %v2096_v59  ;;  %v624_v62 = vsub.f32 %v492_v61, %v2085_v25  ;;  %v625_v3 = vsub.f32 %v492_v61, %v2087_v32  ;;  %v882_v28 = vsel %vm195_vm2, 1, %v3684_v58  ;;  %v886_v59 = vsel %vm199_vm3, 1, %v3684_v58 }
  0xbe   : > { %v883_v61 = vsel %vm196_vm4, 1, %v3684_v58  ;;  %v887_v15 = vsel %vm200_vm8, 1, %v3684_v58  ;;  %v890_v18 = vsel %vm203_vm11, 1, %v3684_v58  ;;  %vm214_vm2 = vcmp.gt.f32.partialorder %v1950_v24, 0.0 }
  0xbf   : > { %v752_v33 = vmul.f32 %v624_v62, %v624_v62  ;;  %v753_v26 = vmul.f32 %v625_v3, %v625_v3  ;;  %v433_v3 = vsub.f32 %v2015_v41, %v2081_v0  ;;  %vm210_vm3 = vcmp.gt.f32.partialorder %v1920_v16, 0.0 }
  0xc0   : > { %v478_v24 = vsub.f32 %v2050_v52, %v2079_v63  ;;  %v479_v16 = vsub.f32 %v2050_v52, %v2081_v0  ;;  %vm212_vm4 = vcmp.gt.f32.partialorder %v1935_v20, 0.0  ;;  %vm220_vm8 = vcmp.gt.f32.partialorder %v1974_v30, 0.0 }
  0xc1   : > { %v2104_v60 = vadd.f32 %v752_v33, %v688_v39  ;;  %v2106_v29 = vadd.f32 %v753_v26, %v689_v31  ;;  %v434_v26 = vsub.f32 %v1991_v34, %v2079_v63  ;;  %v435_v31 = vsub.f32 %v1991_v34, %v2081_v0 }
  0xc2   : > { %1778 = vset.pattern.permute.xlu1 %v3684_v58  ;;  %v442_v34 = vsub.f32 %v2001_v36, %v2079_v63  ;;  %v443_v39 = vsub.f32 %v2001_v36, %v2081_v0 }
  0xc3   : > { %3685 = vst [vmem:[#allocation16_spill] sm:$0xff] %v2104_v60  ;;  %v2113_v5 = vpop.permute.xlu1 %386  ;;  %919 = vperm.xlu1 %1778, %v882_v28   ;;  %v694_v28 = vmul.f32 %v432_v2, %v432_v2  ;;  %v884_v60 = vsel %vm197_vm5, 1, %v3684_v58  ;;  %v2149_v2 = vmul.f32 %v435_v31, %v435_v31  ;;  %v2163_v31 = vmul.f32 %v448_v12, %v448_v12 }
  0xc4   : > { %3686 = vst [vmem:[#allocation17_spill] sm:$0xff] %v2106_v29  ;;  %931 = vperm.xlu0 %1777, %v886_v59   ;;  %v2117_v6 = vpop.permute.xlu0 %381  ;;  %922 = vperm.xlu2 %1776, %v883_v61   ;;  %v437_v59 = vsub.f32 %v1996_v35, %v2081_v0  ;;  %v695_v61 = vmul.f32 %v433_v3, %v433_v3  ;;  %v889_v35 = vsel %vm202_vm6, 1, %v3684_v58  ;;  %vm217_vm5 = vcmp.gt.f32.partialorder %v1962_v27, 0.0 }
  0xc5   : > { %3687 = vst [vmem:[#allocation18_spill] sm:$0xff] %v2113_v5  ;;  %v504_v33 = vpop.permute.xlu2 %503  ;;  %v2143_v5 = vmul.f32 %v434_v26, %v434_v26  ;;  %v698_v3 = vmul.f32 %v436_v55, %v436_v55  ;;  %v2155_v37 = vmul.f32 %v442_v34, %v442_v34  ;;  %v2157_v22 = vmul.f32 %v443_v39, %v443_v39 }
  0xc6   : > { %3688 = vst [vmem:[#allocation19_spill] sm:$0xff] %v2117_v6  ;;  %v630_v62 = vsub.f32 %v504_v33, %v2085_v25  ;;  %v631_v41 = vsub.f32 %v504_v33, %v2087_v32  ;;  %v885_v33 = vsel %vm198_vm7, 1, %v3684_v58  ;;  %v431_v26 = vsub.f32 %v2008_v38, %v2081_v0 }
  0xc7   : > { %v2165_v55 = vmul.f32 %v449_v4, %v449_v4  ;;  %v455_v39 = vsub.f32 %v2013_v40, %v2081_v0  ;;  %vm213_vm6 = vcmp.gt.f32.partialorder %v1932_v19, 0.0  ;;  %vm215_vm7 = vcmp.gt.f32.partialorder %v1947_v23, 0.0 }
  0xc8   : > { %v758_v1 = vmul.f32 %v630_v62, %v630_v62  ;;  %v759_v29 = vmul.f32 %v631_v41, %v631_v41  ;;  %v699_v62 = vmul.f32 %v437_v59, %v437_v59  ;;  %v430_v41 = vsub.f32 %v2008_v38, %v2079_v63 }
  0xc9   : > { %v454_v59 = vsub.f32 %v2013_v40, %v2079_v63  ;;  %v892_v40 = vsel %vm205_vm9, 1, %v3684_v58  ;;  %v465_v23 = vsub.f32 %v2069_v57, %v2081_v0 }
  0xca   : > { %v2145_v9 = vadd.f32 %v758_v1, %v694_v28  ;;  %v2147_v36 = vadd.f32 %v759_v29, %v695_v61  ;;  %v2174_v38 = vmul.f32 %v430_v41, %v430_v41  ;;  %v428_v61 = vsub.f32 %v2017_v42, %v2079_v63 }
  0xcb   : > { %v2153_v6 = vpop.permute.xlu1 %401  ;;  %925 = vperm.xlu1 %1778, %v884_v60   ;;  %v429_v1 = vsub.f32 %v2017_v42, %v2081_v0  ;;  %v2191_v41 = vmul.f32 %v431_v26, %v431_v26  ;;  %v2193_v42 = vmul.f32 %v454_v59, %v454_v59  ;;  %v2209_v26 = vmul.f32 %v460_v8, %v460_v8 }
  0xcc   : > { %3689 = vst [vmem:[#allocation20_spill] sm:$0xff] %v2145_v9  ;;  %940 = vperm.xlu0 %1777, %v889_v35   ;;  %v2161_v29 = vpop.permute.xlu0 %396  ;;  %928 = vperm.xlu2 %1776, %v885_v33   ;;  %v440_v35 = vsub.f32 %v2024_v44, %v2079_v63  ;;  %v888_v33 = vsel %vm201_vm10, 1, %v3684_v58  ;;  %v441_v9 = vsub.f32 %v2024_v44, %v2081_v0 }
  0xcd   : > { %3690 = vst [vmem:[#allocation21_spill] sm:$0xff] %v2147_v36  ;;  %v512_v28 = vpop.permute.xlu2 %511  ;;  %v2201_v36 = vmul.f32 %v428_v61, %v428_v61  ;;  %v2203_v43 = vmul.f32 %v429_v1, %v429_v1  ;;  %v466_v44 = vsub.f32 %v2031_v46, %v2079_v63 }
  0xce   : > { %3691 = vst [vmem:[#allocation22_spill] sm:$0xff] %v2153_v6  ;;  %v634_v60 = vsub.f32 %v512_v28, %v2085_v25  ;;  %v635_v34 = vsub.f32 %v512_v28, %v2087_v32  ;;  %v2219_v61 = vmul.f32 %v440_v35, %v440_v35 }
  0xcf   : > { %3692 = vst [vmem:[#allocation23_spill] sm:$0xff] %v2161_v29 }
  0xd0   : > { %v762_v12 = vmul.f32 %v634_v60, %v634_v60  ;;  %v763_v4 = vmul.f32 %v635_v34, %v635_v34  ;;  %v2199_v34 = vmul.f32 %v455_v39, %v455_v39  ;;  %v2217_v39 = vmul.f32 %v461_v7, %v461_v7 }
  0xd1   : > { %v2236_v7 = vmul.f32 %v441_v9, %v441_v9 }
  0xd2   : > { %v2195_v28 = vadd.f32 %v762_v12, %v698_v3  ;;  %v2197_v60 = vadd.f32 %v763_v4, %v699_v62  ;;  %v438_v3 = vsub.f32 %v2026_v45, %v2079_v63  ;;  %v439_v62 = vsub.f32 %v2026_v45, %v2081_v0 }
  0xd3   : > { %v2207_v6 = vpop.permute.xlu1 %416  ;;  %934 = vperm.xlu1 %1778, %v887_v15   ;;  %v467_v45 = vsub.f32 %v2031_v46, %v2081_v0  ;;  %v446_v4 = vsub.f32 %v2033_v47, %v2079_v63  ;;  %v447_v15 = vsub.f32 %v2033_v47, %v2081_v0  ;;  %v895_v46 = vsel %vm208_vm12, 1, %v3684_v58 }
  0xd4   : > { %3693 = vst [vmem:[#allocation24_spill] sm:$0xff] %v2195_v28  ;;  %949 = vperm.xlu0 %1777, %v892_v40   ;;  %v2215_v59 = vpop.permute.xlu0 %411  ;;  %937 = vperm.xlu2 %1776, %v888_v33   ;;  %v2239_v33 = vmul.f32 %v438_v3, %v438_v3  ;;  %v2241_v10 = vmul.f32 %v439_v62, %v439_v62 }
  0xd5   : > { %3694 = vst [vmem:[#allocation25_spill] sm:$0xff] %v2197_v60  ;;  %v524_v1 = vpop.permute.xlu2 %523  ;;  %v2245_v60 = vmul.f32 %v466_v44, %v466_v44  ;;  %v445_v47 = vsub.f32 %v2035_v48, %v2081_v0  ;;  %v2257_v3 = vmul.f32 %v446_v4, %v446_v4  ;;  %v2259_v62 = vmul.f32 %v447_v15, %v447_v15 }
  0xd6   : > { %3695 = vst [vmem:[#allocation26_spill] sm:$0xff] %v2207_v6  ;;  %v640_v8 = vsub.f32 %v524_v1, %v2085_v25  ;;  %v641_v12 = vsub.f32 %v524_v1, %v2087_v32  ;;  %v891_v1 = vsel %vm204_vm13, 1, %v3684_v58  ;;  %v2261_v28 = vmul.f32 %v444_v11, %v444_v11 }
  0xd7   : > { %3696 = vst [vmem:[#allocation27_spill] sm:$0xff] %v2215_v59  ;;  %v472_v44 = vsub.f32 %v2040_v49, %v2079_v63  ;;  %v473_v48 = vsub.f32 %v2040_v49, %v2081_v0 }
  0xd8   : > { %v768_v35 = vmul.f32 %v640_v8, %v640_v8  ;;  %v769_v40 = vmul.f32 %v641_v12, %v641_v12  ;;  %v2255_v12 = vmul.f32 %v467_v45, %v467_v45 }
  0xd9   : > { %v2307_v21 = vmul.f32 %v472_v44, %v472_v44 }
  0xda   : > { %v2250_v9 = vadd.f32 %v768_v35, %v2155_v37  ;;  %v2253_v8 = vadd.f32 %v769_v40, %v2157_v22  ;;  %v452_v37 = vsub.f32 %v2042_v50, %v2079_v63  ;;  %v894_v50 = vsel %vm207_vm0, 1, %v3684_v58 }
  0xdb   : > { %943 = vperm.xlu1 %1778, %v890_v18  }
  0xdc   : > { %3697 = vst [vmem:[#allocation28_spill] sm:$0xff] %v2250_v9  ;;  %958 = vperm.xlu0 %1777, %v895_v46   ;;  %946 = vperm.xlu2 %1776, %v891_v1   ;;  %v500_v22 = vpop.permute.xlu1 %499 }
  0xdd   : > { %3698 = vst [vmem:[#allocation29_spill] sm:$0xff] %v2253_v8  ;;  %v628_v45 = vsub.f32 %v500_v22, %v2085_v25  ;;  %v629_v4 = vsub.f32 %v500_v22, %v2087_v32  ;;  %v536_v15 = vpop.permute.xlu2 %535  ;;  %v496_v11 = vpop.permute.xlu0 %495  ;;  %v893_v22 = vsel %vm206_vm14, 1, %v3684_v58 }
  0xde   : > { %v646_v49 = vsub.f32 %v536_v15, %v2085_v25  ;;  %v647_v35 = vsub.f32 %v536_v15, %v2087_v32  ;;  %v626_v40 = vsub.f32 %v496_v11, %v2085_v25  ;;  %v627_v18 = vsub.f32 %v496_v11, %v2087_v32 }
  0xdf   : > { %v756_v46 = vmul.f32 %v628_v45, %v628_v45  ;;  %v757_v1 = vmul.f32 %v629_v4, %v629_v4  ;;  %v898_v11 = vsel %vm211_vm15, 1, %v3684_v58 }
  0xe0   : > { %v774_v8 = vmul.f32 %v646_v49, %v646_v49  ;;  %v775_v9 = vmul.f32 %v647_v35, %v647_v35  ;;  %v754_v6 = vmul.f32 %v626_v40, %v626_v40  ;;  %v755_v59 = vmul.f32 %v627_v18, %v627_v18 }
  0xe1   : > { %v2282_v29 = vadd.f32 %v756_v46, %v2174_v38  ;;  %v2285_v15 = vadd.f32 %v757_v1, %v2191_v41  ;;  %v2305_v49 = vmul.f32 %v445_v47, %v445_v47  ;;  %v2328_v35 = vmul.f32 %v450_v13, %v450_v13 }
  0xe2   : > { %v2294_v45 = vadd.f32 %v774_v8, %v2163_v31  ;;  %v2297_v4 = vadd.f32 %v775_v9, %v2165_v55  ;;  %v2300_v38 = vadd.f32 %v754_v6, %v2201_v36  ;;  %v2303_v41 = vadd.f32 %v755_v59, %v2203_v43 }
  0xe3   : > { %v451_v31 = vsub.f32 %v2044_v51, %v2081_v0  ;;  %952 = vperm.xlu1 %1778, %v893_v22   ;;  %v2313_v8 = vmul.f32 %v473_v48, %v473_v48  ;;  %v2315_v55 = vmul.f32 %v452_v37, %v452_v37  ;;  %v2317_v6 = vmul.f32 %v453_v14, %v453_v14 }
  0xe4   : > { %967 = vperm.xlu0 %1777, %v898_v11   ;;  %955 = vperm.xlu2 %1776, %v894_v50   ;;  %v508_v36 = vpop.permute.xlu1 %507  ;;  %v896_v18 = vsel %vm209_vm1, 1, %v3684_v58  ;;  %v897_v13 = vsel %vm210_vm3, 1, %v3684_v58 }
  0xe5   : > { %v632_v43 = vsub.f32 %v508_v36, %v2085_v25  ;;  %v633_v59 = vsub.f32 %v508_v36, %v2087_v32  ;;  %v548_v47 = vpop.permute.xlu2 %547  ;;  %v516_v9 = vpop.permute.xlu0 %515  ;;  %v901_v36 = vsel %vm214_vm2, 1, %v3684_v58 }
  0xe6   : > { %v652_v51 = vsub.f32 %v548_v47, %v2085_v25  ;;  %v653_v44 = vsub.f32 %v548_v47, %v2087_v32  ;;  %v636_v48 = vsub.f32 %v516_v9, %v2085_v25  ;;  %v637_v37 = vsub.f32 %v516_v9, %v2087_v32 }
  0xe7   : > { %v760_v17 = vmul.f32 %v632_v43, %v632_v43  ;;  %v761_v40 = vmul.f32 %v633_v59, %v633_v59  ;;  %v2355_v47 = vmul.f32 %v451_v31, %v451_v31 }
  0xe8   : > { %v780_v14 = vmul.f32 %v652_v51, %v652_v51  ;;  %v781_v46 = vmul.f32 %v653_v44, %v653_v44  ;;  %v764_v1 = vmul.f32 %v636_v48, %v636_v48  ;;  %v765_v22 = vmul.f32 %v637_v37, %v637_v37 }
  0xe9   : > { %v2332_v11 = vadd.f32 %v760_v17, %v2143_v5  ;;  %v2335_v50 = vadd.f32 %v761_v40, %v2149_v2  ;;  %v2380_v17 = vmul.f32 %v478_v24, %v478_v24  ;;  %v900_v24 = vsel %vm213_vm6, 1, %v3684_v58 }
  0xea   : > { %v2344_v43 = vadd.f32 %v780_v14, %v2193_v42  ;;  %v2347_v59 = vadd.f32 %v781_v46, %v2199_v34  ;;  %v2350_v5 = vadd.f32 %v764_v1, %v2239_v33  ;;  %v2353_v2 = vadd.f32 %v765_v22, %v2241_v10 }
  0xeb   : > { %v458_v42 = vsub.f32 %v2052_v53, %v2079_v63  ;;  %961 = vperm.xlu1 %1778, %v896_v18   ;;  %v459_v34 = vsub.f32 %v2052_v53, %v2081_v0  ;;  %v456_v33 = vsub.f32 %v2054_v54, %v2079_v63  ;;  %v2369_v10 = vsub.f32 %v2054_v54, %v2081_v0 }
  0xec   : > { %976 = vperm.xlu0 %1777, %v901_v36   ;;  %964 = vperm.xlu2 %1776, %v897_v13   ;;  %v520_v31 = vpop.permute.xlu1 %519  ;;  %v899_v18 = vsel %vm212_vm4, 1, %v3684_v58 }
  0xed   : > { %v638_v52 = vsub.f32 %v520_v31, %v2085_v25  ;;  %v639_v9 = vsub.f32 %v520_v31, %v2087_v32  ;;  %v560_v51 = vpop.permute.xlu2 %559  ;;  %v528_v44 = vpop.permute.xlu0 %527  ;;  %v904_v31 = vsel %vm217_vm5, 1, %v3684_v58  ;;  %v2409_v27 = vmul.f32 %v458_v42, %v458_v42 }
  0xee   : > { %v658_v53 = vsub.f32 %v560_v51, %v2085_v25  ;;  %v659_v54 = vsub.f32 %v560_v51, %v2087_v32  ;;  %v642_v48 = vsub.f32 %v528_v44, %v2085_v25  ;;  %v643_v37 = vsub.f32 %v528_v44, %v2087_v32 }
  0xef   : > { %v766_v20 = vmul.f32 %v638_v52, %v638_v52  ;;  %v767_v40 = vmul.f32 %v639_v9, %v639_v9  ;;  %v2407_v51 = vmul.f32 %v479_v16, %v479_v16  ;;  %v2411_v44 = vmul.f32 %v459_v34, %v459_v34 }
  0xf0   : > { %v786_v14 = vmul.f32 %v658_v53, %v658_v53  ;;  %v787_v46 = vmul.f32 %v659_v54, %v659_v54  ;;  %v770_v1 = vmul.f32 %v642_v48, %v642_v48  ;;  %v771_v22 = vmul.f32 %v643_v37, %v643_v37  ;;  %v3701_v53 = vld [vmem:[#allocation5_spill] sm:$0xff] }
  0xf1   : > { %v2384_v36 = vadd.f32 %v766_v20, %v2219_v61  ;;  %v2387_v13 = vadd.f32 %v767_v40, %v2236_v7  ;;  %v2413_v19 = vmul.f32 %v456_v33, %v456_v33  ;;  %vm216_vm9 = vcmp.gt.f32.partialorder %v3701_v53, 0.0 }
  0xf2   : > { %v2396_v52 = vadd.f32 %v786_v14, %v2209_v26  ;;  %v2399_v9 = vadd.f32 %v787_v46, %v2217_v39  ;;  %v2402_v61 = vadd.f32 %v770_v1, %v2261_v28  ;;  %v2405_v7 = vadd.f32 %v771_v22, %v2305_v49 }
  0xf3   : > { %970 = vperm.xlu1 %1778, %v899_v18   ;;  %v484_v26 = vsub.f32 %v2067_v56, %v2079_v63  ;;  %v485_v39 = vsub.f32 %v2067_v56, %v2081_v0  ;;  %v464_v28 = vsub.f32 %v2069_v57, %v2079_v63  ;;  %v902_v18 = vsel %vm215_vm7, 1, %v3684_v58 }
  0xf4   : > { %3699 = vst [vmem:[#allocation30_spill] sm:$0xff] %v2402_v61  ;;  %985 = vperm.xlu0 %1777, %v904_v31   ;;  %973 = vperm.xlu2 %1776, %v900_v24   ;;  %v532_v49 = vpop.permute.xlu1 %531  ;;  %v903_v57 = vsel %vm216_vm9, 1, %v3684_v58  ;;  %v719_v30 = vmul.f32 %v2369_v10, %v2369_v10  ;;  %v2471_v10 = vmul.f32 %v465_v23, %v465_v23 }
  0xf5   : > { %3700 = vst [vmem:[#allocation31_spill] sm:$0xff] %v2405_v7  ;;  %v644_v16 = vsub.f32 %v532_v49, %v2085_v25  ;;  %v645_v42 = vsub.f32 %v532_v49, %v2087_v32  ;;  %v572_v34 = vpop.permute.xlu2 %571  ;;  %v540_v33 = vpop.permute.xlu0 %539  ;;  %v907_v49 = vsel %vm220_vm8, 1, %v3684_v58 }
  0xf6   : > { %v664_v56 = vsub.f32 %v572_v34, %v2085_v25  ;;  %v665_v54 = vsub.f32 %v572_v34, %v2087_v32  ;;  %v648_v48 = vsub.f32 %v540_v33, %v2085_v25  ;;  %v649_v37 = vsub.f32 %v540_v33, %v2087_v32  ;;  %v3703_v33 = vld [vmem:[#allocation13_spill] sm:$0xff] }
  0xf7   : > { %v772_v20 = vmul.f32 %v644_v16, %v644_v16  ;;  %v773_v40 = vmul.f32 %v645_v42, %v645_v42  ;;  %v2459_v34 = vmul.f32 %v484_v26, %v484_v26  ;;  %v462_v53 = vsub.f32 %v3703_v33, %v2079_v63 }
  0xf8   : > { %v792_v14 = vmul.f32 %v664_v56, %v664_v56  ;;  %v793_v46 = vmul.f32 %v665_v54, %v665_v54  ;;  %v776_v1 = vmul.f32 %v648_v48, %v648_v48  ;;  %v777_v22 = vmul.f32 %v649_v37, %v649_v37  ;;  %v3705_v54 = vld [vmem:[#allocation11_spill] sm:$0xff] }
  0xf9   : > { %v2434_v31 = vadd.f32 %v772_v20, %v2257_v3  ;;  %v2437_v24 = vadd.f32 %v773_v40, %v2259_v62  ;;  %v2467_v56 = vmul.f32 %v464_v28, %v464_v28  ;;  %vm223_vm11 = vcmp.gt.f32.partialorder %v3705_v54, 0.0  ;;  %v3706_v40 = vld [vmem:[#allocation6_spill] sm:$0xff] }
  0xfa   : > { %v2446_v16 = vadd.f32 %v792_v14, %v2245_v60  ;;  %v2449_v42 = vadd.f32 %v793_v46, %v2255_v12  ;;  %v2452_v3 = vadd.f32 %v776_v1, %v2328_v35  ;;  %v2455_v62 = vadd.f32 %v777_v22, %v2355_v47  ;;  %v3704_v47 = vld [vmem:[#allocation7_spill] sm:$0xff] }
  0xfb   : > { %v463_v60 = vsub.f32 %v3703_v33, %v2081_v0  ;;  %979 = vperm.xlu1 %1778, %v902_v18   ;;  %v2465_v12 = vmul.f32 %v485_v39, %v485_v39  ;;  %vm218_vm10 = vcmp.gt.f32.partialorder %v3704_v47, 0.0  ;;  %vm219_vm12 = vcmp.gt.f32.partialorder %v3706_v40, 0.0  ;;  %v3709_v40 = vld [vmem:[#allocation9_spill] sm:$0xff] }
  0xfc   : > { %3702 = vst [vmem:[#allocation5_spill] sm:$0xff] %v2449_v42  ;;  %994 = vperm.xlu0 %1777, %v907_v49   ;;  %982 = vperm.xlu2 %1776, %v903_v57   ;;  %v544_v35 = vpop.permute.xlu1 %543  ;;  %v905_v23 = vsel %vm218_vm10, 1, %v3684_v58  ;;  %v910_v22 = vsel %vm223_vm11, 1, %v3684_v58  ;;  %vm221_vm13 = vcmp.gt.f32.partialorder %v3709_v40, 0.0 }
  0xfd   : > { %v650_v26 = vsub.f32 %v544_v35, %v2085_v25  ;;  %v651_v48 = vsub.f32 %v544_v35, %v2087_v32  ;;  %v584_v37 = vpop.permute.xlu2 %583  ;;  %v552_v20 = vpop.permute.xlu0 %551 }
  0xfe   : > { %v670_v39 = vsub.f32 %v584_v37, %v2085_v25  ;;  %v671_v28 = vsub.f32 %v584_v37, %v2087_v32  ;;  %v654_v18 = vsub.f32 %v552_v20, %v2085_v25  ;;  %v655_v14 = vsub.f32 %v552_v20, %v2087_v32 }
  0xff   : > { %v778_v46 = vmul.f32 %v650_v26, %v650_v26  ;;  %v779_v1 = vmul.f32 %v651_v48, %v651_v48  ;;  %v906_v37 = vsel %vm219_vm12, 1, %v3684_v58 }
 0x100   : > { %v798_v49 = vmul.f32 %v670_v39, %v670_v39  ;;  %v799_v57 = vmul.f32 %v671_v28, %v671_v28  ;;  %v782_v33 = vmul.f32 %v654_v18, %v654_v18  ;;  %v783_v35 = vmul.f32 %v655_v14, %v655_v14  ;;  %v3715_v14 = vld [vmem:[#allocation15_spill] sm:$0xff] }
 0x101   : > { %v2483_v47 = vadd.f32 %v778_v46, %v2315_v55  ;;  %v2486_v54 = vadd.f32 %v779_v1, %v2317_v6  ;;  %v724_v55 = vmul.f32 %v462_v53, %v462_v53  ;;  %v725_v28 = vmul.f32 %v463_v60, %v463_v60  ;;  %v3714_v6 = vld [vmem:[#allocation14_spill] sm:$0xff] }
 0x102   : > { %v2491_v26 = vadd.f32 %v798_v49, %v2307_v21  ;;  %v2494_v48 = vadd.f32 %v799_v57, %v2313_v8  ;;  %v2497_v20 = vadd.f32 %v782_v33, %v2413_v19  ;;  %v2499_v39 = vadd.f32 %v783_v35, %v719_v30  ;;  %v3716_v19 = vld [vmem:[#allocation8_spill] sm:$0xff]  ;;  %v3717_v30 = vld [vmem:[#allocation3_spill] sm:$0xff] }
 0x103   : > { %3707 = vst [vmem:[#allocation13_spill] sm:$0xff] %v2483_v47  ;;  %v2503_v18 = vsub.f32 %v3714_v6, %v2079_v63  ;;  %v468_v46 = vsub.f32 %v3715_v14, %v2079_v63  ;;  %988 = vperm.xlu1 %1778, %v905_v23   ;;  %v469_v21 = vsub.f32 %v3715_v14, %v2081_v0  ;;  %vm222_vm14 = vcmp.gt.f32.partialorder %v3716_v19, 0.0  ;;  %v3718_v57 = vld [vmem:[#allocation12_spill] sm:$0xff] }
 0x104   : > { %3708 = vst [vmem:[#allocation7_spill] sm:$0xff] %v2486_v54  ;;  %1003 = vperm.xlu0 %1777, %v910_v22   ;;  %991 = vperm.xlu2 %1776, %v906_v37   ;;  %v556_v8 = vpop.permute.xlu1 %555  ;;  %vm226_vm15 = vcmp.gt.f32.partialorder %v3717_v30, 0.5  ;;  %v908_v23 = vsel %vm221_vm13, 1, %v3684_v58  ;;  %vm257_vm0 = vcmp.gt.f32.partialorder %v3718_v57, 0.0 }
 0x105   : > { %3710 = vst [vmem:[#allocation11_spill] sm:$0xff] %v2491_v26  ;;  %v656_v53 = vsub.f32 %v556_v8, %v2085_v25  ;;  %v657_v60 = vsub.f32 %v556_v8, %v2087_v32  ;;  %v596_v1 = vpop.permute.xlu2 %595  ;;  %v564_v49 = vpop.permute.xlu0 %563  ;;  %v909_v8 = vsel %vm222_vm14, 1, %v3684_v58  ;;  %v1254_v30 = vsel %vm226_vm15, 1, %v3684_v58 }
 0x106   : > { %3711 = vst [vmem:[#allocation6_spill] sm:$0xff] %v2494_v48  ;;  %v676_v22 = vsub.f32 %v596_v1, %v2085_v25  ;;  %v677_v33 = vsub.f32 %v596_v1, %v2087_v32  ;;  %v660_v35 = vsub.f32 %v564_v49, %v2085_v25  ;;  %v661_v37 = vsub.f32 %v564_v49, %v2087_v32  ;;  %v3721_v1 = vld [vmem:[#allocation10_spill] sm:$0xff] }
 0x107   : > { %3712 = vst [vmem:[#allocation9_spill] sm:$0xff] %v2497_v20  ;;  %v784_v14 = vmul.f32 %v656_v53, %v656_v53  ;;  %v785_v19 = vmul.f32 %v657_v60, %v657_v60  ;;  %vm224_vm1 = vcmp.gt.f32.partialorder %v3721_v1, 0.0  ;;  %v1040_v53 = vsel %vm257_vm0, 1, %v3684_v58 }
 0x108   : > { %3713 = vst [vmem:[#allocation32_spill] sm:$0xff] %v2499_v39  ;;  %v804_v48 = vmul.f32 %v676_v22, %v676_v22  ;;  %v805_v26 = vmul.f32 %v677_v33, %v677_v33  ;;  %v788_v40 = vmul.f32 %v660_v35, %v660_v35  ;;  %v789_v54 = vmul.f32 %v661_v37, %v661_v37  ;;  %v3726_v37 = vld [vmem:[#allocation19_spill] sm:$0xff] }
 0x109   : > { %v2524_v47 = vadd.f32 %v784_v14, %v2409_v27  ;;  %v2527_v42 = vadd.f32 %v785_v19, %v2411_v44  ;;  %v471_v27 = vsub.f32 %v3714_v6, %v2081_v0  ;;  %v730_v44 = vmul.f32 %v468_v46, %v468_v46 }
 0x10a   : > { %v2534_v60 = vadd.f32 %v804_v48, %v2380_v17  ;;  %v2537_v49 = vadd.f32 %v805_v26, %v2407_v51  ;;  %v2539_v22 = vadd.f32 %v788_v40, %v724_v55  ;;  %v2541_v33 = vadd.f32 %v789_v54, %v725_v28  ;;  %v3727_v26 = vld [vmem:[#allocation4_spill] sm:$0xff]  ;;  %v3728_v55 = vld [vmem:[#allocation2_spill] sm:$0xff] }
 0x10b   : > { %3719 = vst [vmem:[#allocation14_spill] sm:$0xff] %v2524_v47  ;;  %v731_v35 = vmul.f32 %v469_v21, %v469_v21  ;;  %v474_v14 = vsub.f32 %v3726_v37, %v2079_v63  ;;  %997 = vperm.xlu1 %1778, %v908_v23   ;;  %v475_v17 = vsub.f32 %v3726_v37, %v2081_v0  ;;  %v3639_v48 = vmov 1  }
 0x10c   : > { %3720 = vst [vmem:[#allocation15_spill] sm:$0xff] %v2527_v42  ;;  %1780 = vset.pattern.permute.xlu0 %v3639_v48  ;;  %1000 = vperm.xlu2 %1776, %v909_v8   ;;  %v568_v51 = vpop.permute.xlu1 %567  ;;  %v911_v54 = vsel %vm224_vm1, 1, %v3684_v58  ;;  %vm231_vm2 = vcmp.gt.f32.partialorder %v3727_v26, 0.5  ;;  %vm225_vm3 = vcmp.gt.f32.partialorder %v3728_v55, 0.5  ;;  %v1041_v23 = vperm.slane %v1040_v53, 0 }
 0x10d   : > { %3722 = vst [vmem:[#allocation8_spill] sm:$0xff] %v2534_v60  ;;  %v662_v28 = vsub.f32 %v568_v51, %v2085_v25  ;;  %v663_v6 = vsub.f32 %v568_v51, %v2087_v32  ;;  %v608_v46 = vpop.permute.xlu2 %607  ;;  %1289 = vperm.xlu0 %1780, %v1254_v30   ;;  %v576_v21 = vpop.permute.xlu0 %575  ;;  %v1042_v57 = vperm.slane %v1040_v53, 4  ;;  %v1259_v55 = vsel %vm231_vm2, 1, %v3684_v58 }
 0x10e   : > { %3723 = vst [vmem:[#allocation3_spill] sm:$0xff] %v2537_v49  ;;  %v682_v19 = vsub.f32 %v608_v46, %v2085_v25  ;;  %v683_v8 = vsub.f32 %v608_v46, %v2087_v32  ;;  %v666_v40 = vsub.f32 %v576_v21, %v2085_v25  ;;  %v667_v1 = vsub.f32 %v576_v21, %v2087_v32 }
 0x10f   : > { %3724 = vst [vmem:[#allocation12_spill] sm:$0xff] %v2539_v22  ;;  %v790_v37 = vmul.f32 %v662_v28, %v662_v28  ;;  %v791_v26 = vmul.f32 %v663_v6, %v663_v6  ;;  %v1253_v48 = vsel %vm225_vm3, 1, %v3684_v58  ;;  %v2569_v46 = vperm.slane %v1041_v23, 0  ;;  %v3735_v23 = vld [vmem:[#allocation18_spill] sm:$0xff] }
 0x110   : > { %3725 = vst [vmem:[#allocation10_spill] sm:$0xff] %v2541_v33  ;;  %v810_v51 = vmul.f32 %v682_v19, %v682_v19  ;;  %v811_v49 = vmul.f32 %v683_v8, %v683_v8  ;;  %v794_v30 = vmul.f32 %v666_v40, %v666_v40  ;;  %v795_v60 = vmul.f32 %v667_v1, %v667_v1 }
 0x111   : > { %v2564_v53 = vadd.f32 %v790_v37, %v2467_v56  ;;  %v2567_v42 = vadd.f32 %v791_v26, %v2471_v10  ;;  %v2571_v47 = vperm.slane %v1042_v57, 0  ;;  %v732_v56 = vmul.f32 %v2503_v18, %v2503_v18  ;;  %v1787_v37 = vld [vmem:[%s1857_s14 + $0x48] sm:$0xff] }
 0x112   : > { %v2574_v28 = vadd.f32 %v810_v51, %v2459_v34  ;;  %v2577_v6 = vadd.f32 %v811_v49, %v2465_v12  ;;  %v2579_v21 = vadd.f32 %v794_v30, %v730_v44  ;;  %v2581_v19 = vadd.f32 %v795_v60, %v731_v35  ;;  %v3736_v12 = vld [vmem:[#allocation23_spill] sm:$0xff]  ;;  %v1788_v30 = vld [vmem:[%s1857_s14 + $0x18] sm:$0xff] }
 0x113   : > { %3729 = vst [vmem:[#allocation19_spill] sm:$0xff] %v2564_v53  ;;  %v733_v10 = vmul.f32 %v471_v27, %v471_v27  ;;  %v476_v8 = vsub.f32 %v3735_v23, %v2079_v63  ;;  %1006 = vperm.xlu1 %1778, %v911_v54   ;;  %v477_v34 = vsub.f32 %v3735_v23, %v2081_v0  ;;  %v3737_v60 = vmov 1   ;;  %v1786_v54 = vld [vmem:[%s1857_s14 + $0x10] sm:$0xff] }
 0x114   : > { %3730 = vst [vmem:[#allocation4_spill] sm:$0xff] %v2567_v42  ;;  %v736_v57 = vmul.f32 %v474_v14, %v474_v14  ;;  %v737_v40 = vmul.f32 %v475_v17, %v475_v17  ;;  %v480_v49 = vsub.f32 %v3736_v12, %v2079_v63  ;;  %1779 = vset.pattern.permute.xlu2 %v3737_v60  ;;  %v580_v44 = vpop.permute.xlu1 %579  ;;  %vm1045_vm4 = vcmp.eq.s32.totalorder %v2569_v46, 1 }
 0x115   : > { %3731 = vst [vmem:[#allocation2_spill] sm:$0xff] %v2574_v28  ;;  %v668_v18 = vsub.f32 %v580_v44, %v2085_v25  ;;  %v669_v27 = vsub.f32 %v580_v44, %v2087_v32  ;;  %1304 = vperm.xlu0 %1780, %v1259_v55   ;;  %v588_v35 = vpop.permute.xlu0 %587  ;;  %1286 = vperm.xlu2 %1779, %v1253_v48   ;;  %vm227_vm5 = vcmp.gt.f32.partialorder %v1786_v54, 0.5  ;;  %vm1046_vm6 = vcmp.eq.s32.totalorder %v2571_v47, 1  ;;  %v1801_v44 = vld [vmem:[%s1857_s14 + $0x80] sm:$0xff] }
 0x116   : > { %3732 = vst [vmem:[#allocation33_spill] sm:$0xff] %v2577_v6  ;;  %v672_v14 = vsub.f32 %v588_v35, %v2085_v25  ;;  %v673_v17 = vsub.f32 %v588_v35, %v2087_v32  ;;  %v914_v1 = vpop.permute.xlu2 %913  ;;  %vm234_vm7 = vcmp.gt.f32.partialorder %v1787_v37, 0.5  ;;  %vm228_vm9 = vcmp.gt.f32.partialorder %v1788_v30, 0.5 }
 0x117   : > { %3733 = vst [vmem:[#allocation34_spill] sm:$0xff] %v2579_v21  ;;  %v796_v26 = vmul.f32 %v668_v18, %v668_v18  ;;  %v797_v51 = vmul.f32 %v669_v27, %v669_v27  ;;  %vm1008_vm8 = vcmp.eq.s32.totalorder %v914_v1, 1  ;;  %v481_v48 = vsub.f32 %v3736_v12, %v2081_v0  ;;  %v3744_v12 = vld [vmem:[#allocation16_spill] sm:$0xff] }
 0x118   : > { %3734 = vst [vmem:[#allocation35_spill] sm:$0xff] %v2581_v19  ;;  %v800_v55 = vmul.f32 %v672_v14, %v672_v14  ;;  %v801_v23 = vmul.f32 %v673_v17, %v673_v17  ;;  %vm2605_vm10 = vmxor %vm1008_vm8, %vm1045_vm4  ;;  %v1255_v35 = vsel %vm227_vm5, 1, %v3684_v58  ;;  %v1262_v17 = vsel %vm234_vm7, 1, %v3684_v58 }
 0x119   : > { %v2611_v37 = vadd.f32 %v796_v26, %v732_v56  ;;  %v2613_v18 = vadd.f32 %v797_v51, %v733_v10  ;;  %vm2617_vm11 = vmxor %vm1008_vm8, %vm1046_vm6  ;;  %v3747_v56 = vld [vmem:[#allocation17_spill] sm:$0xff]  ;;  %v1256_v26 = vsel %vm228_vm9, 1, %v3684_v58  ;;  %v738_v51 = vmul.f32 %v476_v8, %v476_v8  ;;  %v1789_v8 = vld [vmem:[%s1857_s14 + $0x20] sm:$0xff] }
 0x11a   : > { %v2625_v1 = vadd.f32 %v800_v55, %v736_v57  ;;  %v2627_v54 = vadd.f32 %v801_v23, %v737_v40  ;;  %v739_v30 = vmul.f32 %v477_v34, %v477_v34  ;;  %v742_v55 = vmul.f32 %v480_v49, %v480_v49 }
 0x11b   : > { %3740 = vst [vmem:[#allocation18_spill] sm:$0xff] %v2611_v37  ;;  %1781 = vset.pattern.permute.xlu1 %v3737_v60  ;;  %vm229_vm12 = vcmp.gt.f32.partialorder %v1789_v8, 0.5  ;;  %v743_v34 = vmul.f32 %v481_v48, %v481_v48 }
 0x11c   : > { %3741 = vst [vmem:[#allocation23_spill] sm:$0xff] %v2613_v18  ;;  %v3748_v18 = vld [vmem:[#allocation22_spill] sm:$0xff]  ;;  %v592_v40 = vpop.permute.xlu1 %591  ;;  %1292 = vperm.xlu1 %1781, %v1255_v35  }
 0x11d   : > { %3745 = vst [vmem:[#allocation16_spill] sm:$0xff] %v2625_v1  ;;  %v482_v14 = vsub.f32 %v3748_v18, %v2079_v63  ;;  %v483_v57 = vsub.f32 %v3748_v18, %v2081_v0  ;;  %v674_v23 = vsub.f32 %v592_v40, %v2085_v25  ;;  %v675_v10 = vsub.f32 %v592_v40, %v2087_v32  ;;  %v600_v37 = vpop.permute.xlu0 %599  ;;  %v1790_v18 = vld [vmem:[%s1857_s14 + $0x60] sm:$0xff]  ;;  %v3749_v40 = vld [vmem:[#allocation27_spill] sm:$0xff] }
 0x11e   : > { %3746 = vst [vmem:[#allocation36_spill] sm:$0xff] %v2627_v54  ;;  %1313 = vperm.xlu0 %1780, %v1262_v17   ;;  %1295 = vperm.xlu2 %1779, %v1256_v26   ;;  %v678_v60 = vsub.f32 %v600_v37, %v2085_v25  ;;  %v679_v6 = vsub.f32 %v600_v37, %v2087_v32  ;;  %v923_v28 = vpop.permute.xlu2 %922  ;;  %vm237_vm13 = vcmp.gt.f32.partialorder %v1790_v18, 0.5  ;;  %v1791_v54 = vld [vmem:[%s1857_s14 + $0x28] sm:$0xff]  ;;  %v1257_v37 = vsel %vm229_vm12, 1, %v3684_v58 }
 0x11f   : > { %v802_v35 = vmul.f32 %v674_v23, %v674_v23  ;;  %v803_v49 = vmul.f32 %v675_v10, %v675_v10  ;;  %vm1011_vm14 = vcmp.eq.s32.totalorder %v923_v28, 1  ;;  %vm230_vm15 = vcmp.gt.f32.partialorder %v1791_v54, 0.5 }
 0x120   : > { %v486_v17 = vsub.f32 %v3749_v40, %v2079_v63  ;;  %v806_v1 = vmul.f32 %v678_v60, %v678_v60  ;;  %v807_v26 = vmul.f32 %v679_v6, %v679_v6  ;;  %vm2649_vm0 = vmxor %vm1011_vm14, %vm1045_vm4  ;;  %v3756_v6 = vld [vmem:[#allocation20_spill] sm:$0xff]  ;;  %v1265_v23 = vsel %vm237_vm13, 1, %v3684_v58 }
 0x121   : > { %v2655_v18 = vadd.f32 %v802_v35, %v738_v51  ;;  %v2657_v10 = vadd.f32 %v803_v49, %v739_v30  ;;  %vm2661_vm1 = vmxor %vm1011_vm14, %vm1046_vm6  ;;  %v3759_v51 = vld [vmem:[#allocation21_spill] sm:$0xff]  ;;  %v1258_v35 = vsel %vm230_vm15, 1, %v3684_v58  ;;  %v744_v49 = vmul.f32 %v482_v14, %v482_v14 }
 0x122   : > { %v2669_v60 = vadd.f32 %v806_v1, %v742_v55  ;;  %v2671_v8 = vadd.f32 %v807_v26, %v743_v34  ;;  %v487_v54 = vsub.f32 %v3749_v40, %v2081_v0 }
 0x123   : > { %3752 = vst [vmem:[#allocation17_spill] sm:$0xff] %v2655_v18  ;;  %v3760_v18 = vld [vmem:[#allocation26_spill] sm:$0xff] }
 0x124   : > { %3753 = vst [vmem:[#allocation22_spill] sm:$0xff] %v2657_v10  ;;  %v745_v10 = vmul.f32 %v483_v57, %v483_v57  ;;  %v488_v42 = vsub.f32 %v3760_v18, %v2079_v63  ;;  %v604_v1 = vpop.permute.xlu1 %603  ;;  %1298 = vperm.xlu1 %1781, %v1257_v37   ;;  %v489_v55 = vsub.f32 %v3760_v18, %v2081_v0  ;;  %v1792_v57 = vld [vmem:[%s1857_s14 + $0x38] sm:$0xff]  ;;  %v1794_v18 = vld [vmem:[%s1857_s14 + $0x40] sm:$0xff] }
 0x125   : > { %3757 = vst [vmem:[#allocation27_spill] sm:$0xff] %v2669_v60  ;;  %v680_v34 = vsub.f32 %v604_v1, %v2085_v25  ;;  %v681_v26 = vsub.f32 %v604_v1, %v2087_v32  ;;  %v612_v14 = vpop.permute.xlu0 %611  ;;  %vm232_vm2 = vcmp.gt.f32.partialorder %v1792_v57, 0.5  ;;  %v748_v63 = vmul.f32 %v486_v17, %v486_v17  ;;  %v1793_v37 = vld [vmem:[%s1857_s14 + $0x78] sm:$0xff] }
 0x126   : > { %3758 = vst [vmem:[#allocation20_spill] sm:$0xff] %v2671_v8  ;;  %1322 = vperm.xlu0 %1780, %v1265_v23   ;;  %1301 = vperm.xlu2 %1779, %v1258_v35   ;;  %v684_v30 = vsub.f32 %v612_v14, %v2085_v25  ;;  %v685_v40 = vsub.f32 %v612_v14, %v2087_v32  ;;  %v929_v8 = vpop.permute.xlu2 %928  ;;  %vm240_vm3 = vcmp.gt.f32.partialorder %v1793_v37, 0.5  ;;  %vm233_vm7 = vcmp.gt.f32.partialorder %v1794_v18, 0.5 }
 0x127   : > { %v808_v60 = vmul.f32 %v680_v34, %v680_v34  ;;  %v809_v0 = vmul.f32 %v681_v26, %v681_v26  ;;  %vm1013_vm5 = vcmp.eq.s32.totalorder %v929_v8, 1  ;;  %v749_v53 = vmul.f32 %v487_v54, %v487_v54  ;;  %v3766_v54 = vld [vmem:[#allocation24_spill] sm:$0xff]  ;;  %v1797_v8 = vld [vmem:[%s1857_s14 + $0x58] sm:$0xff] }
 0x128   : > { %v812_v1 = vmul.f32 %v684_v30, %v684_v30  ;;  %v813_v23 = vmul.f32 %v685_v40, %v685_v40  ;;  %vm2692_vm8 = vmxor %vm1013_vm5, %vm1045_vm4  ;;  %v1260_v17 = vsel %vm232_vm2, 1, %v3684_v58  ;;  %v1268_v34 = vsel %vm240_vm3, 1, %v3684_v58 }
 0x129   : > { %v2698_v14 = vadd.f32 %v808_v60, %v744_v49  ;;  %v2700_v37 = vadd.f32 %v809_v0, %v745_v10  ;;  %vm2704_vm9 = vmxor %vm1013_vm5, %vm1046_vm6  ;;  %v1121_v30 = vsel %vm2692_vm8, %v3766_v54, 1e+09  ;;  %v3767_v10 = vld [vmem:[#allocation25_spill] sm:$0xff]  ;;  %v1261_v57 = vsel %vm233_vm7, 1, %v3684_v58  ;;  %v1796_v54 = vld [vmem:[%s1857_s14 + $0x90] sm:$0xff] }
 0x12a   : > { %v2712_v26 = vadd.f32 %v812_v1, %v748_v63  ;;  %v2714_v60 = vadd.f32 %v813_v23, %v749_v53  ;;  %v1122_v49 = vsel %vm2704_vm9, %v3767_v10, 1e+09  ;;  %v750_v0 = vmul.f32 %v488_v42, %v488_v42  ;;  %v1795_v23 = vld [vmem:[%s1857_s14 + $0x50] sm:$0xff] }
 0x12b   : > { %3763 = vst [vmem:[#allocation21_spill] sm:$0xff] %v2700_v37  ;;  %v751_v63 = vmul.f32 %v489_v55, %v489_v55  ;;  %vm235_vm12 = vcmp.gt.f32.partialorder %v1795_v23, 0.5  ;;  %vm243_vm13 = vcmp.gt.f32.partialorder %v1796_v54, 0.5  ;;  %vm236_vm14 = vcmp.gt.f32.partialorder %v1797_v8, 0.5 }
 0x12c   : > { %v616_v40 = vpop.permute.xlu1 %615  ;;  %1307 = vperm.xlu1 %1781, %v1260_v17   ;;  %v1263_v55 = vsel %vm235_vm12, 1, %v3684_v58 }
 0x12d   : > { %v686_v18 = vsub.f32 %v616_v40, %v2085_v25  ;;  %v687_v35 = vsub.f32 %v616_v40, %v2087_v32  ;;  %v1264_v40 = vsel %vm236_vm14, 1, %v3684_v58 }
 0x12e   : > { %1331 = vperm.xlu0 %1780, %v1268_v34   ;;  %1310 = vperm.xlu2 %1779, %v1261_v57   ;;  %v917_v1 = vpop.permute.xlu0 %916  ;;  %v938_v53 = vpop.permute.xlu2 %937  ;;  %v3768_v34 = vsel %vm2649_vm0, %v3756_v6, 1e+09 }
 0x12f   : > { %v814_v10 = vmul.f32 %v686_v18, %v686_v18  ;;  %v815_v37 = vmul.f32 %v687_v35, %v687_v35  ;;  %vm1009_vm15 = vcmp.eq.s32.totalorder %v917_v1, 1  ;;  %vm1016_vm2 = vcmp.eq.s32.totalorder %v938_v53, 1  ;;  %v3774_v35 = vld [vmem:[#allocation28_spill] sm:$0xff]  ;;  %v1802_v1 = vld [vmem:[%s1857_s14 + $0xc0] sm:$0xff] }
 0x130   : > { %vm1049_vm3 = vmxor %vm1009_vm15, %vm1045_vm4 }
 0x131   : > { %v2727_v25 = vadd.f32 %v814_v10, %v750_v0  ;;  %v2729_v32 = vadd.f32 %v815_v37, %v751_v63  ;;  %vm1050_vm5 = vmxor %vm1009_vm15, %vm1046_vm6  ;;  %v1113_v42 = vsel %vm1049_vm3, %v2300_v38, 1e+09  ;;  %v1271_v37 = vsel %vm243_vm13, 1, %v3684_v58  ;;  %v3775_v63 = vld [vmem:[#allocation29_spill] sm:$0xff]  ;;  %v1806_v10 = vld [vmem:[%s1857_s14 + $0xa0] sm:$0xff] }
 0x132   : > { %v1114_v17 = vsel %vm1050_vm5, %v2303_v41, 1e+09  ;;  %v1176_v57 = vmin.f32 %v1113_v42, %v3768_v34  ;;  %vm2742_vm7 = vmxor %vm1016_vm2, %vm1045_vm4  ;;  %v3771_v0 = vsel %vm2661_vm1, %v3759_v51, 1e+09  ;;  %v1799_v34 = vld [vmem:[%s1857_s14 + $0xa8] sm:$0xff] }
 0x133   : > { %v1213_v48 = vmin.f32 %v1114_v17, %v3771_v0  ;;  %vm2755_vm0 = vmxor %vm1016_vm2, %vm1046_vm6  ;;  %v1127_v54 = vsel %vm2742_vm7, %v3774_v35, 1e+09  ;;  %v1798_v17 = vld [vmem:[%s1857_s14 + $0x68] sm:$0xff]  ;;  %vm246_vm13 = vcmp.gt.f32.partialorder %v1799_v34, 0.5  ;;  %v1800_v0 = vld [vmem:[%s1857_s14 + $0x70] sm:$0xff] }
 0x134   : > { %1316 = vperm.xlu1 %1781, %v1263_v55   ;;  %v2765_v28 = vmin.f32 %v1176_v57, %v1121_v30  ;;  %vm238_vm8 = vcmp.gt.f32.partialorder %v1798_v17, 0.5  ;;  %vm239_vm14 = vcmp.gt.f32.partialorder %v1800_v0, 0.5  ;;  %v3776_v55 = vsel %vm2605_vm10, %v3744_v12, 1e+09  ;;  %v1809_v34 = vld [vmem:[%s1857_s14 + $0xb8] sm:$0xff] }
 0x135   : > { %v920_v53 = vpop.permute.xlu1 %919  ;;  %v2767_v23 = vmin.f32 %v1213_v48, %v1122_v49  ;;  %v3779_v48 = vsel %vm2617_vm11, %v3747_v56, 1e+09  ;;  %v1267_v17 = vsel %vm239_vm14, 1, %v3684_v58 }
 0x136   : > { %1340 = vperm.xlu0 %1780, %v1271_v37   ;;  %1319 = vperm.xlu2 %1779, %v1264_v40   ;;  %vm1010_vm1 = vcmp.eq.s32.totalorder %v920_v53, 1  ;;  %v932_v8 = vpop.permute.xlu0 %931  ;;  %v947_v42 = vpop.permute.xlu2 %946  ;;  %v1266_v40 = vsel %vm238_vm8, 1, %v3684_v58  ;;  %vm241_vm8 = vcmp.gt.f32.partialorder %v1801_v44, 0.5 }
 0x137   : > { %vm1051_vm9 = vmxor %vm1010_vm1, %vm1045_vm4  ;;  %vm1014_vm12 = vcmp.eq.s32.totalorder %v932_v8, 1  ;;  %vm1019_vm2 = vcmp.eq.s32.totalorder %v947_v42, 1  ;;  %v1274_v42 = vsel %vm246_vm13, 1, %v3684_v58  ;;  %vm249_vm13 = vcmp.gt.f32.partialorder %v1802_v1, 0.5 }
 0x138   : > { %vm1052_vm15 = vmxor %vm1010_vm1, %vm1046_vm6  ;;  %v1115_v30 = vsel %vm1051_vm9, %v2282_v29, 1e+09 }
 0x139   : > { %v1116_v49 = vsel %vm1052_vm15, %v2285_v15, 1e+09  ;;  %v1175_v57 = vmin.f32 %v3776_v55, %v1115_v30  ;;  %vm2784_vm3 = vmxor %vm1014_vm12, %vm1045_vm4  ;;  %v1803_v30 = vld [vmem:[%s1857_s14 + $0x88] sm:$0xff] }
 0x13a   : > { %v1212_v53 = vmin.f32 %v3779_v48, %v1116_v49  ;;  %vm2795_vm5 = vmxor %vm1014_vm12, %vm1046_vm6  ;;  %v1123_v8 = vsel %vm2784_vm3, %v2350_v5, 1e+09  ;;  %vm242_vm14 = vcmp.gt.f32.partialorder %v1803_v30, 0.5 }
 0x13b   : > { %v1124_v27 = vsel %vm2795_vm5, %v2353_v2, 1e+09  ;;  %vm2809_vm10 = vmxor %vm1019_vm2, %vm1045_vm4  ;;  %v1270_v44 = vsel %vm242_vm14, 1, %v3684_v58 }
 0x13c   : > { %vm2815_vm11 = vmxor %vm1019_vm2, %vm1046_vm6  ;;  %1325 = vperm.xlu1 %1781, %v1266_v40  }
 0x13d   : > { %v926_v55 = vpop.permute.xlu1 %925 }
 0x13e   : > { %1349 = vperm.xlu0 %1780, %v1274_v42   ;;  %1328 = vperm.xlu2 %1779, %v1267_v17   ;;  %vm1012_vm1 = vcmp.eq.s32.totalorder %v926_v55, 1  ;;  %v941_v37 = vpop.permute.xlu0 %940  ;;  %v956_v48 = vpop.permute.xlu2 %955  ;;  %v3826_v55 = vld [vmem:[#allocation11_spill] sm:$0xff] }
 0x13f   : > { %vm1055_vm9 = vmxor %vm1012_vm1, %vm1045_vm4  ;;  %vm1017_vm12 = vcmp.eq.s32.totalorder %v941_v37, 1  ;;  %vm1022_vm2 = vcmp.eq.s32.totalorder %v956_v48, 1  ;;  %v1269_v37 = vsel %vm241_vm8, 1, %v3684_v58 }
 0x140   : > { %vm1056_vm15 = vmxor %vm1012_vm1, %vm1046_vm6  ;;  %v1119_v40 = vsel %vm1055_vm9, %v2332_v11, 1e+09 }
 0x141   : > { %v1120_v42 = vsel %vm1056_vm15, %v2335_v50, 1e+09  ;;  %v1177_v17 = vmin.f32 %v1175_v57, %v1119_v40  ;;  %vm2836_vm3 = vmxor %vm1017_vm12, %vm1045_vm4  ;;  %v1277_v57 = vsel %vm249_vm13, 1, %v3684_v58 }
 0x142   : > { %v1214_v1 = vmin.f32 %v1212_v53, %v1120_v42  ;;  %vm2843_vm5 = vmxor %vm1017_vm12, %vm1046_vm6  ;;  %v1129_v48 = vsel %vm2836_vm3, %v2402_v61, 1e+09  ;;  %v1804_v61 = vld [vmem:[%s1857_s14 + $0x98] sm:$0xff] }
 0x143   : > { %v1179_v40 = vmin.f32 %v1177_v17, %v1123_v8  ;;  %v1130_v53 = vsel %vm2843_vm5, %v2405_v7, 1e+09  ;;  %vm2857_vm1 = vmxor %vm1022_vm2, %vm1045_vm4  ;;  %vm244_vm12 = vcmp.gt.f32.partialorder %v1804_v61, 0.5  ;;  %v1807_v17 = vld [vmem:[%s1857_s14 + $0xb0] sm:$0xff]  ;;  %v3816_v42 = vld [vmem:[#allocation13_spill] sm:$0xff] }
 0x144   : > { %v1216_v49 = vmin.f32 %v1214_v1, %v1124_v27  ;;  %vm2863_vm8 = vmxor %vm1022_vm2, %vm1046_vm6  ;;  %1334 = vperm.xlu1 %1781, %v1269_v37   ;;  %v3794_v37 = vsel %vm2755_vm0, %v3775_v63, 1e+09  ;;  %vm245_vm2 = vcmp.gt.f32.partialorder %v1806_v10, 0.5 }
 0x145   : > { %v935_v27 = vpop.permute.xlu1 %934  ;;  %v1181_v1 = vmin.f32 %v1179_v40, %v1127_v54 }
 0x146   : > { %1358 = vperm.xlu0 %1780, %v1277_v57   ;;  %1337 = vperm.xlu2 %1779, %v1270_v44   ;;  %vm1015_vm9 = vcmp.eq.s32.totalorder %v935_v27, 1  ;;  %v950_v30 = vpop.permute.xlu0 %949  ;;  %v965_v7 = vpop.permute.xlu2 %964  ;;  %v1218_v8 = vmin.f32 %v1216_v49, %v3794_v37  ;;  %v1805_v57 = vld [vmem:[%s1857_s14 + $0xd8] sm:$0xff]  ;;  %v1272_v44 = vsel %vm244_vm12, 1, %v3684_v58 }
 0x147   : > { %vm1061_vm13 = vmxor %vm1015_vm9, %vm1045_vm4  ;;  %vm1020_vm14 = vcmp.eq.s32.totalorder %v950_v30, 1  ;;  %vm252_vm15 = vcmp.gt.f32.partialorder %v1805_v57, 0.5  ;;  %vm1025_vm3 = vcmp.eq.s32.totalorder %v965_v7, 1  ;;  %v1273_v30 = vsel %vm245_vm2, 1, %v3684_v58  ;;  %v3830_v57 = vld [vmem:[#allocation14_spill] sm:$0xff] }
 0x148   : > { %vm1062_vm7 = vmxor %vm1015_vm9, %vm1046_vm6  ;;  %v1125_v54 = vsel %vm1061_vm13, %v2384_v36, 1e+09 }
 0x149   : > { %v1126_v61 = vsel %vm1062_vm7, %v2387_v13, 1e+09  ;;  %v1180_v18 = vmin.f32 %v2765_v28, %v1125_v54  ;;  %vm2893_vm0 = vmxor %vm1020_vm14, %vm1045_vm4  ;;  %v1280_v28 = vsel %vm252_vm15, 1, %v3684_v58 }
 0x14a   : > { %v1217_v40 = vmin.f32 %v2767_v23, %v1126_v61  ;;  %vm2901_vm5 = vmxor %vm1020_vm14, %vm1046_vm6  ;;  %v1135_v7 = vsel %vm2893_vm0, %v2452_v3, 1e+09  ;;  %vm247_vm14 = vcmp.gt.f32.partialorder %v1807_v17, 0.5 }
 0x14b   : > { %v1182_v37 = vmin.f32 %v1180_v18, %v1129_v48  ;;  %v1136_v23 = vsel %vm2901_vm5, %v2455_v62, 1e+09  ;;  %vm2915_vm9 = vmxor %vm1025_vm3, %vm1045_vm4  ;;  %v3803_v18 = vsel %vm2809_vm10, %v2294_v45, 1e+09 }
 0x14c   : > { %v1219_v10 = vmin.f32 %v1217_v40, %v1130_v53  ;;  %vm2921_vm12 = vmxor %vm1025_vm3, %vm1046_vm6  ;;  %1343 = vperm.xlu1 %1781, %v1272_v44   ;;  %v3804_v44 = vsel %vm2815_vm11, %v2297_v4, 1e+09  ;;  %vm248_vm3 = vcmp.gt.f32.partialorder %v1809_v34, 0.5 }
 0x14d   : > { %v944_v53 = vpop.permute.xlu1 %943  ;;  %v1184_v49 = vmin.f32 %v1182_v37, %v3803_v18 }
 0x14e   : > { %1367 = vperm.xlu0 %1780, %v1280_v28   ;;  %1346 = vperm.xlu2 %1779, %v1273_v30   ;;  %vm1018_vm13 = vcmp.eq.s32.totalorder %v944_v53, 1  ;;  %v959_v40 = vpop.permute.xlu0 %958  ;;  %v974_v27 = vpop.permute.xlu2 %973  ;;  %v1221_v48 = vmin.f32 %v1219_v10, %v3804_v44  ;;  %v1808_v28 = vld [vmem:[%s1857_s14 + $0xf0] sm:$0xff]  ;;  %v1275_v10 = vsel %vm247_vm14, 1, %v3684_v58 }
 0x14f   : > { %vm1067_vm15 = vmxor %vm1018_vm13, %vm1045_vm4  ;;  %vm1023_vm2 = vcmp.eq.s32.totalorder %v959_v40, 1  ;;  %vm255_vm7 = vcmp.gt.f32.partialorder %v1808_v28, 0.5  ;;  %vm1028_vm0 = vcmp.eq.s32.totalorder %v974_v27, 1  ;;  %v1276_v27 = vsel %vm248_vm3, 1, %v3684_v58  ;;  %v3844_v28 = vld [vmem:[#allocation19_spill] sm:$0xff] }
 0x150   : > { %vm1068_vm10 = vmxor %vm1018_vm13, %vm1046_vm6  ;;  %v1131_v30 = vsel %vm1067_vm15, %v2434_v31, 1e+09 }
 0x151   : > { %v1132_v17 = vsel %vm1068_vm10, %v2437_v24, 1e+09  ;;  %v1183_v0 = vmin.f32 %v1181_v1, %v1131_v30  ;;  %vm2950_vm11 = vmxor %vm1023_vm2, %vm1045_vm4  ;;  %v1283_v1 = vsel %vm255_vm7, 1, %v3684_v58  ;;  %v3856_v30 = vld [vmem:[#allocation2_spill] sm:$0xff] }
 0x152   : > { %v1220_v53 = vmin.f32 %v1218_v8, %v1132_v17  ;;  %vm2957_vm5 = vmxor %vm1023_vm2, %vm1046_vm6  ;;  %v1141_v40 = vsel %vm2950_vm11, %v2497_v20, 1e+09  ;;  %v3813_v17 = vld [vmem:[#allocation5_spill] sm:$0xff]  ;;  %v1812_v20 = vld [vmem:[%s1857_s14 + $0xe0] sm:$0xff] }
 0x153   : > { %v1185_v44 = vmin.f32 %v1183_v0, %v1135_v7  ;;  %v1142_v8 = vsel %vm2957_vm5, %v2499_v39, 1e+09  ;;  %vm2971_vm13 = vmxor %vm1028_vm0, %vm1045_vm4  ;;  %v1810_v39 = vld [vmem:[%s1857_s14 + $0xc8] sm:$0xff] }
 0x154   : > { %v1222_v34 = vmin.f32 %v1220_v53, %v1136_v23  ;;  %vm2977_vm14 = vmxor %vm1028_vm0, %vm1046_vm6  ;;  %1352 = vperm.xlu1 %1781, %v1275_v10   ;;  %v3814_v23 = vsel %vm2857_vm1, %v2344_v43, 1e+09  ;;  %vm250_vm2 = vcmp.gt.f32.partialorder %v1810_v39, 0.5  ;;  %v3815_v10 = vsel %vm2863_vm8, %v2347_v59, 1e+09 }
 0x155   : > { %v953_v37 = vpop.permute.xlu1 %952  ;;  %v1187_v53 = vmin.f32 %v1185_v44, %v3814_v23  ;;  %v3817_v44 = vld [vmem:[#allocation7_spill] sm:$0xff] }
 0x156   : > { %1376 = vperm.xlu0 %1780, %v1283_v1   ;;  %1355 = vperm.xlu2 %1779, %v1276_v27   ;;  %vm1021_vm15 = vcmp.eq.s32.totalorder %v953_v37, 1  ;;  %v968_v18 = vpop.permute.xlu0 %967  ;;  %v983_v61 = vpop.permute.xlu2 %982  ;;  %v1224_v7 = vmin.f32 %v1222_v34, %v3815_v10  ;;  %v1811_v1 = vld [vmem:[%s1857_s14 + $0xd0] sm:$0xff]  ;;  %v1278_v34 = vsel %vm250_vm2, 1, %v3684_v58 }
 0x157   : > { %vm1073_vm7 = vmxor %vm1021_vm15, %vm1045_vm4  ;;  %vm1026_vm3 = vcmp.eq.s32.totalorder %v968_v18, 1  ;;  %vm251_vm10 = vcmp.gt.f32.partialorder %v1811_v1, 0.5  ;;  %vm1031_vm0 = vcmp.eq.s32.totalorder %v983_v61, 1  ;;  %v3840_v18 = vld [vmem:[#allocation8_spill] sm:$0xff] }
 0x158   : > { %vm1074_vm1 = vmxor %vm1021_vm15, %vm1046_vm6  ;;  %v1137_v27 = vsel %vm1073_vm7, %v3816_v42, 1e+09  ;;  %vm253_vm7 = vcmp.gt.f32.partialorder %v1812_v20, 0.5 }
 0x159   : > { %v1138_v37 = vsel %vm1074_vm1, %v3817_v44, 1e+09  ;;  %v1186_v39 = vmin.f32 %v1184_v49, %v1137_v27  ;;  %vm3005_vm11 = vmxor %vm1026_vm3, %vm1045_vm4  ;;  %v1279_v49 = vsel %vm251_vm10, 1, %v3684_v58 }
 0x15a   : > { %v1223_v23 = vmin.f32 %v1221_v48, %v1138_v37  ;;  %vm3012_vm8 = vmxor %vm1026_vm3, %vm1046_vm6  ;;  %v1147_v61 = vsel %vm3005_vm11, %v2539_v22, 1e+09  ;;  %v3861_v48 = vld [vmem:[#allocation18_spill] sm:$0xff] }
 0x15b   : > { %v1188_v10 = vmin.f32 %v1186_v39, %v1141_v40  ;;  %v1148_v1 = vsel %vm3012_vm8, %v2541_v33, 1e+09  ;;  %vm3025_vm5 = vmxor %vm1031_vm0, %vm1045_vm4  ;;  %v3827_v39 = vld [vmem:[#allocation6_spill] sm:$0xff] }
 0x15c   : > { %v1225_v27 = vmin.f32 %v1223_v23, %v1142_v8  ;;  %vm3031_vm15 = vmxor %vm1031_vm0, %vm1046_vm6  ;;  %1361 = vperm.xlu1 %1781, %v1278_v34   ;;  %v3828_v8 = vsel %vm2915_vm9, %v2396_v52, 1e+09  ;;  %v3829_v34 = vsel %vm2921_vm12, %v2399_v9, 1e+09 }
 0x15d   : > { %v962_v0 = vpop.permute.xlu1 %961  ;;  %v1190_v23 = vmin.f32 %v1188_v10, %v3828_v8  ;;  %v3831_v10 = vld [vmem:[#allocation15_spill] sm:$0xff] }
 0x15e   : > { %1364 = vperm.xlu2 %1779, %v1279_v49   ;;  %vm1024_vm2 = vcmp.eq.s32.totalorder %v962_v0, 1  ;;  %v977_v33 = vpop.permute.xlu0 %976  ;;  %v992_v22 = vpop.permute.xlu2 %991  ;;  %v1227_v40 = vmin.f32 %v1225_v27, %v3829_v34  ;;  %v1813_v49 = vld [vmem:[%s1857_s14 + $0xe8] sm:$0xff]  ;;  %v1281_v27 = vsel %vm253_vm7, 1, %v3684_v58 }
 0x15f   : > { %vm1079_vm3 = vmxor %vm1024_vm2, %vm1045_vm4  ;;  %vm1029_vm10 = vcmp.eq.s32.totalorder %v977_v33, 1  ;;  %vm254_vm1 = vcmp.gt.f32.partialorder %v1813_v49, 0.5  ;;  %vm1034_vm0 = vcmp.eq.s32.totalorder %v992_v22, 1 }
 0x160   : > { %vm1080_vm9 = vmxor %vm1024_vm2, %vm1046_vm6  ;;  %v1143_v0 = vsel %vm1079_vm3, %v3830_v57, 1e+09  ;;  %v1814_v57 = vld [vmem:[%s1857_s14 + $0xf8] sm:$0xff] }
 0x161   : > { %v1144_v8 = vsel %vm1080_vm9, %v3831_v10, 1e+09  ;;  %v1189_v20 = vmin.f32 %v1187_v53, %v1143_v0  ;;  %vm3059_vm11 = vmxor %vm1029_vm10, %vm1045_vm4  ;;  %v1282_v53 = vsel %vm254_vm1, 1, %v3684_v58  ;;  %vm256_vm3 = vcmp.gt.f32.partialorder %v1814_v57, 0.5 }
 0x162   : > { %v1226_v33 = vmin.f32 %v1224_v7, %v1144_v8  ;;  %vm3066_vm12 = vmxor %vm1029_vm10, %vm1046_vm6  ;;  %v1153_v22 = vsel %vm3059_vm11, %v2579_v21, 1e+09  ;;  %v1284_v57 = vsel %vm256_vm3, 1, %v3684_v58 }
 0x163   : > { %v1191_v49 = vmin.f32 %v1189_v20, %v1147_v61  ;;  %v1154_v0 = vsel %vm3066_vm12, %v2581_v19, 1e+09  ;;  %vm3079_vm8 = vmxor %vm1034_vm0, %vm1045_vm4  ;;  %v3841_v20 = vld [vmem:[#allocation3_spill] sm:$0xff] }
 0x164   : > { %v1228_v8 = vmin.f32 %v1226_v33, %v1148_v1  ;;  %vm3085_vm2 = vmxor %vm1034_vm0, %vm1046_vm6  ;;  %v1163_v61 = vsel %vm3079_vm8, %v3840_v18, 1e+09  ;;  %1370 = vperm.xlu1 %1781, %v1281_v27   ;;  %v3842_v1 = vsel %vm2971_vm13, %v2446_v16, 1e+09  ;;  %v3843_v27 = vsel %vm2977_vm14, %v3813_v17, 1e+09 }
 0x165   : > { %v1164_v34 = vsel %vm3085_vm2, %v3841_v20, 1e+09  ;;  %v971_v19 = vpop.permute.xlu1 %970  ;;  %v1193_v33 = vmin.f32 %v1191_v49, %v3842_v1  ;;  %v3860_v20 = vsel %vm3031_vm15, %v3827_v39, 1e+09 }
 0x166   : > { %1373 = vperm.xlu2 %1779, %v1282_v53   ;;  %vm1027_vm7 = vcmp.eq.s32.totalorder %v971_v19, 1  ;;  %v986_v21 = vpop.permute.xlu0 %985  ;;  %v1001_v10 = vpop.permute.xlu2 %1000  ;;  %v1230_v7 = vmin.f32 %v1228_v8, %v3843_v27  ;;  %v3845_v19 = vld [vmem:[#allocation4_spill] sm:$0xff] }
 0x167   : > { %vm1085_vm10 = vmxor %vm1027_vm7, %vm1045_vm4  ;;  %vm1032_vm1 = vcmp.eq.s32.totalorder %v986_v21, 1  ;;  %vm1037_vm13 = vcmp.eq.s32.totalorder %v1001_v10, 1  ;;  %v3850_v10 = vld [vmem:[#allocation16_spill] sm:$0xff] }
 0x168   : > { %vm1086_vm9 = vmxor %vm1027_vm7, %vm1046_vm6  ;;  %v1149_v53 = vsel %vm1085_vm10, %v3844_v28, 1e+09  ;;  %v3851_v27 = vld [vmem:[#allocation36_spill] sm:$0xff] }
 0x169   : > { %v1150_v49 = vsel %vm1086_vm9, %v3845_v19, 1e+09  ;;  %v1192_v54 = vmin.f32 %v1190_v23, %v1149_v53  ;;  %vm3112_vm0 = vmxor %vm1032_vm1, %vm1045_vm4 }
 0x16a   : > { %v1229_v8 = vmin.f32 %v1227_v40, %v1150_v49  ;;  %vm3119_vm14 = vmxor %vm1032_vm1, %vm1046_vm6  ;;  %v1159_v23 = vsel %vm3112_vm0, %v3850_v10, 1e+09  ;;  %v3152_v10 = vld [vmem:[%s2059_s18] sm:$0xff] }
 0x16b   : > { %v1194_v1 = vmin.f32 %v1192_v54, %v1153_v22  ;;  %v1160_v53 = vsel %vm3119_vm14, %v3851_v27, 1e+09  ;;  %vm3131_vm11 = vmxor %vm1037_vm13, %vm1045_vm4  ;;  %v3857_v54 = vld [vmem:[#allocation33_spill] sm:$0xff]  ;;  %3859 = vst [vmem:[#allocation26_spill] sm:$0xff] %v3152_v10  ;;  %vm258_vm2 = vcmp.gt.f32.partialorder %v3152_v10, 0.5 }
 0x16c   : > { %v1231_v40 = vmin.f32 %v1229_v8, %v1154_v0  ;;  %vm3137_vm12 = vmxor %vm1037_vm13, %vm1046_vm6  ;;  %v1169_v22 = vsel %vm3131_vm11, %v3856_v30, 1e+09  ;;  %1379 = vperm.xlu1 %1781, %v1284_v57   ;;  %v3858_v0 = vsel %vm3025_vm5, %v3826_v55, 1e+09  ;;  %v3867_v30 = vld [vmem:[#allocation27_spill] sm:$0xff] }
 0x16d   : > { %v1170_v21 = vsel %vm3137_vm12, %v3857_v54, 1e+09  ;;  %v980_v18 = vpop.permute.xlu1 %979  ;;  %v1196_v8 = vmin.f32 %v1194_v1, %v3858_v0  ;;  %v3862_v1 = vld [vmem:[#allocation23_spill] sm:$0xff] }
 0x16e   : > { %vm1030_vm8 = vcmp.eq.s32.totalorder %v980_v18, 1  ;;  %v995_v27 = vpop.permute.xlu0 %994  ;;  %v1233_v57 = vmin.f32 %v1231_v40, %v3860_v20  ;;  %v1413_v40 = vsel %vm258_vm2, 1, %v3684_v58 }
 0x16f   : > { %vm1091_vm7 = vmxor %vm1030_vm8, %vm1045_vm4  ;;  %vm1035_vm3 = vcmp.eq.s32.totalorder %v995_v27, 1  ;;  %v3161_v49 = vpop.permute.xlu2 %1286  ;;  %v1414_v55 = vperm.slane %v1413_v40, 1  ;;  %v1415_v19 = vperm.slane %v1413_v40, 5  ;;  %v3870_v40 = vld [vmem:[#allocation22_spill] sm:$0xff] }
 0x170   : > { %vm1092_vm5 = vmxor %vm1030_vm8, %vm1046_vm6  ;;  %v1155_v18 = vsel %vm1091_vm7, %v3861_v48, 1e+09 }
 0x171   : > { %v1156_v0 = vsel %vm1092_vm5, %v3862_v1, 1e+09  ;;  %v1195_v54 = vmin.f32 %v1193_v33, %v1155_v18  ;;  %vm3169_vm10 = vmxor %vm1035_vm3, %vm1045_vm4  ;;  %v3868_v18 = vld [vmem:[#allocation20_spill] sm:$0xff]  ;;  %v3188_v37 = vperm.slane %v1414_v55, 1 }
 0x172   : > { %v1232_v20 = vmin.f32 %v1230_v7, %v1156_v0  ;;  %vm3176_vm15 = vmxor %vm1035_vm3, %vm1046_vm6  ;;  %v1165_v1 = vsel %vm3169_vm10, %v3867_v30, 1e+09 }
 0x173   : > { %v1197_v33 = vmin.f32 %v1195_v54, %v1159_v23  ;;  %v1166_v48 = vsel %vm3176_vm15, %v3868_v18, 1e+09  ;;  %v3869_v23 = vld [vmem:[#allocation17_spill] sm:$0xff]  ;;  %vm1418_vm8 = vcmp.eq.s32.totalorder %v3188_v37, 1 }
 0x174   : > { %v1234_v39 = vmin.f32 %v1232_v20, %v1160_v53  ;;  %v3193_v53 = vperm.slane %v1415_v19, 1 }
 0x175   : > { %v989_v58 = vpop.permute.xlu1 %988  ;;  %v1199_v7 = vmin.f32 %v1197_v33, %v1163_v61 }
 0x176   : > { %vm1033_vm1 = vcmp.eq.s32.totalorder %v989_v58, 1  ;;  %v1004_v0 = vpop.permute.xlu0 %1003  ;;  %v1236_v28 = vmin.f32 %v1234_v39, %v1164_v34  ;;  %vm1419_vm2 = vcmp.eq.s32.totalorder %v3193_v53, 1 }
 0x177   : > { %vm1097_vm9 = vmxor %vm1033_vm1, %vm1045_vm4  ;;  %vm1038_vm13 = vcmp.eq.s32.totalorder %v1004_v0, 1 }
 0x178   : > { %v1296_v10 = vpop.permute.xlu2 %1295  ;;  %vm1098_vm0 = vmxor %vm1033_vm1, %vm1046_vm6  ;;  %v1161_v54 = vsel %vm1097_vm9, %v3869_v23, 1e+09 }
 0x179   : > { %v1162_v20 = vsel %vm1098_vm0, %v3870_v40, 1e+09  ;;  %v1198_v61 = vmin.f32 %v1196_v8, %v1161_v54  ;;  %vm3198_vm14 = vmxor %vm1038_vm13, %vm1045_vm4  ;;  %vm1384_vm12 = vcmp.eq.s32.totalorder %v1296_v10, 1 }
 0x17a   : > { %v1235_v34 = vmin.f32 %v1233_v57, %v1162_v20  ;;  %vm3204_vm11 = vmxor %vm1038_vm13, %vm1046_vm6  ;;  %v1171_v19 = vsel %vm3198_vm14, %v2712_v26, 1e+09 }
 0x17b   : > { %v1200_v27 = vmin.f32 %v1198_v61, %v1165_v1  ;;  %v1172_v8 = vsel %vm3204_vm11, %v2714_v60, 1e+09  ;;  %vm3218_vm7 = vmxor %vm1384_vm12, %vm1418_vm8 }
 0x17c   : > { %v1237_v33 = vmin.f32 %v1235_v34, %v1166_v48  ;;  %vm3224_vm3 = vmxor %vm1384_vm12, %vm1419_vm2 }
 0x17d   : > { %v998_v58 = vpop.permute.xlu1 %997  ;;  %v1202_v0 = vmin.f32 %v1200_v27, %v1169_v22  ;;  %v3879_v22 = vld [vmem:[#allocation21_spill] sm:$0xff]  ;;  %v1491_v27 = vsel %vm3224_vm3, %v3759_v51, 1e+09 }
 0x17e   : > { %vm1036_vm5 = vcmp.eq.s32.totalorder %v998_v58, 1  ;;  %v1239_v1 = vmin.f32 %v1237_v33, %v1170_v21  ;;  %v1490_v21 = vsel %vm3218_vm7, %v3756_v6, 1e+09 }
 0x17f   : > { %vm1103_vm10 = vmxor %vm1036_vm5, %vm1045_vm4  ;;  %v1290_v48 = vpop.permute.xlu0 %1289 }
 0x180   : > { %v1302_v54 = vpop.permute.xlu2 %1301  ;;  %vm1104_vm15 = vmxor %vm1036_vm5, %vm1046_vm6  ;;  %v1167_v20 = vsel %vm1103_vm10, %v2698_v14, 1e+09  ;;  %vm1382_vm1 = vcmp.eq.s32.totalorder %v1290_v48, 1  ;;  %v3881_v48 = vld [vmem:[#allocation25_spill] sm:$0xff]  ;;  %vm1381_vm5 = vcmp.eq.s32.totalorder %v3161_v49, 1 }
 0x181   : > { %vm1386_vm9 = vcmp.eq.s32.totalorder %v1302_v54, 1  ;;  %v1168_v61 = vsel %vm1104_vm15, %v3879_v22, 1e+09  ;;  %v1201_v39 = vmin.f32 %v1199_v7, %v1167_v20  ;;  %vm1422_vm13 = vmxor %vm1382_vm1, %vm1418_vm8 }
 0x182   : > { %v1238_v34 = vmin.f32 %v1236_v28, %v1168_v61  ;;  %vm1423_vm0 = vmxor %vm1382_vm1, %vm1419_vm2  ;;  %v1486_v55 = vsel %vm1422_vm13, %v2300_v38, 1e+09  ;;  %v3880_v28 = vld [vmem:[#allocation24_spill] sm:$0xff] }
 0x183   : > { %v1203_v33 = vmin.f32 %v1201_v39, %v1171_v19  ;;  %v1487_v7 = vsel %vm1423_vm0, %v2303_v41, 1e+09  ;;  %v1549_v58 = vmin.f32 %v1486_v55, %v1490_v21  ;;  %vm1430_vm14 = vmxor %vm1386_vm9, %vm1418_vm8 }
 0x184   : > { %v1240_v57 = vmin.f32 %v1238_v34, %v1172_v8  ;;  %v1586_v6 = vmin.f32 %v1487_v7, %v1491_v27  ;;  %vm1431_vm11 = vmxor %vm1386_vm9, %vm1419_vm2  ;;  %v1494_v38 = vsel %vm1430_vm14, %v3880_v28, 1e+09 }
 0x185   : > { %v1495_v20 = vsel %vm1431_vm11, %v3881_v48, 1e+09  ;;  %v3254_v10 = vmin.f32 %v1549_v58, %v1494_v38  ;;  %v1007_v51 = vpop.permute.xlu1 %1006  ;;  %vm1421_vm10 = vmxor %vm1381_vm5, %vm1419_vm2 }
 0x186   : > { %v3256_v19 = vmin.f32 %v1586_v6, %v1495_v20  ;;  %vm1039_vm12 = vcmp.eq.s32.totalorder %v1007_v51, 1  ;;  %v1485_v27 = vsel %vm1421_vm10, %v3747_v56, 1e+09 }
 0x187   : > { %vm1109_vm7 = vmxor %vm1039_vm12, %vm1045_vm4  ;;  %v1305_v41 = vpop.permute.xlu0 %1304 }
 0x188   : > { %v1311_v8 = vpop.permute.xlu2 %1310  ;;  %vm1110_vm3 = vmxor %vm1039_vm12, %vm1046_vm6  ;;  %v1173_v54 = vsel %vm1109_vm7, %v2727_v25, 1e+09  ;;  %vm1387_vm9 = vcmp.eq.s32.totalorder %v1305_v41, 1 }
 0x189   : > { %v1174_v61 = vsel %vm1110_vm3, %v2729_v32, 1e+09  ;;  %v1204_v39 = vmin.f32 %v1202_v0, %v1173_v54  ;;  %vm1420_vm4 = vmxor %vm1381_vm5, %vm1418_vm8  ;;  %vm1389_vm14 = vcmp.eq.s32.totalorder %v1311_v8, 1 }
 0x18a   : > { %v1241_v21 = vmin.f32 %v1239_v1, %v1174_v61  ;;  %v1484_v1 = vsel %vm1420_vm4, %v3744_v12, 1e+09  ;;  %vm3283_vm13 = vmxor %vm1387_vm9, %vm1418_vm8 }
 0x18b   : > { %v3265_v34 = vmin.f32 %v1203_v33, %v1204_v39  ;;  %vm3289_vm0 = vmxor %vm1387_vm9, %vm1419_vm2  ;;  %v1496_v48 = vsel %vm3283_vm13, %v2350_v5, 1e+09 }
 0x18c   : > { %v3267_v55 = vmin.f32 %v1240_v57, %v1241_v21  ;;  %vm1436_vm3 = vmxor %vm1389_vm14, %vm1418_vm8 }
 0x18d   : > { %vm1437_vm5 = vmxor %vm1389_vm14, %vm1419_vm2  ;;  %v1500_v41 = vsel %vm1436_vm3, %v3774_v35, 1e+09 }
 0x18e   : > { %v1293_v46 = vpop.permute.xlu1 %1292 }
 0x18f   : > { %vm1383_vm6 = vcmp.eq.s32.totalorder %v1293_v46, 1 }
 0x190   : > { %v1314_v47 = vpop.permute.xlu0 %1313  ;;  %vm1424_vm15 = vmxor %vm1383_vm6, %vm1418_vm8  ;;  %v1320_v0 = vpop.permute.xlu2 %1319 }
 0x191   : > { %vm1425_vm1 = vmxor %vm1383_vm6, %vm1419_vm2  ;;  %v1488_v49 = vsel %vm1424_vm15, %v2282_v29, 1e+09  ;;  %vm1390_vm4 = vcmp.eq.s32.totalorder %v1314_v47, 1  ;;  %vm1392_vm15 = vcmp.eq.s32.totalorder %v1320_v0, 1  ;;  %v3890_v47 = vld [vmem:[#allocation30_spill] sm:$0xff] }
 0x192   : > { %v1489_v33 = vsel %vm1425_vm1, %v2285_v15, 1e+09  ;;  %v1548_v7 = vmin.f32 %v1484_v1, %v1488_v49  ;;  %vm3313_vm10 = vmxor %vm1390_vm4, %vm1418_vm8  ;;  %v3891_v49 = vld [vmem:[#allocation31_spill] sm:$0xff] }
 0x193   : > { %v1585_v58 = vmin.f32 %v1485_v27, %v1489_v33  ;;  %vm3319_vm6 = vmxor %vm1390_vm4, %vm1419_vm2  ;;  %v1502_v0 = vsel %vm3313_vm10, %v3890_v47, 1e+09 }
 0x194   : > { %vm1443_vm14 = vmxor %vm1392_vm15, %vm1419_vm2 }
 0x196   : > { %v1299_v6 = vpop.permute.xlu1 %1298 }
 0x197   : > { %vm1385_vm11 = vcmp.eq.s32.totalorder %v1299_v6, 1 }
 0x198   : > { %v1323_v29 = vpop.permute.xlu0 %1322  ;;  %vm1428_vm12 = vmxor %vm1385_vm11, %vm1418_vm8  ;;  %v1329_v38 = vpop.permute.xlu2 %1328 }
 0x199   : > { %vm1429_vm7 = vmxor %vm1385_vm11, %vm1419_vm2  ;;  %v1492_v15 = vsel %vm1428_vm12, %v2332_v11, 1e+09  ;;  %v1497_v11 = vsel %vm3289_vm0, %v2353_v2, 1e+09  ;;  %vm1393_vm11 = vcmp.eq.s32.totalorder %v1323_v29, 1  ;;  %vm1395_vm3 = vcmp.eq.s32.totalorder %v1329_v38, 1 }
 0x19a   : > { %v1493_v56 = vsel %vm1429_vm7, %v2335_v50, 1e+09  ;;  %v1550_v28 = vmin.f32 %v1548_v7, %v1492_v15  ;;  %v1501_v50 = vsel %vm1437_vm5, %v3775_v63, 1e+09  ;;  %vm1442_vm0 = vmxor %vm1392_vm15, %vm1418_vm8 }
 0x19b   : > { %v1587_v20 = vmin.f32 %v1585_v58, %v1493_v56  ;;  %vm3345_vm12 = vmxor %vm1393_vm11, %vm1418_vm8 }
 0x19c   : > { %v1552_v51 = vmin.f32 %v1550_v28, %v1496_v48  ;;  %vm3351_vm7 = vmxor %vm1393_vm11, %vm1419_vm2  ;;  %v1508_v56 = vsel %vm3345_vm12, %v2452_v3, 1e+09 }
 0x19d   : > { %v1589_v8 = vmin.f32 %v1587_v20, %v1497_v11  ;;  %vm1449_vm15 = vmxor %vm1395_vm3, %vm1419_vm2  ;;  %v1509_v38 = vsel %vm3351_vm7, %v2455_v62, 1e+09 }
 0x19e   : > { %v1308_v5 = vpop.permute.xlu1 %1307  ;;  %v1554_v61 = vmin.f32 %v1552_v51, %v1500_v41 }
 0x19f   : > { %vm1388_vm1 = vcmp.eq.s32.totalorder %v1308_v5, 1  ;;  %v1591_v35 = vmin.f32 %v1589_v8, %v1501_v50  ;;  %v3900_v5 = vld [vmem:[#allocation9_spill] sm:$0xff]  ;;  %v3919_v8 = vld [vmem:[#allocation34_spill] sm:$0xff] }
 0x1a0   : > { %v1332_v2 = vpop.permute.xlu0 %1331  ;;  %vm1434_vm9 = vmxor %vm1388_vm1, %vm1418_vm8  ;;  %v1338_v33 = vpop.permute.xlu2 %1337 }
 0x1a1   : > { %vm1435_vm13 = vmxor %vm1388_vm1, %vm1419_vm2  ;;  %v1498_v63 = vsel %vm1434_vm9, %v2384_v36, 1e+09  ;;  %v1503_v36 = vsel %vm3319_vm6, %v3891_v49, 1e+09  ;;  %vm1396_vm1 = vcmp.eq.s32.totalorder %v1332_v2, 1  ;;  %v3901_v2 = vld [vmem:[#allocation32_spill] sm:$0xff] }
 0x1a2   : > { %v1499_v21 = vsel %vm1435_vm13, %v2387_v13, 1e+09  ;;  %v1553_v46 = vmin.f32 %v3254_v10, %v1498_v63  ;;  %v1506_v13 = vsel %vm1442_vm0, %v2294_v45, 1e+09  ;;  %v1507_v10 = vsel %vm1443_vm14, %v2297_v4, 1e+09  ;;  %vm1448_vm6 = vmxor %vm1395_vm3, %vm1418_vm8 }
 0x1a3   : > { %v1590_v1 = vmin.f32 %v3256_v19, %v1499_v21  ;;  %v1512_v48 = vsel %vm1448_vm6, %v2344_v43, 1e+09  ;;  %vm3375_vm9 = vmxor %vm1396_vm1, %vm1418_vm8  ;;  %vm1398_vm0 = vcmp.eq.s32.totalorder %v1338_v33, 1 }
 0x1a4   : > { %v1555_v27 = vmin.f32 %v1553_v46, %v1502_v0  ;;  %vm3381_vm13 = vmxor %vm1396_vm1, %vm1419_vm2 }
 0x1a5   : > { %v1592_v7 = vmin.f32 %v1590_v1, %v1503_v36  ;;  %vm1454_vm7 = vmxor %vm1398_vm0, %vm1418_vm8  ;;  %v3929_v1 = vld [vmem:[#allocation18_spill] sm:$0xff] }
 0x1a6   : > { %v1317_v57 = vpop.permute.xlu1 %1316  ;;  %v1557_v6 = vmin.f32 %v1555_v27, %v1506_v13  ;;  %vm1455_vm3 = vmxor %vm1398_vm0, %vm1419_vm2  ;;  %v1518_v63 = vsel %vm1454_vm7, %v2396_v52, 1e+09  ;;  %v3907_v27 = vld [vmem:[#allocation15_spill] sm:$0xff] }
 0x1a7   : > { %vm1391_vm5 = vcmp.eq.s32.totalorder %v1317_v57, 1  ;;  %v1594_v45 = vmin.f32 %v1592_v7, %v1507_v10  ;;  %v3908_v7 = vld [vmem:[#allocation12_spill] sm:$0xff]  ;;  %v3909_v57 = vld [vmem:[#allocation10_spill] sm:$0xff] }
 0x1a8   : > { %vm1440_vm4 = vmxor %vm1391_vm5, %vm1418_vm8  ;;  %v1341_v4 = vpop.permute.xlu0 %1340  ;;  %v1347_v3 = vpop.permute.xlu2 %1346 }
 0x1a9   : > { %vm1441_vm10 = vmxor %vm1391_vm5, %vm1419_vm2  ;;  %v1504_v12 = vsel %vm1440_vm4, %v2434_v31, 1e+09  ;;  %vm1399_vm5 = vcmp.eq.s32.totalorder %v1341_v4, 1  ;;  %vm1401_vm6 = vcmp.eq.s32.totalorder %v1347_v3, 1  ;;  %v3918_v3 = vld [vmem:[#allocation4_spill] sm:$0xff] }
 0x1aa   : > { %v1505_v29 = vsel %vm1441_vm10, %v2437_v24, 1e+09  ;;  %v1556_v15 = vmin.f32 %v1554_v61, %v1504_v12  ;;  %v1513_v24 = vsel %vm1449_vm15, %v2347_v59, 1e+09  ;;  %v1514_v61 = vsel %vm3375_vm9, %v3900_v5, 1e+09  ;;  %vm3405_vm4 = vmxor %vm1399_vm5, %vm1418_vm8 }
 0x1ab   : > { %v1593_v28 = vmin.f32 %v1591_v35, %v1505_v29  ;;  %vm3411_vm10 = vmxor %vm1399_vm5, %vm1419_vm2  ;;  %v1520_v10 = vsel %vm3405_vm4, %v3908_v7, 1e+09 }
 0x1ac   : > { %v1558_v31 = vmin.f32 %v1556_v15, %v1508_v56  ;;  %vm1461_vm0 = vmxor %vm1401_vm6, %vm1419_vm2 }
 0x1ad   : > { %v1595_v20 = vmin.f32 %v1593_v28, %v1509_v38  ;;  %v1525_v29 = vsel %vm1461_vm0, %v3813_v17, 1e+09  ;;  %v3914_v17 = vld [vmem:[#allocation26_spill] sm:$0xff] }
 0x1ae   : > { %v1326_v51 = vpop.permute.xlu1 %1325  ;;  %v1560_v41 = vmin.f32 %v1558_v31, %v1512_v48  ;;  %v1751_v31 = vmul.f32 -1.442695, %v3914_v17  ;;  %v3915_v48 = vld [vmem:[#allocation19_spill] sm:$0xff] }
 0x1af   : > { %vm1394_vm14 = vcmp.eq.s32.totalorder %v1326_v51, 1  ;;  %v1597_v43 = vmin.f32 %v1595_v20, %v1513_v24 }
 0x1b0   : > { %vm1446_vm11 = vmxor %vm1394_vm14, %vm1418_vm8  ;;  %v1350_v54 = vpop.permute.xlu0 %1349  ;;  %v1356_v49 = vpop.permute.xlu2 %1355  ;;  %1782 = vpow2.f32 %v1751_v31 }
 0x1b1   : > { %vm1447_vm12 = vmxor %vm1394_vm14, %vm1419_vm2  ;;  %v1510_v59 = vsel %vm1446_vm11, %v3816_v42, 1e+09  ;;  %v1515_v42 = vsel %vm3381_vm13, %v3901_v2, 1e+09  ;;  %vm1402_vm14 = vcmp.eq.s32.totalorder %v1350_v54, 1  ;;  %vm1404_vm7 = vcmp.eq.s32.totalorder %v1356_v49, 1 }
 0x1b2   : > { %v1511_v62 = vsel %vm1447_vm12, %v3817_v44, 1e+09  ;;  %v1559_v50 = vmin.f32 %v1557_v6, %v1510_v59  ;;  %v1519_v44 = vsel %vm1455_vm3, %v2399_v9, 1e+09  ;;  %v3906_v9 = vld [vmem:[#allocation14_spill] sm:$0xff]  ;;  %vm1460_vm13 = vmxor %vm1401_vm6, %vm1418_vm8 }
 0x1b3   : > { %v1596_v39 = vmin.f32 %v1594_v45, %v1511_v62  ;;  %v1521_v6 = vsel %vm3411_vm10, %v3909_v57, 1e+09  ;;  %v1524_v4 = vsel %vm1460_vm13, %v2446_v16, 1e+09  ;;  %vm3435_vm11 = vmxor %vm1402_vm14, %vm1418_vm8  ;;  %v3936_v57 = vld [vmem:[#allocation36_spill] sm:$0xff]  ;;  %v3943_v59 = vld [vmem:[#allocation2_spill] sm:$0xff] }
 0x1b4   : > { %v1561_v35 = vmin.f32 %v1559_v50, %v1514_v61  ;;  %vm3441_vm12 = vmxor %vm1402_vm14, %vm1419_vm2  ;;  %v3922_v50 = vld [vmem:[#allocation35_spill] sm:$0xff] }
 0x1b5   : > { %v1598_v21 = vmin.f32 %v1596_v39, %v1515_v42  ;;  %vm3453_vm10 = vmxor %vm1404_vm7, %vm1418_vm8  ;;  %v1527_v54 = vsel %vm3441_vm12, %v3922_v50, 1e+09  ;;  %v3923_v61 = vld [vmem:[#allocation11_spill] sm:$0xff]  ;;  %v3924_v42 = vld [vmem:[#allocation6_spill] sm:$0xff] }
 0x1b6   : > { %v1335_v47 = vpop.permute.xlu1 %1334  ;;  %v1563_v0 = vmin.f32 %v1561_v35, %v1518_v63  ;;  %vm3463_vm6 = vmxor %vm1404_vm7, %vm1419_vm2  ;;  %v1530_v39 = vsel %vm3453_vm10, %v3923_v61, 1e+09  ;;  %v1783_v49 = vpop.eup %1782 }
 0x1b7   : > { %vm1397_vm15 = vcmp.eq.s32.totalorder %v1335_v47, 1  ;;  %v1600_v52 = vmin.f32 %v1598_v21, %v1519_v44  ;;  %v1531_v35 = vsel %vm3463_vm6, %v3924_v42, 1e+09  ;;  %v3515_v15 = vadd.f32 1.0, %v1783_v49 }
 0x1b8   : > { %vm1452_vm1 = vmxor %vm1397_vm15, %vm1418_vm8  ;;  %v1359_v45 = vpop.permute.xlu0 %1358  ;;  %v1365_v11 = vpop.permute.xlu2 %1364  ;;  %v1206_v42 = vrot.slane %v3265_v34, 4 }
 0x1b9   : > { %vm1453_vm9 = vmxor %vm1397_vm15, %vm1419_vm2  ;;  %v1516_v36 = vsel %vm1452_vm1, %v3906_v9, 1e+09  ;;  %vm1405_vm15 = vcmp.eq.s32.totalorder %v1359_v45, 1  ;;  %vm1407_vm13 = vcmp.eq.s32.totalorder %v1365_v11, 1  ;;  %1784 = vrcp.f32 %v3515_v15 }
 0x1ba   : > { %v1517_v33 = vsel %vm1453_vm9, %v3907_v27, 1e+09  ;;  %v1562_v13 = vmin.f32 %v1560_v41, %v1516_v36  ;;  %vm3478_vm1 = vmxor %vm1405_vm15, %vm1418_vm8  ;;  %v3932_v36 = vld [vmem:[#allocation23_spill] sm:$0xff]  ;;  %v1643_v37 = vand.u32 2147483648, %v3515_v15  ;;  %v1641_v53 = vand.u32 2147483647, %v3515_v15 }
 0x1bb   : > { %v1599_v58 = vmin.f32 %v1597_v43, %v1517_v33  ;;  %v1526_v43 = vsel %vm3435_vm11, %v3919_v8, 1e+09  ;;  %vm3484_vm9 = vmxor %vm1405_vm15, %vm1419_vm2 }
 0x1bc   : > { %v1564_v19 = vmin.f32 %v1562_v13, %v1520_v10  ;;  %vm3495_vm12 = vmxor %vm1407_vm13, %vm1418_vm8  ;;  %v3933_v13 = vld [vmem:[#allocation16_spill] sm:$0xff] }
 0x1bd   : > { %v1601_v12 = vmin.f32 %v1599_v58, %v1521_v6  ;;  %v1532_v7 = vsel %vm3478_vm1, %v3933_v13, 1e+09  ;;  %vm3505_vm7 = vmxor %vm1407_vm13, %vm1419_vm2  ;;  %v1533_v6 = vsel %vm3484_vm9, %v3936_v57, 1e+09 }
 0x1be   : > { %v1344_v56 = vpop.permute.xlu1 %1343  ;;  %v1566_v28 = vmin.f32 %v1564_v19, %v1524_v4  ;;  %v3937_v4 = vld [vmem:[#allocation8_spill] sm:$0xff] }
 0x1bf   : > { %vm1400_vm3 = vcmp.eq.s32.totalorder %v1344_v56, 1  ;;  %v1603_v16 = vmin.f32 %v1601_v12, %v1525_v29  ;;  %v1536_v12 = vsel %vm3495_vm12, %v3937_v4, 1e+09  ;;  %v3938_v56 = vld [vmem:[#allocation3_spill] sm:$0xff] }
 0x1c0   : > { %vm1458_vm5 = vmxor %vm1400_vm3, %vm1418_vm8  ;;  %v1368_v21 = vpop.permute.xlu0 %1367  ;;  %v1374_v19 = vpop.permute.xlu2 %1373 }
 0x1c1   : > { %vm1459_vm4 = vmxor %vm1400_vm3, %vm1419_vm2  ;;  %v1522_v20 = vsel %vm1458_vm5, %v3915_v48, 1e+09  ;;  %vm1408_vm3 = vcmp.eq.s32.totalorder %v1368_v21, 1  ;;  %vm1410_vm10 = vcmp.eq.s32.totalorder %v1374_v19, 1 }
 0x1c2   : > { %v1523_v51 = vsel %vm1459_vm4, %v3918_v3, 1e+09  ;;  %v1565_v41 = vmin.f32 %v1563_v0, %v1522_v20  ;;  %vm3522_vm5 = vmxor %vm1408_vm3, %vm1418_vm8 }
 0x1c3   : > { %v1602_v62 = vmin.f32 %v1600_v52, %v1523_v51  ;;  %vm3528_vm4 = vmxor %vm1408_vm3, %vm1419_vm2 }
 0x1c4   : > { %v1567_v5 = vmin.f32 %v1565_v41, %v1526_v43  ;;  %vm1478_vm9 = vmxor %vm1410_vm10, %vm1418_vm8  ;;  %v1538_v41 = vsel %vm3522_vm5, %v3867_v30, 1e+09 }
 0x1c5   : > { %v1604_v2 = vmin.f32 %v1602_v62, %v1527_v54  ;;  %vm1479_vm13 = vmxor %vm1410_vm10, %vm1419_vm2  ;;  %v1542_v62 = vsel %vm1478_vm9, %v3943_v59, 1e+09  ;;  %v3944_v54 = vld [vmem:[#allocation33_spill] sm:$0xff] }
 0x1c6   : > { %v1353_v44 = vpop.permute.xlu1 %1352  ;;  %v1569_v46 = vmin.f32 %v1567_v5, %v1530_v39  ;;  %v1785_v39 = vpop.eup %1784 }
 0x1c7   : > { %vm1403_vm0 = vcmp.eq.s32.totalorder %v1353_v44, 1  ;;  %v1606_v0 = vmin.f32 %v1604_v2, %v1531_v35  ;;  %v1243_v35 = vrot.slane %v3267_v55, 4 }
 0x1c8   : > { %vm1464_vm14 = vmxor %vm1403_vm0, %vm1418_vm8  ;;  %v1377_v24 = vpop.permute.xlu0 %1376 }
 0x1c9   : > { %vm1465_vm11 = vmxor %vm1403_vm0, %vm1419_vm2  ;;  %v1528_v52 = vsel %vm1464_vm14, %v3929_v1, 1e+09  ;;  %vm1411_vm0 = vcmp.eq.s32.totalorder %v1377_v24, 1  ;;  %v1207_v1 = vmin.f32 %v3265_v34, %v1206_v42  ;;  %v1244_v9 = vmin.f32 %v3267_v55, %v1243_v35 }
 0x1ca   : > { %v1529_v27 = vsel %vm1465_vm11, %v3932_v36, 1e+09  ;;  %v1568_v33 = vmin.f32 %v1566_v28, %v1528_v52  ;;  %v1537_v28 = vsel %vm3505_vm7, %v3938_v56, 1e+09  ;;  %vm3553_vm14 = vmxor %vm1411_vm0, %vm1418_vm8 }
 0x1cb   : > { %v1605_v58 = vmin.f32 %v1603_v16, %v1529_v27  ;;  %vm3559_vm11 = vmxor %vm1411_vm0, %vm1419_vm2  ;;  %v1544_v47 = vsel %vm3553_vm14, %v2712_v26, 1e+09  ;;  %v1208_v27 = vrot.slane %v1207_v1, 2  ;;  %vm1655_vm14 = vcmask 1043456  }
 0x1cc   : > { %v1570_v45 = vmin.f32 %v1568_v33, %v1532_v7  ;;  %v1545_v52 = vsel %vm3559_vm11, %v2714_v60, 1e+09  ;;  %v1245_v33 = vrot.slane %v1244_v9, 2  ;;  %vm1665_vm11 = vcmask 1040384  }
 0x1cd   : > { %v1607_v29 = vmin.f32 %v1605_v58, %v1533_v6  ;;  %v1209_v55 = vmin.f32 %v1207_v1, %v1208_v27 }
 0x1ce   : > { %v1362_v16 = vpop.permute.xlu1 %1361  ;;  %v1572_v31 = vmin.f32 %v1570_v45, %v1536_v12  ;;  %v1246_v58 = vmin.f32 %v1244_v9, %v1245_v33 }
 0x1cf   : > { %vm1406_vm6 = vcmp.eq.s32.totalorder %v1362_v16, 1  ;;  %v1609_v20 = vmin.f32 %v1607_v29, %v1537_v28  ;;  %v1644_v29 = vor.u32 1.1754944e-38, %v1643_v37 }
 0x1d0   : > { %vm1470_vm15 = vmxor %vm1406_vm6, %vm1418_vm8  ;;  %v1247_v4 = vrot.slane %v1246_v58, 1 }
 0x1d1   : > { %vm1471_vm1 = vmxor %vm1406_vm6, %vm1419_vm2  ;;  %v1534_v11 = vsel %vm1470_vm15, %v3869_v23, 1e+09  ;;  %v1539_v23 = vsel %vm3528_vm4, %v3868_v18, 1e+09  ;;  %vm1637_vm6 = vweird.f32 %v3515_v15  ;;  %vm1638_vm15 = vweird.f32 %v1785_v39 }
 0x1d2   : > { %v1535_v3 = vsel %vm1471_vm1, %v3870_v40, 1e+09  ;;  %v1571_v51 = vmin.f32 %v1569_v46, %v1534_v11  ;;  %v1543_v40 = vsel %vm1479_vm13, %v3944_v54, 1e+09  ;;  %v1633_v46 = vmul.f32 %v1785_v39, %v3515_v15 }
 0x1d3   : > { %v1608_v8 = vmin.f32 %v1606_v0, %v1535_v3  ;;  %v1248_v48 = vmin.f32 %v1246_v58, %v1247_v4 }
 0x1d4   : > { %v1573_v43 = vmin.f32 %v1571_v51, %v1538_v41 }
 0x1d5   : > { %v1610_v50 = vmin.f32 %v1608_v8, %v1539_v23  ;;  %vm1250_vm9 = vcmp.gt.f32.partialorder %v1248_v48, 5e+08 }
 0x1d6   : > { %v1371_v30 = vpop.permute.xlu1 %1370  ;;  %v1575_v61 = vmin.f32 %v1573_v43, %v1542_v62  ;;  %v1252_v43 = vsel %vm1250_vm9, 0.0, %v1248_v48 }
 0x1d7   : > { %vm1409_vm12 = vcmp.eq.s32.totalorder %v1371_v30, 1  ;;  %v1612_v18 = vmin.f32 %v1610_v50, %v1543_v40 }
 0x1d8   : > { %vm1476_vm7 = vmxor %vm1409_vm12, %vm1418_vm8 }
 0x1d9   : > { %vm1477_vm3 = vmxor %vm1409_vm12, %vm1419_vm2  ;;  %v1540_v63 = vsel %vm1476_vm7, %v2698_v14, 1e+09  ;;  %vm1681_vm12 = vcmask 0  }
 0x1da   : > { %v1541_v21 = vsel %vm1477_vm3, %v3879_v22, 1e+09  ;;  %v1574_v44 = vmin.f32 %v1572_v31, %v1540_v63  ;;  %v1634_v22 = vsub.f32 1.0, %v1633_v46 }
 0x1db   : > { %v1611_v0 = vmin.f32 %v1609_v20, %v1541_v21 }
 0x1dc   : > { %v1576_v49 = vmin.f32 %v1574_v44, %v1544_v47  ;;  %v1635_v13 = vmul.f32 %v1785_v39, %v1634_v22 }
 0x1dd   : > { %v1613_v14 = vmin.f32 %v1611_v0, %v1545_v52 }
 0x1de   : > { %v1380_v36 = vpop.permute.xlu1 %1379  ;;  %v1636_v19 = vadd.f32 %v1785_v39, %v1635_v13 }
 0x1df   : > { %vm1412_vm5 = vcmp.eq.s32.totalorder %v1380_v36, 1 }
 0x1e0   : > { %vm1482_vm4 = vmxor %vm1412_vm5, %vm1418_vm8 }
 0x1e1   : > { %vm1483_vm10 = vmxor %vm1412_vm5, %vm1419_vm2  ;;  %v1546_v26 = vsel %vm1482_vm4, %v2727_v25, 1e+09  ;;  %v1210_v25 = vrot.slane %v1209_v55, 1  ;;  %vm1642_vm2 = vcmp.eq.f32.partialorder %v1641_v53, 8.507059e+37 }
 0x1e2   : > { %v1547_v34 = vsel %vm1483_vm10, %v2729_v32, 1e+09  ;;  %v1577_v60 = vmin.f32 %v1575_v61, %v1546_v26  ;;  %vm1639_vm8 = vmor %vm1637_vm6, %vm1638_vm15 }
 0x1e3   : > { %v1614_v7 = vmin.f32 %v1612_v18, %v1547_v34  ;;  %v1640_v28 = vsel %vm1639_vm8, %v1785_v39, %v1636_v19  ;;  %v1211_v16 = vmin.f32 %v1209_v55, %v1210_v25 }
 0x1e4   : > { %v1578_v10 = vmin.f32 %v1576_v49, %v1577_v60  ;;  %v1645_v24 = vsel %vm1642_vm2, %v1644_v29, %v1640_v28 }
 0x1e5   : > { %v1615_v57 = vmin.f32 %v1613_v14, %v1614_v7  ;;  %vm1249_vm1 = vcmp.gt.f32.partialorder %v1211_v16, 5e+08  ;;  %v1648_v51 = vrot.slane %v1645_v24, 7 }
 0x1e6   : > { %v1579_v6 = vrot.slane %v1578_v10, 4  ;;  %v1251_v8 = vsel %vm1249_vm1, 0.0, %v1211_v16 }
 0x1e7   : > { %v1616_v45 = vrot.slane %v1615_v57, 4  ;;  %v1650_v50 = vsub.f32 %v3914_v17, %v1648_v51 }
 0x1e8   : > { %v1580_v32 = vmin.f32 %v1578_v10, %v1579_v6 }
 0x1e9   : > { %v1617_v12 = vmin.f32 %v1615_v57, %v1616_v45  ;;  %v1651_v5 = vmul.f32 %v1650_v50, %v1650_v50 }
 0x1ea   : > { %v1581_v56 = vrot.slane %v1580_v32, 2 }
 0x1eb   : > { %v1618_v38 = vrot.slane %v1617_v12, 2 }
 0x1ec   : > { %v1582_v31 = vmin.f32 %v1580_v32, %v1581_v56 }
 0x1ed   : > { %v1619_v20 = vmin.f32 %v1617_v12, %v1618_v38 }
 0x1ee   : > { %v1583_v11 = vrot.slane %v1582_v31, 1 }
 0x1ef   : > { %v1620_v3 = vrot.slane %v1619_v20, 1 }
 0x1f0   : > { %v1584_v15 = vmin.f32 %v1582_v31, %v1583_v11 }
 0x1f1   : > { %v1621_v41 = vmin.f32 %v1619_v20, %v1620_v3 }
 0x1f2   : > { %vm1622_vm13 = vcmp.gt.f32.partialorder %v1584_v15, 5e+08 }
 0x1f3   : > { %vm1623_vm0 = vcmp.gt.f32.partialorder %v1621_v41, 5e+08  ;;  %v1624_v23 = vsel %vm1622_vm13, 0.0, %v1584_v15 }
 0x1f4   : > { %v1625_v59 = vsel %vm1623_vm0, 0.0, %v1621_v41  ;;  %v1626_v62 = vadd.f32 %v1624_v23, %v1251_v8 }
 0x1f5   : > { %v1627_v54 = vadd.f32 %v1625_v59, %v1252_v43 }
 0x1f7   : > { %v1654_v40 = vrot.slane %v1627_v54, 4 }
 0x1f9   : > { %v1656_v30 = vsel %vm1655_vm14, %v1626_v62, %v1654_v40 }
 0x1fa   : > { %v1657_v61 = vrot.slane %v1656_v30, 7 }
 0x1fc   : > { %v1659_v39 = vmul.f32 %v1657_v61, %v1651_v5 }
 0x1fe   : > { %v1661_v2 = vperm.slane %v1659_v39, 1  ;;  %v1662_v18 = vperm.slane %v1659_v39, 5 }
 0x200   : > { %v1666_v42 = vsel %vm1665_vm11, %v1661_v2, 0.0  ;;  %v1667_v35 = vsel %vm1665_vm11, %v1662_v18, 0.0 }
 0x201   : > { %v1668_v63 = vadd.f32 %v1667_v35, %v1666_v42 }
 0x203   : > { %1669 = vadd.xlane.f32.xlu2 %v1668_v63 }
 0x276   : > { %v1670_v21 = vpop.xlane.xlu2 %1669 }
 0x277   : > { %v1671_v44 = vrot.slane %v1670_v21, 4 }
 0x279   : > { %v1672_v46 = vadd.f32 %v1671_v44, %v1670_v21 }
 0x27b   : > { %v1673_v47 = vrot.slane %v1672_v46, 2 }
 0x27d   : > { %v1674_v17 = vadd.f32 %v1673_v47, %v1672_v46 }
 0x27f   : > { %v1675_v0 = vrot.slane %v1674_v17, 1 }
 0x281   : > { %v1676_v1 = vadd.f32 %v1675_v0, %v1674_v17 }
 0x283   : > { %1756 = vpush %v1676_v1 }
 0x2b4   : > { %s1757_s19 = spop %1756 }
 0x2b5   : > { %s1678_s23 = smul.f32 2.9802322e-08, %s1757_s19 }
 0x2b7   : > { %v1679_v52 = vstv %s1678_s23 }
 0x2b8   : > { %1682 = vst.msk [vmem:[%s159_s22] sm:$0x1] %vm1681_vm12, %v1679_v52 }
 0x2b9 PF: > { %s12_s9 = sadd.s32 1, %s1822_s9  }
 0x2ba   : > { %p9_p4 = scmp.ge.s32.totalorder %s12_s9, 4  }
 0x2bc   :  { %11 = sbr.rel (!%p9_p4) target bundleno = 1 (0x1), region = 61 }

</bundles_post_ra>
